<compile_context>
chip_gen: v5e
topology: v5e:2x2
jax: 0.10.0
libtpu: 0.0.40
codegen_flags: <defaults>
</compile_context>

<pallas_src>
import functools
import math

import jax
import jax.numpy as jnp
from jax.experimental import pallas as pl
from jax.experimental.pallas import tpu as pltpu

EPS = 1e-5
LANES = 128
VMEM_LIMIT = 32 * 1024 * 1024   # safe on v5e/v6e/v7x; blocks here are far smaller


# ---------------------------------------------------------------------------
# kernels
# ---------------------------------------------------------------------------

def _conv1x1_stats_kernel(x_ref, w_ref, h_ref, s_ref):
    """(TM, Ci) @ (Ci, Co) 1x1 conv on flattened rows + per-tile (sum, sum-sq)."""
    h = jnp.dot(x_ref[...], w_ref[...], preferred_element_type=jnp.float32)
    h_ref[...] = h.astype(h_ref.dtype)
    s_ref[0] = jnp.concatenate(
        [jnp.sum(h, axis=0, keepdims=True),
         jnp.sum(h * h, axis=0, keepdims=True)], axis=0)


def _bn_relu_conv3x3_stats_kernel(h_ref, ss_ref, w_ref, o_ref, s_ref, *, H, W):
    """a = relu(bn(h)); o = conv3x3(a) as ONE long-K MXU matmul; stats of o.

    The 9 taps are static slices of a zero-bordered copy of `a` (no rolls, no
    boundary-mask loads/multiplies) concatenated along K, so the MXU accumulates
    all taps internally (MRF on v5e/v6e, in-place MRB on v7x).
    """
    HW, C = h_ref.shape
    scale = ss_ref[0:1, :]
    shift = ss_ref[1:2, :]
    a = jnp.maximum(h_ref[...].astype(jnp.float32) * scale + shift, 0.0)
    a = a.astype(jnp.bfloat16).reshape(H, W, C)      # single reshape after BN+ReLU

    # zero border == conv zero padding (built with concatenates only)
    zc = jnp.zeros((H, 1, C), jnp.bfloat16)
    zr = jnp.zeros((1, W + 2, C), jnp.bfloat16)
    ap = jnp.concatenate([zr, jnp.concatenate([zc, a, zc], axis=1), zr], axis=0)

    taps = [ap[ky:ky + H, kx:kx + W, :] for ky in range(3) for kx in range(3)]
    big = jnp.concatenate(taps, axis=-1).reshape(HW, 9 * C)
    acc = jnp.dot(big, w_ref[...], preferred_element_type=jnp.float32)

    o_ref[...] = acc.astype(o_ref.dtype)
    s_ref[0] = jnp.concatenate(
        [jnp.sum(acc, axis=0, keepdims=True),
         jnp.sum(acc * acc, axis=0, keepdims=True)], axis=0)


def _bn_relu_conv1x1_stats_kernel(h_ref, ss_ref, w_ref, o_ref, s_ref):
    """a = relu(bn(h)); o = a @ w (1x1 conv); per-tile stats of o."""
    scale = ss_ref[0:1, :]
    shift = ss_ref[1:2, :]
    a = jnp.maximum(h_ref[...].astype(jnp.float32) * scale + shift, 0.0)
    o = jnp.dot(a.astype(jnp.bfloat16), w_ref[...],
                preferred_element_type=jnp.float32)
    o_ref[...] = o.astype(o_ref.dtype)
    s_ref[0] = jnp.concatenate(
        [jnp.sum(o, axis=0, keepdims=True),
         jnp.sum(o * o, axis=0, keepdims=True)], axis=0)


def _bn_residual_relu_kernel(h_ref, ss_ref, x_ref, o_ref):
    """out = relu(bn3(h) + x); h and x arrive bf16 and are widened in-kernel."""
    scale = ss_ref[0:1, :]
    shift = ss_ref[1:2, :]
    y = (h_ref[...].astype(jnp.float32) * scale + shift
         + x_ref[...].astype(jnp.float32))
    o_ref[...] = jnp.maximum(y, 0.0)


# ---------------------------------------------------------------------------
# host-side helpers
# ---------------------------------------------------------------------------

def _round_up(v, m):
    return (v + m - 1) // m * m


def _pad_axis(a, target, axis):
    pad = target - a.shape[axis]
    if pad == 0:
        return a
    widths = [(0, 0)] * a.ndim
    widths[axis] = (0, pad)
    return jnp.pad(a, widths)


def _bytes_of(*xs):
    return int(sum(math.prod(x.shape) * jnp.dtype(x.dtype).itemsize for x in xs))


def _pick_row_tile(nrows, cap=512):
    """Largest multiple of 8 <= cap that divides nrows (keeps stats exact)."""
    t = min(cap, nrows)
    t -= t % 8
    while t >= 8:
        if nrows % t == 0:
            return t
        t -= 8
    raise ValueError("N*H*W must be a multiple of 8")


def _bn_affine(partial_stats, gamma, beta, count):
    """Fold full-batch mean/var (from per-tile partial sums) + gamma/beta into a
    per-channel (scale, shift) pair so that bn(x) == x*scale + shift."""
    sums = jnp.sum(partial_stats, axis=0)                    # (2, C), f32
    mean = sums[0] / count
    var = jnp.maximum(sums[1] / count - mean * mean, 0.0)    # biased batch var
    scale = gamma * jax.lax.rsqrt(var + EPS)
    shift = beta - mean * scale
    return jnp.stack([scale, shift], axis=0).astype(jnp.float32)


# ---------------------------------------------------------------------------
# public wrapper
# ---------------------------------------------------------------------------

def bottleneck(x_nchw, w1_t, w2_t, w3_t, g1, b1, g2, b2, g3, b3):
    """Bottleneck forward. x_nchw: (N, Cin, H, W); conv weights in PyTorch OIHW."""
    N, Cin, H, W = x_nchw.shape
    P = w1_t.shape[0]
    Cout = w3_t.shape[0]
    assert Cin == Cout, "identity residual requires inplanes == planes * 4"
    assert (H * W) % 8 == 0, "demo supports H*W that is a multiple of 8"

    Ci = _round_up(Cin, LANES)     # lane-dense in/out channel width
    Cm = _round_up(P, LANES)       # lane-dense bottleneck channel width
    nhw = N * H * W
    TM = _pick_row_tile(nhw)       # row tile for the 1x1 / elementwise passes
    T = nhw // TM

    # ---- layout: NCHW -> flattened NHWC rows, channels zero-padded to x128 ----
    x_rows = jnp.transpose(x_nchw, (0, 2, 3, 1)).reshape(nhw, Cin)
    xb = _pad_axis(x_rows, Ci, 1).astype(jnp.bfloat16)   # MXU operand + residual

    w1 = _pad_axis(_pad_axis(jnp.transpose(w1_t[:, :, 0, 0], (1, 0)), Ci, 0),
                   Cm, 1).astype(jnp.bfloat16)                      # (Ci, Cm)
    w2 = _pad_axis(_pad_axis(
        jnp.transpose(w2_t, (2, 3, 1, 0)).reshape(9, P, P), Cm, 1),
        Cm, 2).reshape(9 * Cm, Cm).astype(jnp.bfloat16)             # (9*Cm, Cm)
    w3 = _pad_axis(_pad_axis(jnp.transpose(w3_t[:, :, 0, 0], (1, 0)), Cm, 0),
                   Ci, 1).astype(jnp.bfloat16)                      # (Cm, Ci)

    g1p = _pad_axis(g1.astype(jnp.float32), Cm, 0)
    b1p = _pad_axis(b1.astype(jnp.float32), Cm, 0)
    g2p = _pad_axis(g2.astype(jnp.float32), Cm, 0)
    b2p = _pad_axis(b2.astype(jnp.float32), Cm, 0)
    g3p = _pad_axis(g3.astype(jnp.float32), Ci, 0)
    b3p = _pad_axis(b3.astype(jnp.float32), Ci, 0)

    cparams = pltpu.CompilerParams(
        dimension_semantics=("parallel",),          # megacore sharding on v7x
        vmem_limit_bytes=VMEM_LIMIT)

    row_in = pl.BlockSpec((TM, Ci), lambda i: (i, 0))
    row_mid = pl.BlockSpec((TM, Cm), lambda i: (i, 0))
    stats_mid_t = pl.BlockSpec((1, 2, Cm), lambda i: (i, 0, 0))
    stats_in_t = pl.BlockSpec((1, 2, Ci), lambda i: (i, 0, 0))
    samp_mid = pl.BlockSpec((H * W, Cm), lambda n: (n, 0))
    samp_stats = pl.BlockSpec((1, 2, Cm), lambda n: (n, 0, 0))

    def full_spec(shape):
        return pl.BlockSpec(shape, lambda i: (0,) * len(shape))

    # ---- pass 1: conv1 (1x1) + batch stats, row-tiled -------------------------
    h1_sds = jax.ShapeDtypeStruct((nhw, Cm), jnp.bfloat16)
    s1_sds = jax.ShapeDtypeStruct((T, 2, Cm), jnp.float32)
    h1, s1 = pl.pallas_call(
        _conv1x1_stats_kernel,
        grid=(T,),
        in_specs=[row_in, full_spec((Ci, Cm))],
        out_specs=(row_mid, stats_mid_t),
        out_shape=(h1_sds, s1_sds),
        compiler_params=cparams,
        cost_estimate=pl.CostEstimate(
            flops=2 * nhw * Ci * Cm, transcendentals=0,
            bytes_accessed=_bytes_of(xb, w1, h1_sds, s1_sds)),
    )(xb, w1)
    ss1 = _bn_affine(s1, g1p, b1p, nhw)

    # ---- pass 2: bn1 + relu + conv2 (3x3), one sample per grid step -----------
    h2_sds = jax.ShapeDtypeStruct((nhw, Cm), jnp.bfloat16)
    s2_sds = jax.ShapeDtypeStruct((N, 2, Cm), jnp.float32)
    h2, s2 = pl.pallas_call(
        functools.partial(_bn_relu_conv3x3_stats_kernel, H=H, W=W),
        grid=(N,),
        in_specs=[samp_mid, full_spec((2, Cm)), full_spec((9 * Cm, Cm))],
        out_specs=(samp_mid, samp_stats),
        out_shape=(h2_sds, s2_sds),
        compiler_params=cparams,
        cost_estimate=pl.CostEstimate(
            flops=2 * nhw * 9 * Cm * Cm, transcendentals=0,
            bytes_accessed=_bytes_of(h1_sds, ss1, w2, h2_sds, s2_sds)),
    )(h1, ss1, w2)
    ss2 = _bn_affine(s2, g2p, b2p, nhw)

    # ---- pass 3: bn2 + relu + conv3 (1x1) + stats, row-tiled, bf16 writeback ---
    h3_sds = jax.ShapeDtypeStruct((nhw, Ci), jnp.bfloat16)
    s3_sds = jax.ShapeDtypeStruct((T, 2, Ci), jnp.float32)
    h3, s3 = pl.pallas_call(
        _bn_relu_conv1x1_stats_kernel,
        grid=(T,),
        in_specs=[row_mid, full_spec((2, Cm)), full_spec((Cm, Ci))],
        out_specs=(row_in, stats_in_t),
        out_shape=(h3_sds, s3_sds),
        compiler_params=cparams,
        cost_estimate=pl.CostEstimate(
            flops=2 * nhw * Cm * Ci, transcendentals=0,
            bytes_accessed=_bytes_of(h2_sds, ss2, w3, h3_sds, s3_sds)),
    )(h2, ss2, w3)
    ss3 = _bn_affine(s3, g3p, b3p, nhw)

    # ---- pass 4: bn3 + identity residual + relu, row-tiled, bf16 reads ---------
    out_sds = jax.ShapeDtypeStruct((nhw, Ci), jnp.float32)
    out_rows = pl.pallas_call(
        _bn_residual_relu_kernel,
        grid=(T,),
        in_specs=[row_in, full_spec((2, Ci)), row_in],
        out_specs=row_in,
        out_shape=out_sds,
        compiler_params=cparams,
        cost_estimate=pl.CostEstimate(
            flops=4 * nhw * Ci, transcendentals=0,
            bytes_accessed=_bytes_of(h3_sds, ss3, xb, out_sds)),
    )(h3, ss3, xb)

    out = out_rows[:, :Cout].reshape(N, H, W, Cout)
    return jnp.transpose(out, (0, 3, 1, 2))      # back to PyTorch NCHW


# ---------------------------------------------------------------------------
# plain-JAX reference (f32, NCHW, same training-mode BatchNorm semantics)
# ---------------------------------------------------------------------------

def bottleneck_ref(x, w1_t, w2_t, w3_t, g1, b1, g2, b2, g3, b3):
    def conv(x, w, padding=0):
        return jax.lax.conv_general_dilated(
            x, w, (1, 1), [(padding, padding), (padding, padding)],
            dimension_numbers=('NCHW', 'OIHW', 'NCHW'))

    def bn(x, g, b):
        mean = x.mean(axis=(0, 2, 3), keepdims=True)
        var = jnp.square(x - mean).mean(axis=(0, 2, 3), keepdims=True)
        return ((x - mean) * jax.lax.rsqrt(var + EPS) * g.reshape(1, -1, 1, 1)
                + b.reshape(1, -1, 1, 1))

    out = jax.nn.relu(bn(conv(x, w1_t), g1, b1))
    out = jax.nn.relu(bn(conv(out, w2_t, padding=1), g2, b2))
    out = bn(conv(out, w3_t), g3, b3)
    return jax.nn.relu(out + x)


if __name__ == "__main__":
    key = jax.random.PRNGKey(0)
    planes = 4
    inplanes = planes * 4          # so the identity residual is valid
    N, H, W = 2, 16, 16

    ks = jax.random.split(key, 10)
    x = jax.random.normal(ks[0], (N, inplanes, H, W), jnp.float32)
    # deterministic synthetic parameters (PyTorch OIHW conv weights, no bias)
    w1_t = jax.random.normal(ks[1], (planes, inplanes, 1, 1), jnp.float32) * 0.1
    w2_t = jax.random.normal(ks[2], (planes, planes, 3, 3), jnp.float32) * 0.1
    w3_t = jax.random.normal(ks[3], (planes * 4, planes, 1, 1), jnp.float32) * 0.1
    g1 = 1.0 + 0.1 * jax.random.normal(ks[4], (planes,), jnp.float32)
    b1 = 0.1 * jax.random.normal(ks[5], (planes,), jnp.float32)
    g2 = 1.0 + 0.1 * jax.random.normal(ks[6], (planes,), jnp.float32)
    b2 = 0.1 * jax.random.normal(ks[7], (planes,), jnp.float32)
    g3 = 1.0 + 0.1 * jax.random.normal(ks[8], (planes * 4,), jnp.float32)
    b3 = 0.1 * jax.random.normal(ks[9], (planes * 4,), jnp.float32)

    out = jax.jit(bottleneck)(x, w1_t, w2_t, w3_t, g1, b1, g2, b2, g3, b3)
    out = jax.block_until_ready(out)

    ref = bottleneck_ref(x, w1_t, w2_t, w3_t, g1, b1, g2, b2, g3, b3)
    max_err = float(jnp.max(jnp.abs(out - ref)))
    mean_err = float(jnp.mean(jnp.abs(out - ref)))
    assert out.shape == (N, planes * 4, H, W)
    # bf16 MXU operands, bf16 intermediate activations and bf16 residual stream
    # => looser tolerance than the pure-f32 reference pipeline.
    assert max_err < 1.5e-1 and mean_err < 2e-2, (
        f"mismatch vs reference: max={max_err} mean={mean_err}")
    print("KERNEL_OK")
</pallas_src>

<mosaic_0001>
module attributes {stable_mosaic.version = 11 : i64} {
  func.func @_conv1x1_stats_kernel(%arg0: i32, %arg1: memref<512x128xbf16, #tpu.memory_space<vmem>>, %arg2: memref<128x128xbf16, #tpu.memory_space<vmem>>, %arg3: memref<512x128xbf16, #tpu.memory_space<vmem>>, %arg4: memref<1x2x128xf32, #tpu.memory_space<vmem>>) attributes {dimension_semantics = [#tpu.dimension_semantics<parallel>], iteration_bounds = array<i64: 1>, scalar_prefetch = 0 : i64, scratch_operands = 0 : i64, tpu.core_type = #tpu.core_type<tc>, window_params = [{transform_indices = @transform_0, window_bounds = array<i64: 512, 128>}, {pipeline_mode = #tpu.pipeline_mode<synchronous>, transform_indices = @transform_1, window_bounds = array<i64: 128, 128>}, {transform_indices = @transform_2, window_bounds = array<i64: 512, 128>}, {transform_indices = @transform_3, window_bounds = array<i64: 1, 2, 128>}]} {
    %c0 = arith.constant 0 : index
    %c0_0 = arith.constant 0 : index
    %0 = vector.load %arg1[%c0, %c0_0] : memref<512x128xbf16, #tpu.memory_space<vmem>>, vector<512x128xbf16>
    %c0_1 = arith.constant 0 : index
    %c0_2 = arith.constant 0 : index
    %1 = vector.load %arg2[%c0_1, %c0_2] : memref<128x128xbf16, #tpu.memory_space<vmem>>, vector<128x128xbf16>
    %cst = arith.constant dense<0.000000e+00> : vector<512x128xf32>
    %2 = tpu.matmul %0, %1, %cst {dimension_numbers = #tpu.dot_dimension_numbers<[1], [0], [0], [1], [0, 0, 1, 1], [], []>} : vector<512x128xbf16>, vector<128x128xbf16>, vector<512x128xf32> -> vector<512x128xf32>
    %3 = arith.truncf %2 : vector<512x128xf32> to vector<512x128xbf16>
    %c0_3 = arith.constant 0 : index
    %c0_4 = arith.constant 0 : index
    %4 = vector.load %arg3[%c0_3, %c0_4] : memref<512x128xbf16, #tpu.memory_space<vmem>>, vector<512x128xbf16>
    tpu.vector_store %arg3[%c0_3, %c0_4], %3 {strides = array<i32>} : memref<512x128xbf16, #tpu.memory_space<vmem>>, vector<512x128xbf16>,
    %cst_5 = arith.constant dense<0.000000e+00> : vector<128xf32>
    %5 = vector.multi_reduction <add>, %2, %cst_5 [0] : vector<512x128xf32> to vector<128xf32>
    %6 = vector.shape_cast %5 : vector<128xf32> to vector<1x128xf32>
    %7 = arith.mulf %2, %2 : vector<512x128xf32>
    %cst_6 = arith.constant dense<0.000000e+00> : vector<128xf32>
    %8 = vector.multi_reduction <add>, %7, %cst_6 [0] : vector<512x128xf32> to vector<128xf32>
    %9 = vector.shape_cast %8 : vector<128xf32> to vector<1x128xf32>
    %10 = tpu.concatenate %6, %9 in 0 : vector<1x128xf32>, vector<1x128xf32> -> vector<2x128xf32>
    %c0_7 = arith.constant 0 : index
    %c0_8 = arith.constant 0 : index
    %c0_9 = arith.constant 0 : index
    %11 = vector.load %arg4[%c0_7, %c0_8, %c0_9] : memref<1x2x128xf32, #tpu.memory_space<vmem>>, vector<1x2x128xf32>
    %12 = vector.shape_cast %11 : vector<1x2x128xf32> to vector<2x128xf32>
    %13 = vector.shape_cast %10 : vector<2x128xf32> to vector<1x2x128xf32>
    tpu.vector_store %arg4[%c0_7, %c0_8, %c0_9], %13 {strides = array<i32>} : memref<1x2x128xf32, #tpu.memory_space<vmem>>, vector<1x2x128xf32>,
    return
  }
  func.func @transform_0(%arg0: i32) -> (i32, i32) {
    %c0_i32 = arith.constant 0 : i32
    %c0_i32_0 = arith.constant 0 : i32
    return %arg0, %c0_i32 : i32, i32
  }
  func.func @transform_1(%arg0: i32) -> (i32, i32) {
    %c0_i32 = arith.constant 0 : i32
    %c0_i32_0 = arith.constant 0 : i32
    %c0_i32_1 = arith.constant 0 : i32
    return %c0_i32, %c0_i32_0 : i32, i32
  }
  func.func @transform_2(%arg0: i32) -> (i32, i32) {
    %c0_i32 = arith.constant 0 : i32
    %c0_i32_0 = arith.constant 0 : i32
    return %arg0, %c0_i32 : i32, i32
  }
  func.func @transform_3(%arg0: i32) -> (i32, i32, i32) {
    %c0_i32 = arith.constant 0 : i32
    %c0_i32_0 = arith.constant 0 : i32
    %c0_i32_1 = arith.constant 0 : i32
    return %arg0, %c0_i32, %c0_i32_0 : i32, i32, i32
  }
}

module attributes {stable_mosaic.version = 11 : i64} {
  func.func @_bn_relu_conv3x3_stats_kernel(%arg0: i32, %arg1: memref<256x128xbf16, #tpu.memory_space<vmem>>, %arg2: memref<2x128xf32, #tpu.memory_space<vmem>>, %arg3: memref<1152x128xbf16, #tpu.memory_space<vmem>>, %arg4: memref<256x128xbf16, #tpu.memory_space<vmem>>, %arg5: memref<1x2x128xf32, #tpu.memory_space<vmem>>) attributes {dimension_semantics = [#tpu.dimension_semantics<parallel>], iteration_bounds = array<i64: 2>, scalar_prefetch = 0 : i64, scratch_operands = 0 : i64, tpu.core_type = #tpu.core_type<tc>, window_params = [{transform_indices = @transform_0, window_bounds = array<i64: 256, 128>}, {pipeline_mode = #tpu.pipeline_mode<synchronous>, transform_indices = @transform_1, window_bounds = array<i64: 2, 128>}, {pipeline_mode = #tpu.pipeline_mode<synchronous>, transform_indices = @transform_2, window_bounds = array<i64: 1152, 128>}, {transform_indices = @transform_3, window_bounds = array<i64: 256, 128>}, {transform_indices = @transform_4, window_bounds = array<i64: 1, 2, 128>}]} {
    %c0 = arith.constant 0 : index
    %c0_0 = arith.constant 0 : index
    %0 = vector.load %arg2[%c0, %c0_0] : memref<2x128xf32, #tpu.memory_space<vmem>>, vector<1x128xf32>
    %c1 = arith.constant 1 : index
    %c0_1 = arith.constant 0 : index
    %1 = vector.load %arg2[%c1, %c0_1] : memref<2x128xf32, #tpu.memory_space<vmem>>, vector<1x128xf32>
    %c0_2 = arith.constant 0 : index
    %c0_3 = arith.constant 0 : index
    %2 = vector.load %arg1[%c0_2, %c0_3] : memref<256x128xbf16, #tpu.memory_space<vmem>>, vector<256x128xbf16>
    %3 = arith.extf %2 : vector<256x128xbf16> to vector<256x128xf32>
    %4 = vector.broadcast %0 : vector<1x128xf32> to vector<256x128xf32>
    %5 = arith.mulf %3, %4 : vector<256x128xf32>
    %6 = vector.broadcast %1 : vector<1x128xf32> to vector<256x128xf32>
    %7 = arith.addf %5, %6 : vector<256x128xf32>
    %cst = arith.constant 0.000000e+00 : f32
    %8 = vector.broadcast %cst : f32 to vector<256x128xf32>
    %9 = arith.maximumf %7, %8 : vector<256x128xf32>
    %10 = arith.truncf %9 : vector<256x128xf32> to vector<256x128xbf16>
    %11 = vector.shape_cast %10 : vector<256x128xbf16> to vector<16x16x128xbf16>
    %cst_4 = arith.constant 0.000000e+00 : bf16
    %12 = vector.broadcast %cst_4 : bf16 to vector<16x1x128xbf16>
    %cst_5 = arith.constant 0.000000e+00 : bf16
    %13 = vector.broadcast %cst_5 : bf16 to vector<1x18x128xbf16>
    %14 = tpu.concatenate %12, %11, %12 in 1 : vector<16x1x128xbf16>, vector<16x16x128xbf16>, vector<16x1x128xbf16> -> vector<16x18x128xbf16>
    %15 = tpu.concatenate %13, %14, %13 in 0 : vector<1x18x128xbf16>, vector<16x18x128xbf16>, vector<1x18x128xbf16> -> vector<18x18x128xbf16>
    %16 = vector.extract_strided_slice %15 {offsets = [0, 0, 0], sizes = [16, 16, 128], strides = [1, 1, 1]} : vector<18x18x128xbf16> to vector<16x16x128xbf16>
    %17 = vector.extract_strided_slice %15 {offsets = [0, 1, 0], sizes = [16, 16, 128], strides = [1, 1, 1]} : vector<18x18x128xbf16> to vector<16x16x128xbf16>
    %18 = vector.extract_strided_slice %15 {offsets = [0, 2, 0], sizes = [16, 16, 128], strides = [1, 1, 1]} : vector<18x18x128xbf16> to vector<16x16x128xbf16>
    %19 = vector.extract_strided_slice %15 {offsets = [1, 0, 0], sizes = [16, 16, 128], strides = [1, 1, 1]} : vector<18x18x128xbf16> to vector<16x16x128xbf16>
    %20 = vector.extract_strided_slice %15 {offsets = [1, 1, 0], sizes = [16, 16, 128], strides = [1, 1, 1]} : vector<18x18x128xbf16> to vector<16x16x128xbf16>
    %21 = vector.extract_strided_slice %15 {offsets = [1, 2, 0], sizes = [16, 16, 128], strides = [1, 1, 1]} : vector<18x18x128xbf16> to vector<16x16x128xbf16>
    %22 = vector.extract_strided_slice %15 {offsets = [2, 0, 0], sizes = [16, 16, 128], strides = [1, 1, 1]} : vector<18x18x128xbf16> to vector<16x16x128xbf16>
    %23 = vector.extract_strided_slice %15 {offsets = [2, 1, 0], sizes = [16, 16, 128], strides = [1, 1, 1]} : vector<18x18x128xbf16> to vector<16x16x128xbf16>
    %24 = vector.extract_strided_slice %15 {offsets = [2, 2, 0], sizes = [16, 16, 128], strides = [1, 1, 1]} : vector<18x18x128xbf16> to vector<16x16x128xbf16>
    %25 = tpu.concatenate %16, %17, %18, %19, %20, %21, %22, %23, %24 in 2 : vector<16x16x128xbf16>, vector<16x16x128xbf16>, vector<16x16x128xbf16>, vector<16x16x128xbf16>, vector<16x16x128xbf16>, vector<16x16x128xbf16>, vector<16x16x128xbf16>, vector<16x16x128xbf16>, vector<16x16x128xbf16> -> vector<16x16x1152xbf16>
    %26 = vector.shape_cast %25 : vector<16x16x1152xbf16> to vector<256x1152xbf16>
    %c0_6 = arith.constant 0 : index
    %c0_7 = arith.constant 0 : index
    %27 = vector.load %arg3[%c0_6, %c0_7] : memref<1152x128xbf16, #tpu.memory_space<vmem>>, vector<1152x128xbf16>
    %cst_8 = arith.constant dense<0.000000e+00> : vector<256x128xf32>
    %28 = tpu.matmul %26, %27, %cst_8 {dimension_numbers = #tpu.dot_dimension_numbers<[1], [0], [0], [1], [0, 0, 1, 1], [], []>} : vector<256x1152xbf16>, vector<1152x128xbf16>, vector<256x128xf32> -> vector<256x128xf32>
    %29 = arith.truncf %28 : vector<256x128xf32> to vector<256x128xbf16>
    %c0_9 = arith.constant 0 : index
    %c0_10 = arith.constant 0 : index
    %30 = vector.load %arg4[%c0_9, %c0_10] : memref<256x128xbf16, #tpu.memory_space<vmem>>, vector<256x128xbf16>
    tpu.vector_store %arg4[%c0_9, %c0_10], %29 {strides = array<i32>} : memref<256x128xbf16, #tpu.memory_space<vmem>>, vector<256x128xbf16>,
    %cst_11 = arith.constant dense<0.000000e+00> : vector<128xf32>
    %31 = vector.multi_reduction <add>, %28, %cst_11 [0] : vector<256x128xf32> to vector<128xf32>
    %32 = vector.shape_cast %31 : vector<128xf32> to vector<1x128xf32>
    %33 = arith.mulf %28, %28 : vector<256x128xf32>
    %cst_12 = arith.constant dense<0.000000e+00> : vector<128xf32>
    %34 = vector.multi_reduction <add>, %33, %cst_12 [0] : vector<256x128xf32> to vector<128xf32>
    %35 = vector.shape_cast %34 : vector<128xf32> to vector<1x128xf32>
    %36 = tpu.concatenate %32, %35 in 0 : vector<1x128xf32>, vector<1x128xf32> -> vector<2x128xf32>
    %c0_13 = arith.constant 0 : index
    %c0_14 = arith.constant 0 : index
    %c0_15 = arith.constant 0 : index
    %37 = vector.load %arg5[%c0_13, %c0_14, %c0_15] : memref<1x2x128xf32, #tpu.memory_space<vmem>>, vector<1x2x128xf32>
    %38 = vector.shape_cast %37 : vector<1x2x128xf32> to vector<2x128xf32>
    %39 = vector.shape_cast %36 : vector<2x128xf32> to vector<1x2x128xf32>
    tpu.vector_store %arg5[%c0_13, %c0_14, %c0_15], %39 {strides = array<i32>} : memref<1x2x128xf32, #tpu.memory_space<vmem>>, vector<1x2x128xf32>,
    return
  }
  func.func @transform_0(%arg0: i32) -> (i32, i32) {
    %c0_i32 = arith.constant 0 : i32
    %c0_i32_0 = arith.constant 0 : i32
    return %arg0, %c0_i32 : i32, i32
  }
  func.func @transform_1(%arg0: i32) -> (i32, i32) {
    %c0_i32 = arith.constant 0 : i32
    %c0_i32_0 = arith.constant 0 : i32
    %c0_i32_1 = arith.constant 0 : i32
    return %c0_i32, %c0_i32_0 : i32, i32
  }
  func.func @transform_2(%arg0: i32) -> (i32, i32) {
    %c0_i32 = arith.constant 0 : i32
    %c0_i32_0 = arith.constant 0 : i32
    %c0_i32_1 = arith.constant 0 : i32
    return %c0_i32, %c0_i32_0 : i32, i32
  }
  func.func @transform_3(%arg0: i32) -> (i32, i32) {
    %c0_i32 = arith.constant 0 : i32
    %c0_i32_0 = arith.constant 0 : i32
    return %arg0, %c0_i32 : i32, i32
  }
  func.func @transform_4(%arg0: i32) -> (i32, i32, i32) {
    %c0_i32 = arith.constant 0 : i32
    %c0_i32_0 = arith.constant 0 : i32
    %c0_i32_1 = arith.constant 0 : i32
    return %arg0, %c0_i32, %c0_i32_0 : i32, i32, i32
  }
}

module attributes {stable_mosaic.version = 11 : i64} {
  func.func @_bn_relu_conv1x1_stats_kernel(%arg0: i32, %arg1: memref<512x128xbf16, #tpu.memory_space<vmem>>, %arg2: memref<2x128xf32, #tpu.memory_space<vmem>>, %arg3: memref<128x128xbf16, #tpu.memory_space<vmem>>, %arg4: memref<512x128xbf16, #tpu.memory_space<vmem>>, %arg5: memref<1x2x128xf32, #tpu.memory_space<vmem>>) attributes {dimension_semantics = [#tpu.dimension_semantics<parallel>], iteration_bounds = array<i64: 1>, scalar_prefetch = 0 : i64, scratch_operands = 0 : i64, tpu.core_type = #tpu.core_type<tc>, window_params = [{transform_indices = @transform_0, window_bounds = array<i64: 512, 128>}, {pipeline_mode = #tpu.pipeline_mode<synchronous>, transform_indices = @transform_1, window_bounds = array<i64: 2, 128>}, {pipeline_mode = #tpu.pipeline_mode<synchronous>, transform_indices = @transform_2, window_bounds = array<i64: 128, 128>}, {transform_indices = @transform_3, window_bounds = array<i64: 512, 128>}, {transform_indices = @transform_4, window_bounds = array<i64: 1, 2, 128>}]} {
    %c0 = arith.constant 0 : index
    %c0_0 = arith.constant 0 : index
    %0 = vector.load %arg2[%c0, %c0_0] : memref<2x128xf32, #tpu.memory_space<vmem>>, vector<1x128xf32>
    %c1 = arith.constant 1 : index
    %c0_1 = arith.constant 0 : index
    %1 = vector.load %arg2[%c1, %c0_1] : memref<2x128xf32, #tpu.memory_space<vmem>>, vector<1x128xf32>
    %c0_2 = arith.constant 0 : index
    %c0_3 = arith.constant 0 : index
    %2 = vector.load %arg1[%c0_2, %c0_3] : memref<512x128xbf16, #tpu.memory_space<vmem>>, vector<512x128xbf16>
    %3 = arith.extf %2 : vector<512x128xbf16> to vector<512x128xf32>
    %4 = vector.broadcast %0 : vector<1x128xf32> to vector<512x128xf32>
    %5 = arith.mulf %3, %4 : vector<512x128xf32>
    %6 = vector.broadcast %1 : vector<1x128xf32> to vector<512x128xf32>
    %7 = arith.addf %5, %6 : vector<512x128xf32>
    %cst = arith.constant 0.000000e+00 : f32
    %8 = vector.broadcast %cst : f32 to vector<512x128xf32>
    %9 = arith.maximumf %7, %8 : vector<512x128xf32>
    %10 = arith.truncf %9 : vector<512x128xf32> to vector<512x128xbf16>
    %c0_4 = arith.constant 0 : index
    %c0_5 = arith.constant 0 : index
    %11 = vector.load %arg3[%c0_4, %c0_5] : memref<128x128xbf16, #tpu.memory_space<vmem>>, vector<128x128xbf16>
    %cst_6 = arith.constant dense<0.000000e+00> : vector<512x128xf32>
    %12 = tpu.matmul %10, %11, %cst_6 {dimension_numbers = #tpu.dot_dimension_numbers<[1], [0], [0], [1], [0, 0, 1, 1], [], []>} : vector<512x128xbf16>, vector<128x128xbf16>, vector<512x128xf32> -> vector<512x128xf32>
    %13 = arith.truncf %12 : vector<512x128xf32> to vector<512x128xbf16>
    %c0_7 = arith.constant 0 : index
    %c0_8 = arith.constant 0 : index
    %14 = vector.load %arg4[%c0_7, %c0_8] : memref<512x128xbf16, #tpu.memory_space<vmem>>, vector<512x128xbf16>
    tpu.vector_store %arg4[%c0_7, %c0_8], %13 {strides = array<i32>} : memref<512x128xbf16, #tpu.memory_space<vmem>>, vector<512x128xbf16>,
    %cst_9 = arith.constant dense<0.000000e+00> : vector<128xf32>
    %15 = vector.multi_reduction <add>, %12, %cst_9 [0] : vector<512x128xf32> to vector<128xf32>
    %16 = vector.shape_cast %15 : vector<128xf32> to vector<1x128xf32>
    %17 = arith.mulf %12, %12 : vector<512x128xf32>
    %cst_10 = arith.constant dense<0.000000e+00> : vector<128xf32>
    %18 = vector.multi_reduction <add>, %17, %cst_10 [0] : vector<512x128xf32> to vector<128xf32>
    %19 = vector.shape_cast %18 : vector<128xf32> to vector<1x128xf32>
    %20 = tpu.concatenate %16, %19 in 0 : vector<1x128xf32>, vector<1x128xf32> -> vector<2x128xf32>
    %c0_11 = arith.constant 0 : index
    %c0_12 = arith.constant 0 : index
    %c0_13 = arith.constant 0 : index
    %21 = vector.load %arg5[%c0_11, %c0_12, %c0_13] : memref<1x2x128xf32, #tpu.memory_space<vmem>>, vector<1x2x128xf32>
    %22 = vector.shape_cast %21 : vector<1x2x128xf32> to vector<2x128xf32>
    %23 = vector.shape_cast %20 : vector<2x128xf32> to vector<1x2x128xf32>
    tpu.vector_store %arg5[%c0_11, %c0_12, %c0_13], %23 {strides = array<i32>} : memref<1x2x128xf32, #tpu.memory_space<vmem>>, vector<1x2x128xf32>,
    return
  }
  func.func @transform_0(%arg0: i32) -> (i32, i32) {
    %c0_i32 = arith.constant 0 : i32
    %c0_i32_0 = arith.constant 0 : i32
    return %arg0, %c0_i32 : i32, i32
  }
  func.func @transform_1(%arg0: i32) -> (i32, i32) {
    %c0_i32 = arith.constant 0 : i32
    %c0_i32_0 = arith.constant 0 : i32
    %c0_i32_1 = arith.constant 0 : i32
    return %c0_i32, %c0_i32_0 : i32, i32
  }
  func.func @transform_2(%arg0: i32) -> (i32, i32) {
    %c0_i32 = arith.constant 0 : i32
    %c0_i32_0 = arith.constant 0 : i32
    %c0_i32_1 = arith.constant 0 : i32
    return %c0_i32, %c0_i32_0 : i32, i32
  }
  func.func @transform_3(%arg0: i32) -> (i32, i32) {
    %c0_i32 = arith.constant 0 : i32
    %c0_i32_0 = arith.constant 0 : i32
    return %arg0, %c0_i32 : i32, i32
  }
  func.func @transform_4(%arg0: i32) -> (i32, i32, i32) {
    %c0_i32 = arith.constant 0 : i32
    %c0_i32_0 = arith.constant 0 : i32
    %c0_i32_1 = arith.constant 0 : i32
    return %arg0, %c0_i32, %c0_i32_0 : i32, i32, i32
  }
}

module attributes {stable_mosaic.version = 11 : i64} {
  func.func @_bn_residual_relu_kernel(%arg0: i32, %arg1: memref<512x128xbf16, #tpu.memory_space<vmem>>, %arg2: memref<2x128xf32, #tpu.memory_space<vmem>>, %arg3: memref<512x128xbf16, #tpu.memory_space<vmem>>, %arg4: memref<512x128xf32, #tpu.memory_space<vmem>>) attributes {dimension_semantics = [#tpu.dimension_semantics<parallel>], iteration_bounds = array<i64: 1>, scalar_prefetch = 0 : i64, scratch_operands = 0 : i64, tpu.core_type = #tpu.core_type<tc>, window_params = [{transform_indices = @transform_0, window_bounds = array<i64: 512, 128>}, {pipeline_mode = #tpu.pipeline_mode<synchronous>, transform_indices = @transform_1, window_bounds = array<i64: 2, 128>}, {transform_indices = @transform_2, window_bounds = array<i64: 512, 128>}, {transform_indices = @transform_3, window_bounds = array<i64: 512, 128>}]} {
    %c0 = arith.constant 0 : index
    %c0_0 = arith.constant 0 : index
    %0 = vector.load %arg2[%c0, %c0_0] : memref<2x128xf32, #tpu.memory_space<vmem>>, vector<1x128xf32>
    %c1 = arith.constant 1 : index
    %c0_1 = arith.constant 0 : index
    %1 = vector.load %arg2[%c1, %c0_1] : memref<2x128xf32, #tpu.memory_space<vmem>>, vector<1x128xf32>
    %c0_2 = arith.constant 0 : index
    %c0_3 = arith.constant 0 : index
    %2 = vector.load %arg1[%c0_2, %c0_3] : memref<512x128xbf16, #tpu.memory_space<vmem>>, vector<512x128xbf16>
    %3 = arith.extf %2 : vector<512x128xbf16> to vector<512x128xf32>
    %4 = vector.broadcast %0 : vector<1x128xf32> to vector<512x128xf32>
    %5 = arith.mulf %3, %4 : vector<512x128xf32>
    %6 = vector.broadcast %1 : vector<1x128xf32> to vector<512x128xf32>
    %7 = arith.addf %5, %6 : vector<512x128xf32>
    %c0_4 = arith.constant 0 : index
    %c0_5 = arith.constant 0 : index
    %8 = vector.load %arg3[%c0_4, %c0_5] : memref<512x128xbf16, #tpu.memory_space<vmem>>, vector<512x128xbf16>
    %9 = arith.extf %8 : vector<512x128xbf16> to vector<512x128xf32>
    %10 = arith.addf %7, %9 : vector<512x128xf32>
    %cst = arith.constant 0.000000e+00 : f32
    %11 = vector.broadcast %cst : f32 to vector<512x128xf32>
    %12 = arith.maximumf %10, %11 : vector<512x128xf32>
    %c0_6 = arith.constant 0 : index
    %c0_7 = arith.constant 0 : index
    %13 = vector.load %arg4[%c0_6, %c0_7] : memref<512x128xf32, #tpu.memory_space<vmem>>, vector<512x128xf32>
    tpu.vector_store %arg4[%c0_6, %c0_7], %12 {strides = array<i32>} : memref<512x128xf32, #tpu.memory_space<vmem>>, vector<512x128xf32>,
    return
  }
  func.func @transform_0(%arg0: i32) -> (i32, i32) {
    %c0_i32 = arith.constant 0 : i32
    %c0_i32_0 = arith.constant 0 : i32
    return %arg0, %c0_i32 : i32, i32
  }
  func.func @transform_1(%arg0: i32) -> (i32, i32) {
    %c0_i32 = arith.constant 0 : i32
    %c0_i32_0 = arith.constant 0 : i32
    %c0_i32_1 = arith.constant 0 : i32
    return %c0_i32, %c0_i32_0 : i32, i32
  }
  func.func @transform_2(%arg0: i32) -> (i32, i32) {
    %c0_i32 = arith.constant 0 : i32
    %c0_i32_0 = arith.constant 0 : i32
    return %arg0, %c0_i32 : i32, i32
  }
  func.func @transform_3(%arg0: i32) -> (i32, i32) {
    %c0_i32 = arith.constant 0 : i32
    %c0_i32_0 = arith.constant 0 : i32
    return %arg0, %c0_i32 : i32, i32
  }
}

</mosaic_0001>

<bundles_post_ra>
// kernel: bottleneck.6
= control target key start
LH: loop header
LB: loop body
LE: loop exit
PB: predicated region body
PF: predicated region fallthrough
CT: control target
= control target key end

     0   :  { %vm935_vm0 = vcmask 1040384   ;;  %s2032_s2 = inlined_call_operand.vmem [shape: bf16[128,128], index: 2, kind: input, shape index: {}]   ;;  %s2033_s1 = inlined_call_operand.vmem [shape: f32[2,128], index: 1, kind: input, shape index: {}]   ;;  %s2034_s0 = inlined_call_operand.vmem [shape: bf16[512,128], index: 0, kind: input, shape index: {}]   ;;  %s2035_s3 = inlined_call_operand.vmem [shape: bf16[512,128], index: 3, kind: output, shape index: {0}]   ;;  %s2036_s4 = inlined_call_operand.vmem [shape: f32[1,2,128], index: 4, kind: output, shape index: {1}]  }
   0x1   :  { %v985_v0 = vld [vmem:[%s2032_s2 + $0x38] sm:$0xff]  ;;  %v984_v1 = vld [vmem:[%s2032_s2 + $0x30] sm:$0xff]  ;;  %v983_v2 = vld [vmem:[%s2032_s2 + $0x28] sm:$0xff] }
   0x2   :  { %436 = vmatpush.bf16.msra.mxu0 %v985_v0  ;;  %1336 = vmatpush.bf16.msra.mxu1 %v985_v0  ;;  %v982_v3 = vld [vmem:[%s2032_s2 + $0x20] sm:$0xff]  ;;  %v981_v8 = vld [vmem:[%s2032_s2 + $0x18] sm:$0xff]  ;;  %v980_v17 = vld [vmem:[%s2032_s2 + $0x10] sm:$0xff] }
   0x3   :  { %1337 = vmatpush.bf16.msra.mxu2 %v985_v0  ;;  %1338 = vmatpush.bf16.msra.mxu3 %v985_v0  ;;  %v987_v4 = vld [vmem:[%s2034_s0] sm:$0xff]   ;;  %v979_v22 = vld [vmem:[%s2032_s2 + $0x8] sm:$0xff]  ;;  %v1275_v47 = vld [vmem:[%s2034_s0 + $0x10] sm:$0xff]  }
   0x4   :  { %v988_v5 = vunpack.c.l.bf16 %v987_v4  ;;  %v989_v6 = vunpack.c.h.bf16 %v987_v4  ;;  %v1405_v7 = vld [vmem:[%s2033_s1] ss:$0 sm:$0xff]  ;;  %v1418_v14 = vld [vmem:[%s2033_s1 + $0x1] ss:$0 sm:$0xff]  ;;  %v1274_v25 = vld [vmem:[%s2034_s0 + $0x8] sm:$0xff]   ;;  %v996_v54 = vunpack.c.l.bf16 %v1275_v47  ;;  %v997_v55 = vunpack.c.h.bf16 %v1275_v47 }
   0x5   :  { %v1281_v9 = vld [vmem:[%s2034_s0 + $0x40] sm:$0xff]   ;;  %v992_v29 = vunpack.c.l.bf16 %v1274_v25  ;;  %v993_v30 = vunpack.c.h.bf16 %v1274_v25  ;;  %v1282_v33 = vld [vmem:[%s2034_s0 + $0x48] sm:$0xff]   ;;  %v1283_v60 = vld [vmem:[%s2034_s0 + $0x50] sm:$0xff]  }
   0x6   :  { %437 = vmatpush.bf16.msra.mxu0 %v984_v1  ;;  %1339 = vmatpush.bf16.msra.mxu1 %v984_v1  ;;  %v1020_v10 = vunpack.c.l.bf16 %v1281_v9  ;;  %v1021_v11 = vunpack.c.h.bf16 %v1281_v9  ;;  %v147_v12 = vmul.f32 %v1405_v7, %v988_v5  ;;  %v148_v13 = vmul.f32 %v1405_v7, %v989_v6  ;;  %v978_v28 = vld [vmem:[%s2032_s2] sm:$0xff] }
   0x7   :  { %1340 = vmatpush.bf16.msra.mxu2 %v984_v1  ;;  %1341 = vmatpush.bf16.msra.mxu3 %v984_v1  ;;  %v1024_v34 = vunpack.c.l.bf16 %v1282_v33  ;;  %v1025_v35 = vunpack.c.h.bf16 %v1282_v33  ;;  %v149_v36 = vmul.f32 %v1405_v7, %v992_v29  ;;  %v150_v37 = vmul.f32 %v1405_v7, %v993_v30  ;;  %v1289_v46 = vld [vmem:[%s2034_s0 + $0x80] sm:$0xff]  }
   0x8   :  { %v163_v15 = vmul.f32 %v1405_v7, %v1020_v10  ;;  %v164_v16 = vmul.f32 %v1405_v7, %v1021_v11  ;;  %v212_v18 = vadd.f32 %v1418_v14, %v147_v12  ;;  %v213_v19 = vadd.f32 %v1418_v14, %v148_v13  ;;  %v1290_v13 = vld [vmem:[%s2034_s0 + $0x88] sm:$0xff]   ;;  %v1297_v47 = vld [vmem:[%s2034_s0 + $0xc0] sm:$0xff]  }
   0x9   :  { %v165_v38 = vmul.f32 %v1405_v7, %v1024_v34  ;;  %v166_v39 = vmul.f32 %v1405_v7, %v1025_v35  ;;  %v214_v40 = vadd.f32 %v1418_v14, %v149_v36  ;;  %v215_v41 = vadd.f32 %v1418_v14, %v150_v37 }
   0xa   :  { %438 = vmatpush.bf16.msra.mxu0 %v983_v2  ;;  %1342 = vmatpush.bf16.msra.mxu1 %v983_v2  ;;  %v228_v20 = vadd.f32 %v1418_v14, %v163_v15  ;;  %v229_v21 = vadd.f32 %v1418_v14, %v164_v16  ;;  %v276_v23 = vmax.f32 %v212_v18, 0.0  ;;  %v277_v24 = vmax.f32 %v213_v19, 0.0  ;;  %v1276_v15 = vld [vmem:[%s2034_s0 + $0x18] sm:$0xff]  }
   0xb   :  { %1343 = vmatpush.bf16.msra.mxu2 %v983_v2  ;;  %1344 = vmatpush.bf16.msra.mxu3 %v983_v2  ;;  %v230_v42 = vadd.f32 %v1418_v14, %v165_v38  ;;  %v231_v43 = vadd.f32 %v1418_v14, %v166_v39  ;;  %v278_v44 = vmax.f32 %v214_v40, 0.0  ;;  %v279_v45 = vmax.f32 %v215_v41, 0.0 }
   0xc   :  { %v292_v26 = vmax.f32 %v228_v20, 0.0  ;;  %v293_v27 = vmax.f32 %v229_v21, 0.0  ;;  %v340_v31 = vpack.c.bf16 %v277_v24, %v276_v23  ;;  %v1052_v50 = vunpack.c.l.bf16 %v1289_v46 }
   0xd   :  { %v294_v48 = vmax.f32 %v230_v42, 0.0  ;;  %v295_v49 = vmax.f32 %v231_v43, 0.0  ;;  %v1053_v51 = vunpack.c.h.bf16 %v1289_v46  ;;  %v341_v56 = vpack.c.bf16 %v279_v45, %v278_v44  ;;  %v1291_v46 = vld [vmem:[%s2034_s0 + $0x90] sm:$0xff]  }
   0xe   :  { %439 = vmatpush.bf16.msra.mxu0 %v982_v3  ;;  %1345 = vmatpush.bf16.msra.mxu1 %v982_v3  ;;  %v348_v32 = vpack.c.bf16 %v293_v27, %v292_v26  ;;  %v179_v52 = vmul.f32 %v1405_v7, %v1052_v50  ;;  %v1028_v63 = vunpack.c.l.bf16 %v1283_v60  ;;  %v1029_v0 = vunpack.c.h.bf16 %v1283_v60 }
   0xf   :  { %1346 = vmatpush.bf16.msra.mxu2 %v982_v3  ;;  %1347 = vmatpush.bf16.msra.mxu3 %v982_v3  ;;  %v180_v53 = vmul.f32 %v1405_v7, %v1053_v51  ;;  %v349_v57 = vpack.c.bf16 %v295_v49, %v294_v48  ;;  %v151_v1 = vmul.f32 %v1405_v7, %v996_v54  ;;  %v1056_v18 = vunpack.c.l.bf16 %v1290_v13  ;;  %v1277_v48 = vld [vmem:[%s2034_s0 + $0x20] sm:$0xff]  }
  0x10   :  { %v244_v58 = vadd.f32 %v1418_v14, %v179_v52  ;;  %v152_v2 = vmul.f32 %v1405_v7, %v997_v55  ;;  %v167_v4 = vmul.f32 %v1405_v7, %v1028_v63  ;;  %v168_v5 = vmul.f32 %v1405_v7, %v1029_v0 }
  0x11   :  { %v245_v59 = vadd.f32 %v1418_v14, %v180_v53  ;;  %v216_v6 = vadd.f32 %v1418_v14, %v151_v1  ;;  %v1057_v19 = vunpack.c.h.bf16 %v1290_v13  ;;  %v181_v20 = vmul.f32 %v1405_v7, %v1056_v18  ;;  %v1285_v1 = vld [vmem:[%s2034_s0 + $0x60] sm:$0xff]  }
  0x12   :  { %440 = vmatpush.bf16.msra.mxu0 %v981_v8  ;;  %1348 = vmatpush.bf16.msra.mxu1 %v981_v8  ;;  %v308_v61 = vmax.f32 %v244_v58, 0.0  ;;  %v232_v9 = vadd.f32 %v1418_v14, %v167_v4  ;;  %v233_v10 = vadd.f32 %v1418_v14, %v168_v5  ;;  %v1001_v23 = vunpack.c.h.bf16 %v1276_v15 }
  0x13   :  { %1349 = vmatpush.bf16.msra.mxu2 %v981_v8  ;;  %1350 = vmatpush.bf16.msra.mxu3 %v981_v8  ;;  %v309_v62 = vmax.f32 %v245_v59, 0.0  ;;  %v217_v8 = vadd.f32 %v1418_v14, %v152_v2  ;;  %v280_v11 = vmax.f32 %v216_v6, 0.0  ;;  %v182_v21 = vmul.f32 %v1405_v7, %v1057_v19 }
  0x14   :  { %v296_v16 = vmax.f32 %v232_v9, 0.0  ;;  %v246_v26 = vadd.f32 %v1418_v14, %v181_v20  ;;  %v154_v34 = vmul.f32 %v1405_v7, %v1001_v23  ;;  %v1060_v49 = vunpack.c.l.bf16 %v1291_v46 }
  0x15   :  { %v356_v3 = vpack.c.bf16 %v309_v62, %v308_v61  ;;  %v281_v12 = vmax.f32 %v217_v8, 0.0  ;;  %v247_v27 = vadd.f32 %v1418_v14, %v182_v21  ;;  %v1061_v50 = vunpack.c.h.bf16 %v1291_v46 }
  0x16   :  { %441 = vmatpush.bf16.msra.mxu0 %v980_v17  ;;  %1351 = vmatpush.bf16.msra.mxu1 %v980_v17  ;;  %v310_v29 = vmax.f32 %v246_v26, 0.0  ;;  %v219_v39 = vadd.f32 %v1418_v14, %v154_v34  ;;  %v1084_v51 = vunpack.c.l.bf16 %v1297_v47  ;;  %v1085_v52 = vunpack.c.h.bf16 %v1297_v47  ;;  %v1278_v26 = vld [vmem:[%s2034_s0 + $0x28] sm:$0xff]  }
  0x17   :  { %1352 = vmatpush.bf16.msra.mxu2 %v980_v17  ;;  %1353 = vmatpush.bf16.msra.mxu3 %v980_v17  ;;  %v297_v17 = vmax.f32 %v233_v10, 0.0  ;;  %v342_v24 = vpack.c.bf16 %v281_v12, %v280_v11  ;;  %v311_v30 = vmax.f32 %v247_v27, 0.0  ;;  %v183_v53 = vmul.f32 %v1405_v7, %v1060_v49 }
  0x18   :  { %v283_v43 = vmax.f32 %v219_v39, 0.0  ;;  %v184_v54 = vmul.f32 %v1405_v7, %v1061_v50  ;;  %v195_v55 = vmul.f32 %v1405_v7, %v1084_v51  ;;  %v1004_v58 = vunpack.c.l.bf16 %v1277_v48 }
  0x19   :  { %v350_v25 = vpack.c.bf16 %v297_v17, %v296_v16  ;;  %v357_v35 = vpack.c.bf16 %v311_v30, %v310_v29  ;;  %v1005_v59 = vunpack.c.h.bf16 %v1277_v48  ;;  %v248_v61 = vadd.f32 %v1418_v14, %v183_v53 }
  0x1a   :  { %442 = vmatpush.bf16.msra.mxu0 %v979_v22  ;;  %1354 = vmatpush.bf16.msra.mxu1 %v979_v22  ;;  %v249_v62 = vadd.f32 %v1418_v14, %v184_v54  ;;  %v260_v63 = vadd.f32 %v1418_v14, %v195_v55  ;;  %v155_v6 = vmul.f32 %v1405_v7, %v1004_v58  ;;  %v1036_v9 = vunpack.c.l.bf16 %v1285_v1 }
  0x1b   :  { %1355 = vmatpush.bf16.msra.mxu2 %v979_v22  ;;  %1356 = vmatpush.bf16.msra.mxu3 %v979_v22  ;;  %v1000_v22 = vunpack.c.l.bf16 %v1276_v15  ;;  %v312_v2 = vmax.f32 %v248_v61, 0.0  ;;  %v156_v8 = vmul.f32 %v1405_v7, %v1005_v59  ;;  %v1037_v10 = vunpack.c.h.bf16 %v1285_v1  ;;  %v1299_v1 = vld [vmem:[%s2034_s0 + $0xd0] sm:$0xff]  }
  0x1c   :  { %v324_v4 = vmax.f32 %v260_v63, 0.0  ;;  %v171_v13 = vmul.f32 %v1405_v7, %v1036_v9  ;;  %v220_v16 = vadd.f32 %v1418_v14, %v155_v6  ;;  %v1093_v6 = vunpack.c.h.bf16 %v1299_v1 }
  0x1d   :  { %v153_v33 = vmul.f32 %v1405_v7, %v1000_v22  ;;  %v172_v15 = vmul.f32 %v1405_v7, %v1037_v10  ;;  %v221_v17 = vadd.f32 %v1418_v14, %v156_v8 }
  0x1e   :  { %443 = vmatpush.bf16.msra.mxu0 %v978_v28  ;;  %1357 = vmatpush.bf16.msra.mxu1 %v978_v28  ;;  %v236_v18 = vadd.f32 %v1418_v14, %v171_v13  ;;  %v284_v20 = vmax.f32 %v220_v16, 0.0 }
  0x1f   :  { %1358 = vmatpush.bf16.msra.mxu2 %v978_v28  ;;  %1359 = vmatpush.bf16.msra.mxu3 %v978_v28  ;;  %v1284_v28 = vld [vmem:[%s2034_s0 + $0x58] sm:$0xff]   ;;  %v218_v38 = vadd.f32 %v1418_v14, %v153_v33  ;;  %v237_v19 = vadd.f32 %v1418_v14, %v172_v15  ;;  %v285_v21 = vmax.f32 %v221_v17, 0.0 }
  0x20   :  { %v300_v22 = vmax.f32 %v236_v18, 0.0 }
  0x21   :  { %444 = vmatmul.bf16.vlgmr.msra.gmra.mxu0 %v340_v31  ;;  %484 = vmatmul.bf16.vlgmr.msra.gmra.mxu1 %v348_v32  ;;  %v1032_v31 = vunpack.c.l.bf16 %v1284_v28  ;;  %v1033_v32 = vunpack.c.h.bf16 %v1284_v28  ;;  %v282_v42 = vmax.f32 %v218_v38, 0.0  ;;  %v301_v23 = vmax.f32 %v237_v19, 0.0 }
  0x22   :  { %524 = vmatmul.bf16.vlgmr.msra.gmra.mxu2 %v356_v3  ;;  %v313_v3 = vmax.f32 %v249_v62, 0.0 }
  0x23   :  { %v169_v36 = vmul.f32 %v1405_v7, %v1032_v31  ;;  %v170_v37 = vmul.f32 %v1405_v7, %v1033_v32  ;;  %v352_v38 = vpack.c.bf16 %v301_v23, %v300_v22 }
  0x24   :  { %v358_v11 = vpack.c.bf16 %v313_v3, %v312_v2  ;;  %v1279_v2 = vld [vmem:[%s2034_s0 + $0x30] sm:$0xff]  }
  0x25   :  { %v234_v40 = vadd.f32 %v1418_v14, %v169_v36  ;;  %v235_v41 = vadd.f32 %v1418_v14, %v170_v37  ;;  %v1008_v36 = vunpack.c.l.bf16 %v1278_v26  ;;  %v1009_v37 = vunpack.c.h.bf16 %v1278_v26 }
  0x26   :  { %v1012_v13 = vunpack.c.l.bf16 %v1279_v2  ;;  %v1013_v15 = vunpack.c.h.bf16 %v1279_v2 }
  0x27   :  { %v298_v44 = vmax.f32 %v234_v40, 0.0  ;;  %v299_v45 = vmax.f32 %v235_v41, 0.0  ;;  %v157_v48 = vmul.f32 %v1405_v7, %v1008_v36  ;;  %v158_v49 = vmul.f32 %v1405_v7, %v1009_v37 }
  0x28   :  { %v159_v26 = vmul.f32 %v1405_v7, %v1012_v13 }
  0x29   :  { %v351_v60 = vpack.c.bf16 %v299_v45, %v298_v44 }
  0x31   :  { %449 = vmatmul.bf16.gmra.mxu0 %v341_v56  ;;  %489 = vmatmul.bf16.gmra.mxu1 %v349_v57  ;;  %v196_v56 = vmul.f32 %v1405_v7, %v1085_v52  ;;  %v343_v57 = vpack.c.bf16 %v283_v43, %v282_v42  ;;  %v1286_v43 = vld [vmem:[%s2034_s0 + $0x68] sm:$0xff]  }
  0x32   :  { %529 = vmatmul.bf16.gmra.mxu2 %v357_v35  ;;  %v344_v35 = vpack.c.bf16 %v285_v21, %v284_v20  ;;  %v1040_v50 = vunpack.c.l.bf16 %v1286_v43  ;;  %v1041_v51 = vunpack.c.h.bf16 %v1286_v43  ;;  %v1287_v21 = vld [vmem:[%s2034_s0 + $0x70] sm:$0xff]   ;;  %v1300_v43 = vld [vmem:[%s2034_s0 + $0xd8] sm:$0xff]  }
  0x33   :  { %v261_v0 = vadd.f32 %v1418_v14, %v196_v56  ;;  %v222_v56 = vadd.f32 %v1418_v14, %v157_v48  ;;  %v1097_v48 = vunpack.c.h.bf16 %v1300_v43 }
  0x34   :  { %v173_v54 = vmul.f32 %v1405_v7, %v1040_v50  ;;  %v174_v55 = vmul.f32 %v1405_v7, %v1041_v51 }
  0x35   :  { %v325_v5 = vmax.f32 %v261_v0, 0.0  ;;  %v1293_v0 = vld [vmem:[%s2034_s0 + $0xa0] sm:$0xff]  }
  0x36   :  { %v238_v58 = vadd.f32 %v1418_v14, %v173_v54  ;;  %v239_v59 = vadd.f32 %v1418_v14, %v174_v55  ;;  %v1068_v3 = vunpack.c.l.bf16 %v1293_v0 }
  0x37   :  { %v364_v12 = vpack.c.bf16 %v325_v5, %v324_v4  ;;  %v1069_v4 = vunpack.c.h.bf16 %v1293_v0  ;;  %v1092_v5 = vunpack.c.l.bf16 %v1299_v1 }
  0x38   :  { %v302_v62 = vmax.f32 %v238_v58, 0.0  ;;  %v303_v63 = vmax.f32 %v239_v59, 0.0  ;;  %v187_v8 = vmul.f32 %v1405_v7, %v1068_v3 }
  0x39   :  { %564 = vmatmul.bf16.vlgmr.msra.gmra.mxu3 %v364_v12  ;;  %v188_v9 = vmul.f32 %v1405_v7, %v1069_v4  ;;  %v199_v10 = vmul.f32 %v1405_v7, %v1092_v5 }
  0x3a   :  { %v353_v16 = vpack.c.bf16 %v303_v63, %v302_v62  ;;  %v252_v17 = vadd.f32 %v1418_v14, %v187_v8 }
  0x3b   :  { %v253_v18 = vadd.f32 %v1418_v14, %v188_v9  ;;  %v264_v19 = vadd.f32 %v1418_v14, %v199_v10 }
  0x3c   :  { %v316_v22 = vmax.f32 %v252_v17, 0.0 }
  0x3d   :  { %v317_v23 = vmax.f32 %v253_v18, 0.0 }
  0x41   :  { %454 = vmatmul.bf16.gmra.mxu0 %v342_v24  ;;  %494 = vmatmul.bf16.gmra.mxu1 %v350_v25  ;;  %v1292_v24 = vld [vmem:[%s2034_s0 + $0x98] sm:$0xff]   ;;  %v1298_v25 = vld [vmem:[%s2034_s0 + $0xc8] sm:$0xff]  }
  0x42   :  { %534 = vmatmul.bf16.gmra.mxu2 %v358_v11  ;;  %v1064_v27 = vunpack.c.l.bf16 %v1292_v24  ;;  %v1065_v28 = vunpack.c.h.bf16 %v1292_v24  ;;  %v1088_v29 = vunpack.c.l.bf16 %v1298_v25  ;;  %v1089_v30 = vunpack.c.h.bf16 %v1298_v25 }
  0x43   :  { %v200_v11 = vmul.f32 %v1405_v7, %v1093_v6  ;;  %v328_v24 = vmax.f32 %v264_v19, 0.0 }
  0x44   :  { %v185_v31 = vmul.f32 %v1405_v7, %v1064_v27  ;;  %v186_v32 = vmul.f32 %v1405_v7, %v1065_v28  ;;  %v197_v33 = vmul.f32 %v1405_v7, %v1088_v29  ;;  %v198_v34 = vmul.f32 %v1405_v7, %v1089_v30 }
  0x45   :  { %v265_v20 = vadd.f32 %v1418_v14, %v200_v11  ;;  %v160_v27 = vmul.f32 %v1405_v7, %v1013_v15  ;;  %v1044_v28 = vunpack.c.l.bf16 %v1287_v21  ;;  %v1045_v29 = vunpack.c.h.bf16 %v1287_v21  ;;  %v1301_v21 = vld [vmem:[%s2034_s0 + $0xe0] sm:$0xff]  }
  0x46   :  { %v250_v39 = vadd.f32 %v1418_v14, %v185_v31  ;;  %v251_v40 = vadd.f32 %v1418_v14, %v186_v32  ;;  %v262_v41 = vadd.f32 %v1418_v14, %v197_v33  ;;  %v263_v42 = vadd.f32 %v1418_v14, %v198_v34 }
  0x47   :  { %v329_v25 = vmax.f32 %v265_v20, 0.0  ;;  %v360_v30 = vpack.c.bf16 %v317_v23, %v316_v22  ;;  %v175_v32 = vmul.f32 %v1405_v7, %v1044_v28  ;;  %v176_v33 = vmul.f32 %v1405_v7, %v1045_v29  ;;  %v1295_v20 = vld [vmem:[%s2034_s0 + $0xb0] sm:$0xff]  }
  0x48   :  { %v314_v44 = vmax.f32 %v250_v39, 0.0  ;;  %v315_v45 = vmax.f32 %v251_v40, 0.0  ;;  %v326_v46 = vmax.f32 %v262_v41, 0.0  ;;  %v327_v47 = vmax.f32 %v263_v42, 0.0  ;;  %v1294_v42 = vld [vmem:[%s2034_s0 + $0xa8] sm:$0xff]  }
  0x49   :  { %v366_v31 = vpack.c.bf16 %v329_v25, %v328_v24  ;;  %v224_v34 = vadd.f32 %v1418_v14, %v159_v26  ;;  %v240_v36 = vadd.f32 %v1418_v14, %v175_v32  ;;  %v241_v37 = vadd.f32 %v1418_v14, %v176_v33 }
  0x4a   :  { %v359_v52 = vpack.c.bf16 %v315_v45, %v314_v44  ;;  %v365_v53 = vpack.c.bf16 %v327_v47, %v326_v46  ;;  %v1280_v44 = vld [vmem:[%s2034_s0 + $0x38] sm:$0xff]   ;;  %v1072_v45 = vunpack.c.l.bf16 %v1294_v42  ;;  %v1073_v46 = vunpack.c.h.bf16 %v1294_v42 }
  0x4b   :  { %v304_v40 = vmax.f32 %v240_v36, 0.0  ;;  %v305_v41 = vmax.f32 %v241_v37, 0.0  ;;  %v1096_v47 = vunpack.c.l.bf16 %v1300_v43  ;;  %v1016_v54 = vunpack.c.l.bf16 %v1280_v44  ;;  %v1296_v42 = vld [vmem:[%s2034_s0 + $0xb8] sm:$0xff]   ;;  %v1302_v43 = vld [vmem:[%s2034_s0 + $0xe8] sm:$0xff]  }
  0x4c   :  { %569 = vmatmul.bf16.gmra.mxu3 %v365_v53  ;;  %v190_v50 = vmul.f32 %v1405_v7, %v1073_v46  ;;  %v1017_v55 = vunpack.c.h.bf16 %v1280_v44  ;;  %v1076_v22 = vunpack.c.l.bf16 %v1295_v20  ;;  %v1077_v23 = vunpack.c.h.bf16 %v1295_v20 }
  0x4d   :  { %v201_v51 = vmul.f32 %v1405_v7, %v1096_v47  ;;  %v161_v2 = vmul.f32 %v1405_v7, %v1016_v54  ;;  %v1100_v24 = vunpack.c.l.bf16 %v1301_v21  ;;  %v1101_v25 = vunpack.c.h.bf16 %v1301_v21 }
  0x4e   :  { %v255_v58 = vadd.f32 %v1418_v14, %v190_v50  ;;  %v162_v3 = vmul.f32 %v1405_v7, %v1017_v55  ;;  %v191_v26 = vmul.f32 %v1405_v7, %v1076_v22  ;;  %v1080_v44 = vunpack.c.l.bf16 %v1296_v42 }
  0x4f   :  { %v266_v59 = vadd.f32 %v1418_v14, %v201_v51  ;;  %v226_v11 = vadd.f32 %v1418_v14, %v161_v2  ;;  %v203_v28 = vmul.f32 %v1405_v7, %v1100_v24  ;;  %v204_v29 = vmul.f32 %v1405_v7, %v1101_v25 }
  0x50   :  { %v319_v63 = vmax.f32 %v255_v58, 0.0  ;;  %v256_v32 = vadd.f32 %v1418_v14, %v191_v26  ;;  %v1104_v46 = vunpack.c.l.bf16 %v1302_v43  ;;  %v1105_v47 = vunpack.c.h.bf16 %v1302_v43 }
  0x51   :  { %459 = vmatmul.bf16.gmra.mxu0 %v343_v57  ;;  %499 = vmatmul.bf16.gmra.mxu1 %v351_v60  ;;  %v223_v57 = vadd.f32 %v1418_v14, %v158_v49  ;;  %v286_v60 = vmax.f32 %v222_v56, 0.0  ;;  %v189_v49 = vmul.f32 %v1405_v7, %v1072_v45  ;;  %v354_v56 = vpack.c.bf16 %v305_v41, %v304_v40 }
  0x52   :  { %539 = vmatmul.bf16.gmra.mxu2 %v359_v52  ;;  %v202_v52 = vmul.f32 %v1405_v7, %v1097_v48  ;;  %v330_v0 = vmax.f32 %v266_v59, 0.0  ;;  %v320_v36 = vmax.f32 %v256_v32, 0.0  ;;  %v1081_v45 = vunpack.c.h.bf16 %v1296_v42  ;;  %v1304_v32 = vld [vmem:[%s2034_s0 + $0xf8] sm:$0xff]  }
  0x53   :  { %v287_v61 = vmax.f32 %v223_v57, 0.0  ;;  %v254_v57 = vadd.f32 %v1418_v14, %v189_v49  ;;  %v193_v48 = vmul.f32 %v1405_v7, %v1080_v44  ;;  %v205_v50 = vmul.f32 %v1405_v7, %v1104_v46 }
  0x54   :  { %v194_v49 = vmul.f32 %v1405_v7, %v1081_v45  ;;  %v206_v51 = vmul.f32 %v1405_v7, %v1105_v47 }
  0x55   :  { %v345_v12 = vpack.c.bf16 %v287_v61, %v286_v60  ;;  %v267_v60 = vadd.f32 %v1418_v14, %v202_v52  ;;  %v1288_v61 = vld [vmem:[%s2034_s0 + $0x78] sm:$0xff]   ;;  %v318_v62 = vmax.f32 %v254_v57, 0.0  ;;  %v258_v52 = vadd.f32 %v1418_v14, %v193_v48 }
  0x56   :  { %v1048_v4 = vunpack.c.l.bf16 %v1288_v61  ;;  %v1049_v5 = vunpack.c.h.bf16 %v1288_v61  ;;  %v270_v54 = vadd.f32 %v1418_v14, %v205_v50  ;;  %v271_v55 = vadd.f32 %v1418_v14, %v206_v51 }
  0x57   :  { %v331_v1 = vmax.f32 %v267_v60, 0.0  ;;  %v361_v6 = vpack.c.bf16 %v319_v63, %v318_v62  ;;  %v322_v58 = vmax.f32 %v258_v52, 0.0 }
  0x58   :  { %v177_v9 = vmul.f32 %v1405_v7, %v1048_v4  ;;  %v178_v10 = vmul.f32 %v1405_v7, %v1049_v5  ;;  %v334_v60 = vmax.f32 %v270_v54, 0.0  ;;  %v335_v61 = vmax.f32 %v271_v55, 0.0 }
  0x59   :  { %v367_v8 = vpack.c.bf16 %v331_v1, %v330_v0 }
  0x5a   :  { %v242_v13 = vadd.f32 %v1418_v14, %v177_v9  ;;  %v243_v15 = vadd.f32 %v1418_v14, %v178_v10  ;;  %v369_v63 = vpack.c.bf16 %v335_v61, %v334_v60 }
  0x5c   :  { %574 = vmatmul.bf16.gmra.mxu3 %v366_v31  ;;  %v306_v18 = vmax.f32 %v242_v13, 0.0  ;;  %v307_v19 = vmax.f32 %v243_v15, 0.0 }
  0x5e   :  { %v355_v31 = vpack.c.bf16 %v307_v19, %v306_v18 }
  0x61   :  { %464 = vmatmul.bf16.gmra.mxu0 %v344_v35  ;;  %504 = vmatmul.bf16.gmra.mxu1 %v352_v38  ;;  %v225_v35 = vadd.f32 %v1418_v14, %v160_v27  ;;  %v288_v38 = vmax.f32 %v224_v34, 0.0  ;;  %v192_v27 = vmul.f32 %v1405_v7, %v1077_v23  ;;  %v268_v34 = vadd.f32 %v1418_v14, %v203_v28 }
  0x62   :  { %544 = vmatmul.bf16.gmra.mxu2 %v360_v30 }
  0x63   :  { %v289_v39 = vmax.f32 %v225_v35, 0.0  ;;  %v257_v33 = vadd.f32 %v1418_v14, %v192_v27  ;;  %v269_v35 = vadd.f32 %v1418_v14, %v204_v29 }
  0x65   :  { %v346_v53 = vpack.c.bf16 %v289_v39, %v288_v38  ;;  %v321_v37 = vmax.f32 %v257_v33, 0.0  ;;  %v332_v38 = vmax.f32 %v268_v34, 0.0  ;;  %v333_v39 = vmax.f32 %v269_v35, 0.0 }
  0x66   :  { %v1112_v34 = vunpack.c.l.bf16 %v1304_v32  ;;  %v1113_v35 = vunpack.c.h.bf16 %v1304_v32 }
  0x67   :  { %v362_v40 = vpack.c.bf16 %v321_v37, %v320_v36  ;;  %v368_v41 = vpack.c.bf16 %v333_v39, %v332_v38 }
  0x68   :  { %v209_v36 = vmul.f32 %v1405_v7, %v1112_v34  ;;  %v210_v37 = vmul.f32 %v1405_v7, %v1113_v35 }
  0x6a   :  { %v274_v38 = vadd.f32 %v1418_v14, %v209_v36  ;;  %v275_v39 = vadd.f32 %v1418_v14, %v210_v37 }
  0x6c   :  { %579 = vmatmul.bf16.gmra.mxu3 %v367_v8  ;;  %v1303_v8 = vld [vmem:[%s2034_s0 + $0xf0] sm:$0xff]   ;;  %v338_v45 = vmax.f32 %v274_v38, 0.0  ;;  %v339_v47 = vmax.f32 %v275_v39, 0.0 }
  0x6d   :  { %v1108_v10 = vunpack.c.l.bf16 %v1303_v8 }
  0x71   :  { %469 = vmatmul.bf16.gmra.mxu0 %v345_v12  ;;  %509 = vmatmul.bf16.gmra.mxu1 %v353_v16  ;;  %v227_v12 = vadd.f32 %v1418_v14, %v162_v3  ;;  %v290_v16 = vmax.f32 %v226_v11, 0.0  ;;  %v1109_v11 = vunpack.c.h.bf16 %v1303_v8 }
  0x72   :  { %549 = vmatmul.bf16.gmra.mxu2 %v361_v6 }
  0x73   :  { %v291_v17 = vmax.f32 %v227_v12, 0.0  ;;  %v207_v12 = vmul.f32 %v1405_v7, %v1108_v10  ;;  %v208_v13 = vmul.f32 %v1405_v7, %v1109_v11  ;;  %v371_v7 = vpack.c.bf16 %v339_v47, %v338_v45 }
  0x75   :  { %v347_v30 = vpack.c.bf16 %v291_v17, %v290_v16  ;;  %v272_v15 = vadd.f32 %v1418_v14, %v207_v12  ;;  %v273_v16 = vadd.f32 %v1418_v14, %v208_v13 }
  0x77   :  { %v336_v21 = vmax.f32 %v272_v15, 0.0  ;;  %v337_v22 = vmax.f32 %v273_v16, 0.0 }
  0x79   :  { %v370_v24 = vpack.c.bf16 %v337_v22, %v336_v21 }
  0x7c   :  { %584 = vmatmul.bf16.gmra.mxu3 %v368_v41 }
  0x81   :  { %474 = vmatmul.bf16.gmra.mxu0 %v346_v53  ;;  %514 = vmatmul.bf16.gmra.mxu1 %v354_v56  ;;  %v259_v53 = vadd.f32 %v1418_v14, %v194_v49 }
  0x82   :  { %554 = vmatmul.bf16.gmra.mxu2 %v362_v40 }
  0x83   :  { %v323_v59 = vmax.f32 %v259_v53, 0.0 }
  0x85   :  { %v363_v62 = vpack.c.bf16 %v323_v59, %v322_v58 }
  0x8c   :  { %589 = vmatmul.bf16.gmra.mxu3 %v369_v63 }
  0x91   :  { %479 = vmatmul.bf16.gmra.mxu0 %v347_v30  ;;  %519 = vmatmul.bf16.gmra.mxu1 %v355_v31 }
  0x92   :  { %559 = vmatmul.bf16.gmra.mxu2 %v363_v62 }
  0x9c   :  { %594 = vmatmul.bf16.gmra.mxu3 %v370_v24 }
  0x9e   :  { %v445_v56 = vpop.f32.mrf.mxu0  ;;  %v1631_v57 = vpop.f32.mrf.mxu1 }
  0x9f   :  { %v802_v0 = vmul.f32 %v445_v56, %v445_v56 }
  0xa5   :  { %v1656_v31 = vpop.f32.mrf.mxu2 }
  0xa6   :  { %v447_v1 = vpop.f32.mrf.mxu0  ;;  %v1633_v2 = vpop.f32.mrf.mxu1 }
  0xa7   :  { %v1117_v3 = vpack.c.bf16 %v447_v1, %v445_v56  ;;  %v733_v4 = vadd.f32 %v447_v1, %v445_v56  ;;  %v803_v5 = vmul.f32 %v447_v1, %v447_v1  ;;  %v1157_v6 = vpack.c.bf16 %v1633_v2, %v1631_v57 }
  0xa9   :  { %1118 = vst [vmem:[%s2035_s3] sm:$0xff] %v1117_v3   ;;  %v866_v9 = vadd.f32 %v803_v5, %v802_v0 }
  0xaa   :  { %1312 = vst [vmem:[%s2035_s3 + $0x40] sm:$0xff] %v1157_v6  }
  0xac   :  { %599 = vmatmul.bf16.gmra.mxu3 %v371_v7 }
  0xad   :  { %v1675_v44 = vpop.f32.mrf.mxu2 }
  0xae   :  { %v450_v17 = vpop.f32.mrf.mxu0  ;;  %v1650_v18 = vpop.f32.mrf.mxu1  ;;  %v1197_v46 = vpack.c.bf16 %v1675_v44, %v1656_v31 }
  0xaf   :  { %v734_v19 = vadd.f32 %v733_v4, %v450_v17  ;;  %v804_v20 = vmul.f32 %v450_v17, %v450_v17 }
  0xb0   :  { %1320 = vst [vmem:[%s2035_s3 + $0x80] sm:$0xff] %v1197_v46  }
  0xb1   :  { %v867_v23 = vadd.f32 %v866_v9, %v804_v20 }
  0xb5   :  { %v1688_v52 = vpop.f32.mrf.mxu2 }
  0xb6   :  { %v452_v25 = vpop.f32.mrf.mxu0  ;;  %v1652_v26 = vpop.f32.mrf.mxu1 }
  0xb7   :  { %v1122_v27 = vpack.c.bf16 %v452_v25, %v450_v17  ;;  %v735_v28 = vadd.f32 %v734_v19, %v452_v25  ;;  %v805_v29 = vmul.f32 %v452_v25, %v452_v25  ;;  %v1162_v30 = vpack.c.bf16 %v1652_v26, %v1650_v18 }
  0xb9   :  { %1305 = vst [vmem:[%s2035_s3 + $0x8] sm:$0xff] %v1122_v27   ;;  %v868_v33 = vadd.f32 %v867_v23, %v805_v29 }
  0xba   :  { %1313 = vst [vmem:[%s2035_s3 + $0x48] sm:$0xff] %v1162_v30  }
  0xbc   :  { %v1711_v63 = vpop.f32.mrf.mxu3 }
  0xbd   :  { %v1698_v55 = vpop.f32.mrf.mxu2 }
  0xbe   :  { %v455_v40 = vpop.f32.mrf.mxu0  ;;  %v1671_v41 = vpop.f32.mrf.mxu1  ;;  %v1202_v56 = vpack.c.bf16 %v1698_v55, %v1688_v52 }
  0xbf   :  { %v1673_v42 = vadd.f32 %v735_v28, %v455_v40  ;;  %v806_v43 = vmul.f32 %v455_v40, %v455_v40 }
  0xc0   :  { %1321 = vst [vmem:[%s2035_s3 + $0x88] sm:$0xff] %v1202_v56  }
  0xc1   :  { %v1679_v48 = vadd.f32 %v868_v33, %v806_v43 }
  0xc4   :  { %v1723_v4 = vpop.f32.mrf.mxu3 }
  0xc5   :  { %v1709_v62 = vpop.f32.mrf.mxu2  ;;  %v1237_v6 = vpack.c.bf16 %v1723_v4, %v1711_v63 }
  0xc6   :  { %v457_v14 = vpop.f32.mrf.mxu0  ;;  %v1684_v49 = vpop.f32.mrf.mxu1 }
  0xc7   :  { %v1127_v50 = vpack.c.bf16 %v457_v14, %v455_v40  ;;  %v1167_v51 = vpack.c.bf16 %v1684_v49, %v1671_v41  ;;  %1328 = vst [vmem:[%s2035_s3 + $0xc0] sm:$0xff] %v1237_v6   ;;  %v807_v34 = vmul.f32 %v457_v14, %v457_v14  ;;  %v737_v38 = vadd.f32 %v1673_v42, %v457_v14 }
  0xc9   :  { %1306 = vst [vmem:[%s2035_s3 + $0x10] sm:$0xff] %v1127_v50   ;;  %v870_v39 = vadd.f32 %v1679_v48, %v807_v34 }
  0xca   :  { %1314 = vst [vmem:[%s2035_s3 + $0x50] sm:$0xff] %v1167_v51  }
  0xcd   :  { %v1721_v3 = vpop.f32.mrf.mxu2 }
  0xce   :  { %v460_v53 = vpop.f32.mrf.mxu0  ;;  %v1696_v54 = vpop.f32.mrf.mxu1  ;;  %v1207_v5 = vpack.c.bf16 %v1721_v3, %v1709_v62 }
  0xcf   :  { %v1741_v13 = vpop.f32.mrf.mxu3  ;;  %v808_v37 = vmul.f32 %v460_v53, %v460_v53  ;;  %v738_v43 = vadd.f32 %v737_v38, %v460_v53 }
  0xd0   :  { %1322 = vst [vmem:[%s2035_s3 + $0x90] sm:$0xff] %v1207_v5  }
  0xd1   :  { %v871_v45 = vadd.f32 %v870_v39, %v808_v37 }
  0xd5   :  { %v1739_v12 = vpop.f32.mrf.mxu2 }
  0xd6   :  { %v462_v58 = vpop.f32.mrf.mxu0  ;;  %v1705_v59 = vpop.f32.mrf.mxu1 }
  0xd7   :  { %v1132_v60 = vpack.c.bf16 %v462_v58, %v460_v53  ;;  %v1172_v61 = vpack.c.bf16 %v1705_v59, %v1696_v54  ;;  %v1753_v19 = vpop.f32.mrf.mxu3  ;;  %v809_v40 = vmul.f32 %v462_v58, %v462_v58  ;;  %v739_v50 = vadd.f32 %v738_v43, %v462_v58 }
  0xd8   :  { %v1242_v21 = vpack.c.bf16 %v1753_v19, %v1741_v13 }
  0xd9   :  { %1307 = vst [vmem:[%s2035_s3 + $0x18] sm:$0xff] %v1132_v60   ;;  %v872_v14 = vadd.f32 %v871_v45, %v809_v40 }
  0xda   :  { %1315 = vst [vmem:[%s2035_s3 + $0x58] sm:$0xff] %v1172_v61  }
  0xdb   :  { %1329 = vst [vmem:[%s2035_s3 + $0xc8] sm:$0xff] %v1242_v21  }
  0xdd   :  { %v1751_v17 = vpop.f32.mrf.mxu2 }
  0xde   :  { %v465_v0 = vpop.f32.mrf.mxu0  ;;  %v1719_v1 = vpop.f32.mrf.mxu1  ;;  %v1212_v20 = vpack.c.bf16 %v1751_v17, %v1739_v12 }
  0xdf   :  { %v1771_v28 = vpop.f32.mrf.mxu3  ;;  %v810_v46 = vmul.f32 %v465_v0, %v465_v0  ;;  %v740_v5 = vadd.f32 %v739_v50, %v465_v0 }
  0xe0   :  { %1323 = vst [vmem:[%s2035_s3 + $0x98] sm:$0xff] %v1212_v20  }
  0xe1   :  { %v873_v48 = vadd.f32 %v872_v14, %v810_v46 }
  0xe5   :  { %v1769_v27 = vpop.f32.mrf.mxu2 }
  0xe6   :  { %v467_v8 = vpop.f32.mrf.mxu0  ;;  %v1735_v9 = vpop.f32.mrf.mxu1 }
  0xe7   :  { %v1137_v10 = vpack.c.bf16 %v467_v8, %v465_v0  ;;  %v1177_v11 = vpack.c.bf16 %v1735_v9, %v1719_v1  ;;  %v1783_v33 = vpop.f32.mrf.mxu3  ;;  %v811_v61 = vmul.f32 %v467_v8, %v467_v8  ;;  %v741_v58 = vadd.f32 %v740_v5, %v467_v8 }
  0xe8   :  { %v1247_v36 = vpack.c.bf16 %v1783_v33, %v1771_v28 }
  0xe9   :  { %1308 = vst [vmem:[%s2035_s3 + $0x20] sm:$0xff] %v1137_v10   ;;  %v874_v6 = vadd.f32 %v873_v48, %v811_v61 }
  0xea   :  { %1316 = vst [vmem:[%s2035_s3 + $0x60] sm:$0xff] %v1177_v11  }
  0xeb   :  { %1330 = vst [vmem:[%s2035_s3 + $0xd0] sm:$0xff] %v1247_v36  }
  0xed   :  { %v1781_v32 = vpop.f32.mrf.mxu2 }
  0xee   :  { %v470_v15 = vpop.f32.mrf.mxu0  ;;  %v1749_v16 = vpop.f32.mrf.mxu1  ;;  %v1217_v35 = vpack.c.bf16 %v1781_v32, %v1769_v27 }
  0xef   :  { %v1803_v42 = vpop.f32.mrf.mxu3  ;;  %v812_v53 = vmul.f32 %v470_v15, %v470_v15  ;;  %v742_v11 = vadd.f32 %v741_v58, %v470_v15 }
  0xf0   :  { %1324 = vst [vmem:[%s2035_s3 + $0xa0] sm:$0xff] %v1217_v35  }
  0xf1   :  { %v875_v20 = vadd.f32 %v874_v6, %v812_v53  ;;  %v819_v6 = vmul.f32 %v1633_v2, %v1633_v2 }
  0xf5   :  { %v1801_v60 = vpop.f32.mrf.mxu2 }
  0xf6   :  { %v472_v22 = vpop.f32.mrf.mxu0  ;;  %v1765_v23 = vpop.f32.mrf.mxu1 }
  0xf7   :  { %v1142_v24 = vpack.c.bf16 %v472_v22, %v470_v15  ;;  %v1182_v25 = vpack.c.bf16 %v1765_v23, %v1749_v16  ;;  %v813_v10 = vmul.f32 %v472_v22, %v472_v22  ;;  %v743_v0 = vadd.f32 %v742_v11, %v472_v22  ;;  %v1815_v35 = vpop.f32.mrf.mxu3 }
  0xf8   :  { %v1252_v8 = vpack.c.bf16 %v1815_v35, %v1803_v42 }
  0xf9   :  { %1309 = vst [vmem:[%s2035_s3 + $0x28] sm:$0xff] %v1142_v24   ;;  %v876_v36 = vadd.f32 %v875_v20, %v813_v10  ;;  %v820_v20 = vmul.f32 %v1650_v18, %v1650_v18 }
  0xfa   :  { %1317 = vst [vmem:[%s2035_s3 + $0x68] sm:$0xff] %v1182_v25  }
  0xfb   :  { %1331 = vst [vmem:[%s2035_s3 + $0xd8] sm:$0xff] %v1252_v8  }
  0xfd   :  { %v1813_v34 = vpop.f32.mrf.mxu2 }
  0xfe   :  { %v475_v29 = vpop.f32.mrf.mxu0  ;;  %v1779_v30 = vpop.f32.mrf.mxu1  ;;  %v1222_v38 = vpack.c.bf16 %v1813_v34, %v1801_v60 }
  0xff   :  { %v814_v21 = vmul.f32 %v475_v29, %v475_v29  ;;  %v744_v39 = vadd.f32 %v743_v0, %v475_v29  ;;  %v1833_v48 = vpop.f32.mrf.mxu3 }
 0x100   :  { %1325 = vst [vmem:[%s2035_s3 + $0xa8] sm:$0xff] %v1222_v38  }
 0x101   :  { %v877_v15 = vadd.f32 %v876_v36, %v814_v21 }
 0x105   :  { %v1831_v5 = vpop.f32.mrf.mxu2 }
 0x106   :  { %v477_v47 = vpop.f32.mrf.mxu0  ;;  %v1797_v7 = vpop.f32.mrf.mxu1 }
 0x107   :  { %v1147_v51 = vpack.c.bf16 %v477_v47, %v475_v29  ;;  %v1187_v56 = vpack.c.bf16 %v1797_v7, %v1779_v30  ;;  %v815_v37 = vmul.f32 %v477_v47, %v477_v47  ;;  %v745_v22 = vadd.f32 %v744_v39, %v477_v47  ;;  %v1855_v38 = vpop.f32.mrf.mxu3 }
 0x108   :  { %v818_v47 = vmul.f32 %v1631_v57, %v1631_v57  ;;  %v1257_v8 = vpack.c.bf16 %v1855_v38, %v1833_v48 }
 0x109   :  { %1310 = vst [vmem:[%s2035_s3 + $0x30] sm:$0xff] %v1147_v51   ;;  %v878_v43 = vadd.f32 %v877_v15, %v815_v37 }
 0x10a   :  { %1318 = vst [vmem:[%s2035_s3 + $0x70] sm:$0xff] %v1187_v56  }
 0x10b   :  { %1332 = vst [vmem:[%s2035_s3 + $0xe0] sm:$0xff] %v1257_v8   ;;  %v831_v8 = vmul.f32 %v1797_v7, %v1797_v7 }
 0x10d   :  { %v1853_v37 = vpop.f32.mrf.mxu2 }
 0x10e   :  { %v480_v24 = vpop.f32.mrf.mxu0  ;;  %v1811_v25 = vpop.f32.mrf.mxu1 }
 0x10f   :  { %v816_v40 = vmul.f32 %v480_v24, %v480_v24  ;;  %v746_v45 = vadd.f32 %v745_v22, %v480_v24 }
 0x111   :  { %v879_v46 = vadd.f32 %v878_v43, %v816_v40  ;;  %v824_v43 = vmul.f32 %v1696_v54, %v1696_v54 }
 0x116   :  { %v482_v50 = vpop.f32.mrf.mxu0  ;;  %v1827_v51 = vpop.f32.mrf.mxu1 }
 0x117   :  { %v1152_v56 = vpack.c.bf16 %v482_v50, %v480_v24  ;;  %v747_v14 = vadd.f32 %v746_v45, %v482_v50  ;;  %v817_v29 = vmul.f32 %v482_v50, %v482_v50  ;;  %v1192_v61 = vpack.c.bf16 %v1827_v51, %v1811_v25 }
 0x119   :  { %1311 = vst [vmem:[%s2035_s3 + $0x38] sm:$0xff] %v1152_v56   ;;  %v748_v53 = vadd.f32 %v747_v14, %v1631_v57  ;;  %v880_v58 = vadd.f32 %v879_v46, %v817_v29  ;;  %v821_v57 = vmul.f32 %v1652_v26, %v1652_v26  ;;  %v825_v46 = vmul.f32 %v1705_v59, %v1705_v59  ;;  %v1879_v14 = vpop.f32.mrf.mxu2 }
 0x11a   :  { %1319 = vst [vmem:[%s2035_s3 + $0x78] sm:$0xff] %v1192_v61   ;;  %v826_v29 = vmul.f32 %v1719_v1, %v1719_v1 }
 0x11b   :  { %v749_v10 = vadd.f32 %v748_v53, %v1633_v2  ;;  %v881_v11 = vadd.f32 %v880_v58, %v818_v47  ;;  %v1227_v2 = vpack.c.bf16 %v1853_v37, %v1831_v5  ;;  %v827_v53 = vmul.f32 %v1735_v9, %v1735_v9 }
 0x11d   :  { %v750_v21 = vadd.f32 %v749_v10, %v1650_v18  ;;  %v882_v24 = vadd.f32 %v881_v11, %v819_v6  ;;  %v822_v18 = vmul.f32 %v1671_v41, %v1671_v41  ;;  %1326 = vst [vmem:[%s2035_s3 + $0xb0] sm:$0xff] %v1227_v2   ;;  %v829_v11 = vmul.f32 %v1765_v23, %v1765_v23 }
 0x11f   :  { %v751_v0 = vadd.f32 %v750_v21, %v1652_v26  ;;  %v883_v36 = vadd.f32 %v882_v24, %v820_v20  ;;  %v823_v26 = vmul.f32 %v1684_v49, %v1684_v49 }
 0x121   :  { %v752_v39 = vadd.f32 %v751_v0, %v1671_v41  ;;  %v884_v15 = vadd.f32 %v883_v36, %v821_v57 }
 0x123   :  { %v753_v40 = vadd.f32 %v752_v39, %v1684_v49  ;;  %v885_v22 = vadd.f32 %v884_v15, %v822_v18  ;;  %v1881_v49 = vpop.f32.mrf.mxu3 }
 0x125   :  { %v886_v45 = vadd.f32 %v885_v22, %v823_v26  ;;  %v754_v41 = vadd.f32 %v753_v40, %v1696_v54  ;;  %v833_v40 = vmul.f32 %v1827_v51, %v1827_v51 }
 0x127   :  { %v755_v50 = vadd.f32 %v754_v41, %v1705_v59  ;;  %v887_v56 = vadd.f32 %v886_v45, %v824_v43  ;;  %v828_v59 = vmul.f32 %v1749_v16, %v1749_v16  ;;  %v835_v41 = vmul.f32 %v1675_v44, %v1675_v44 }
 0x129   :  { %v756_v61 = vadd.f32 %v755_v50, %v1719_v1  ;;  %v888_v47 = vadd.f32 %v887_v56, %v825_v46  ;;  %v1895_v1 = vpop.f32.mrf.mxu2  ;;  %v836_v50 = vmul.f32 %v1688_v52, %v1688_v52 }
 0x12b   :  { %v757_v54 = vadd.f32 %v756_v61, %v1735_v9  ;;  %v889_v58 = vadd.f32 %v888_v47, %v826_v29  ;;  %v1897_v24 = vpop.f32.mrf.mxu3  ;;  %v1232_v9 = vpack.c.bf16 %v1895_v1, %v1879_v14  ;;  %v837_v29 = vmul.f32 %v1698_v55, %v1698_v55 }
 0x12c   :  { %v1262_v57 = vpack.c.bf16 %v1897_v24, %v1881_v49 }
 0x12d   :  { %v758_v6 = vadd.f32 %v757_v54, %v1749_v16  ;;  %v890_v10 = vadd.f32 %v889_v58, %v827_v53  ;;  %v830_v16 = vmul.f32 %v1779_v30, %v1779_v30  ;;  %1327 = vst [vmem:[%s2035_s3 + $0xb8] sm:$0xff] %v1232_v9  }
 0x12e   :  { %1333 = vst [vmem:[%s2035_s3 + $0xe8] sm:$0xff] %v1262_v57   ;;  %v842_v57 = vmul.f32 %v1769_v27, %v1769_v27 }
 0x12f   :  { %v759_v20 = vadd.f32 %v758_v6, %v1765_v23  ;;  %v891_v21 = vadd.f32 %v890_v10, %v828_v59  ;;  %v840_v6 = vmul.f32 %v1739_v12, %v1739_v12 }
 0x131   :  { %v760_v0 = vadd.f32 %v759_v20, %v1779_v30  ;;  %v892_v36 = vadd.f32 %v891_v21, %v829_v11  ;;  %v832_v30 = vmul.f32 %v1811_v25, %v1811_v25 }
 0x133   :  { %v893_v23 = vadd.f32 %v892_v36, %v830_v16  ;;  %v761_v2 = vadd.f32 %v760_v0, %v1797_v7  ;;  %v1921_v22 = vpop.f32.mrf.mxu3  ;;  %v834_v7 = vmul.f32 %v1656_v31, %v1656_v31  ;;  %v843_v16 = vmul.f32 %v1781_v32, %v1781_v32 }
 0x135   :  { %v894_v18 = vadd.f32 %v893_v23, %v831_v8  ;;  %v762_v39 = vadd.f32 %v761_v2, %v1811_v25  ;;  %v844_v23 = vmul.f32 %v1801_v60, %v1801_v60 }
 0x137   :  { %v895_v15 = vadd.f32 %v894_v18, %v832_v30  ;;  %v763_v26 = vadd.f32 %v762_v39, %v1827_v51  ;;  %v845_v18 = vmul.f32 %v1813_v34, %v1813_v34 }
 0x139   :  { %v764_v43 = vadd.f32 %v763_v26, %v1656_v31  ;;  %v896_v45 = vadd.f32 %v895_v15, %v833_v40 }
 0x13b   :  { %v765_v46 = vadd.f32 %v764_v43, %v1675_v44  ;;  %v897_v25 = vadd.f32 %v896_v45, %v834_v7  ;;  %v1935_v31 = vpop.f32.mrf.mxu3  ;;  %v838_v44 = vmul.f32 %v1709_v62, %v1709_v62  ;;  %v848_v45 = vmul.f32 %v1879_v14, %v1879_v14 }
 0x13c   :  { %v1267_v53 = vpack.c.bf16 %v1935_v31, %v1921_v22 }
 0x13d   :  { %v766_v56 = vadd.f32 %v765_v46, %v1688_v52  ;;  %v898_v51 = vadd.f32 %v897_v25, %v835_v41  ;;  %v839_v52 = vmul.f32 %v1721_v3, %v1721_v3  ;;  %v850_v25 = vmul.f32 %v1711_v63, %v1711_v63 }
 0x13e   :  { %1334 = vst [vmem:[%s2035_s3 + $0xf0] sm:$0xff] %v1267_v53  }
 0x13f   :  { %v767_v61 = vadd.f32 %v766_v56, %v1698_v55  ;;  %v899_v47 = vadd.f32 %v898_v51, %v836_v50 }
 0x141   :  { %v768_v54 = vadd.f32 %v767_v61, %v1709_v62  ;;  %v900_v58 = vadd.f32 %v899_v47, %v837_v29  ;;  %v841_v62 = vmul.f32 %v1751_v17, %v1751_v17 }
 0x143   :  { %v769_v55 = vadd.f32 %v768_v54, %v1721_v3  ;;  %v901_v59 = vadd.f32 %v900_v58, %v838_v44  ;;  %v1954_v9 = vpop.f32.mrf.mxu3 }
 0x145   :  { %v902_v10 = vadd.f32 %v901_v59, %v839_v52  ;;  %v770_v11 = vadd.f32 %v769_v55, %v1739_v12 }
 0x147   :  { %v771_v20 = vadd.f32 %v770_v11, %v1751_v17  ;;  %v903_v21 = vadd.f32 %v902_v10, %v840_v6 }
 0x149   :  { %v772_v3 = vadd.f32 %v771_v20, %v1769_v27  ;;  %v904_v0 = vadd.f32 %v903_v21, %v841_v62 }
 0x14b   :  { %v773_v36 = vadd.f32 %v772_v3, %v1781_v32  ;;  %v905_v12 = vadd.f32 %v904_v0, %v842_v57  ;;  %v602_v27 = vpop.f32.mrf.mxu3  ;;  %v846_v32 = vmul.f32 %v1831_v5, %v1831_v5 }
 0x14c   :  { %v1272_v30 = vpack.c.bf16 %v602_v27, %v1954_v9 }
 0x14d   :  { %v774_v17 = vadd.f32 %v773_v36, %v1801_v60  ;;  %v906_v2 = vadd.f32 %v905_v12, %v843_v16  ;;  %v861_v16 = vmul.f32 %v1897_v24, %v1897_v24 }
 0x14e   :  { %1335 = vst [vmem:[%s2035_s3 + $0xf8] sm:$0xff] %v1272_v30   ;;  %v865_v30 = vmul.f32 %v602_v27, %v602_v27 }
 0x14f   :  { %v775_v8 = vadd.f32 %v774_v17, %v1813_v34  ;;  %v907_v39 = vadd.f32 %v906_v2, %v844_v23  ;;  %v847_v34 = vmul.f32 %v1853_v37, %v1853_v37  ;;  %v862_v23 = vmul.f32 %v1921_v22, %v1921_v22 }
 0x150   :  { %v863_v2 = vmul.f32 %v1935_v31, %v1935_v31 }
 0x151   :  { %v908_v15 = vadd.f32 %v907_v39, %v845_v18  ;;  %v776_v26 = vadd.f32 %v775_v8, %v1831_v5  ;;  %v849_v5 = vmul.f32 %v1895_v1, %v1895_v1  ;;  %v864_v18 = vmul.f32 %v1954_v9, %v1954_v9 }
 0x153   :  { %v909_v60 = vadd.f32 %v908_v15, %v846_v32  ;;  %v777_v40 = vadd.f32 %v776_v26, %v1853_v37  ;;  %v851_v37 = vmul.f32 %v1723_v4, %v1723_v4 }
 0x155   :  { %v910_v7 = vadd.f32 %v909_v60, %v847_v34  ;;  %v778_v43 = vadd.f32 %v777_v40, %v1879_v14  ;;  %v852_v14 = vmul.f32 %v1741_v13, %v1741_v13 }
 0x157   :  { %v911_v41 = vadd.f32 %v910_v7, %v848_v45  ;;  %v779_v46 = vadd.f32 %v778_v43, %v1895_v1  ;;  %v853_v1 = vmul.f32 %v1753_v19, %v1753_v19 }
 0x159   :  { %v780_v50 = vadd.f32 %v779_v46, %v1711_v63  ;;  %v912_v56 = vadd.f32 %v911_v41, %v849_v5  ;;  %v854_v63 = vmul.f32 %v1771_v28, %v1771_v28 }
 0x15b   :  { %v781_v51 = vadd.f32 %v780_v50, %v1723_v4  ;;  %v913_v29 = vadd.f32 %v912_v56, %v850_v25  ;;  %v855_v4 = vmul.f32 %v1783_v33, %v1783_v33 }
 0x15d   :  { %v782_v61 = vadd.f32 %v781_v51, %v1741_v13  ;;  %v914_v47 = vadd.f32 %v913_v29, %v851_v37  ;;  %v856_v13 = vmul.f32 %v1803_v42, %v1803_v42 }
 0x15f   :  { %v783_v53 = vadd.f32 %v782_v61, %v1753_v19  ;;  %v915_v44 = vadd.f32 %v914_v47, %v852_v14  ;;  %v857_v19 = vmul.f32 %v1815_v35, %v1815_v35 }
 0x161   :  { %v784_v54 = vadd.f32 %v783_v53, %v1771_v28  ;;  %v916_v58 = vadd.f32 %v915_v44, %v853_v1  ;;  %v858_v28 = vmul.f32 %v1833_v48, %v1833_v48 }
 0x163   :  { %v785_v52 = vadd.f32 %v784_v54, %v1783_v33  ;;  %v917_v55 = vadd.f32 %v916_v58, %v854_v63  ;;  %v859_v33 = vmul.f32 %v1855_v38, %v1855_v38 }
 0x165   :  { %v918_v59 = vadd.f32 %v917_v55, %v855_v4  ;;  %v786_v6 = vadd.f32 %v785_v52, %v1803_v42  ;;  %v860_v42 = vmul.f32 %v1881_v49, %v1881_v49 }
 0x167   :  { %v787_v10 = vadd.f32 %v786_v6, %v1815_v35  ;;  %v919_v11 = vadd.f32 %v918_v59, %v856_v13 }
 0x169   :  { %v788_v62 = vadd.f32 %v787_v10, %v1833_v48  ;;  %v920_v20 = vadd.f32 %v919_v11, %v857_v19 }
 0x16b   :  { %v789_v21 = vadd.f32 %v788_v62, %v1855_v38  ;;  %v921_v57 = vadd.f32 %v920_v20, %v858_v28 }
 0x16d   :  { %v790_v3 = vadd.f32 %v789_v21, %v1881_v49  ;;  %v922_v0 = vadd.f32 %v921_v57, %v859_v33 }
 0x16f   :  { %v791_v35 = vadd.f32 %v790_v3, %v1897_v24  ;;  %v923_v36 = vadd.f32 %v922_v0, %v860_v42 }
 0x171   :  { %v924_v48 = vadd.f32 %v923_v36, %v861_v16  ;;  %v792_v12 = vadd.f32 %v791_v35, %v1921_v22 }
 0x173   :  { %v925_v38 = vadd.f32 %v924_v48, %v862_v23  ;;  %v793_v17 = vadd.f32 %v792_v12, %v1935_v31 }
 0x175   :  { %v926_v49 = vadd.f32 %v925_v38, %v863_v2  ;;  %v794_v8 = vadd.f32 %v793_v17, %v1954_v9 }
 0x177   :  { %v927_v24 = vadd.f32 %v926_v49, %v864_v18  ;;  %v795_v39 = vadd.f32 %v794_v8, %v602_v27 }
 0x179   :  { %v796_v15 = vrot.slane %v795_v39, 4  ;;  %v928_v26 = vadd.f32 %v927_v24, %v865_v30 }
 0x17b   :  { %v797_v32 = vadd.f32 %v796_v15, %v795_v39  ;;  %v929_v60 = vrot.slane %v928_v26, 4 }
 0x17d   :  { %v798_v22 = vrot.slane %v797_v32, 2  ;;  %v930_v40 = vadd.f32 %v929_v60, %v928_v26 }
 0x17f   :  { %v799_v34 = vadd.f32 %v798_v22, %v797_v32  ;;  %v931_v7 = vrot.slane %v930_v40, 2 }
 0x181   :  { %v800_v43 = vrot.slane %v799_v34, 1  ;;  %v932_v45 = vadd.f32 %v931_v7, %v930_v40 }
 0x183   :  { %v933_v31 = vrot.slane %v932_v45, 1  ;;  %v801_v41 = vadd.f32 %v800_v43, %v799_v34 }
 0x185   :  { %v934_v46 = vadd.f32 %v933_v31, %v932_v45 }
 0x187   :  { %v936_v5 = vsel %vm935_vm0, %v801_v41, %v934_v46 }
 0x188   :  { %937 = vst [vmem:[%s2036_s4] sm:$0x3] %v936_v5 }

// kernel: bottleneck.4
= control target key start
LH: loop header
LB: loop body
LE: loop exit
PB: predicated region body
PF: predicated region fallthrough
CT: control target
= control target key end

     0   :  { %vm832_vm0 = vcmask 1040384   ;;  %s1785_s1 = inlined_call_operand.vmem [shape: bf16[128,128], index: 1, kind: input, shape index: {}]   ;;  %s1786_s0 = inlined_call_operand.vmem [shape: bf16[512,128], index: 0, kind: input, shape index: {}]   ;;  %s1787_s2 = inlined_call_operand.vmem [shape: bf16[512,128], index: 2, kind: output, shape index: {0}]   ;;  %s1788_s3 = inlined_call_operand.vmem [shape: f32[1,2,128], index: 3, kind: output, shape index: {1}]  }
   0x1   :  { %v1042_v0 = vld [vmem:[%s1785_s1 + $0x38] sm:$0xff]  ;;  %v1041_v1 = vld [vmem:[%s1785_s1 + $0x30] sm:$0xff]  ;;  %v1040_v2 = vld [vmem:[%s1785_s1 + $0x28] sm:$0xff] }
   0x2   :  { %333 = vmatpush.bf16.msra.mxu0 %v1042_v0  ;;  %1234 = vmatpush.bf16.msra.mxu1 %v1042_v0  ;;  %v1039_v3 = vld [vmem:[%s1785_s1 + $0x20] sm:$0xff]  ;;  %v1038_v4 = vld [vmem:[%s1785_s1 + $0x18] sm:$0xff]  ;;  %v1037_v5 = vld [vmem:[%s1785_s1 + $0x10] sm:$0xff] }
   0x3   :  { %1235 = vmatpush.bf16.msra.mxu2 %v1042_v0  ;;  %1236 = vmatpush.bf16.msra.mxu3 %v1042_v0  ;;  %v1036_v6 = vld [vmem:[%s1785_s1 + $0x8] sm:$0xff]  ;;  %v1035_v7 = vld [vmem:[%s1785_s1] sm:$0xff]  ;;  %v1005_v13 = vld [vmem:[%s1786_s0 + $0x10] sm:$0xff] }
   0x4   :  { %v1003_v8 = vld [vmem:[%s1786_s0] sm:$0xff]  ;;  %v1004_v10 = vld [vmem:[%s1786_s0 + $0x8] sm:$0xff]  ;;  %v1013_v14 = vld [vmem:[%s1786_s0 + $0x50] sm:$0xff] }
   0x5   :  { %v1011_v9 = vld [vmem:[%s1786_s0 + $0x40] sm:$0xff]  ;;  %v1012_v11 = vld [vmem:[%s1786_s0 + $0x48] sm:$0xff]  ;;  %v1006_v16 = vld [vmem:[%s1786_s0 + $0x18] sm:$0xff] }
   0x6   :  { %334 = vmatpush.bf16.msra.mxu0 %v1041_v1  ;;  %1237 = vmatpush.bf16.msra.mxu1 %v1041_v1  ;;  %v1019_v12 = vld [vmem:[%s1786_s0 + $0x80] sm:$0xff]  ;;  %v1020_v15 = vld [vmem:[%s1786_s0 + $0x88] sm:$0xff]  ;;  %v1014_v17 = vld [vmem:[%s1786_s0 + $0x58] sm:$0xff] }
   0x7   :  { %1238 = vmatpush.bf16.msra.mxu2 %v1041_v1  ;;  %1239 = vmatpush.bf16.msra.mxu3 %v1041_v1  ;;  %v1021_v18 = vld [vmem:[%s1786_s0 + $0x90] sm:$0xff]  ;;  %v1027_v19 = vld [vmem:[%s1786_s0 + $0xc0] sm:$0xff]  ;;  %v1022_v22 = vld [vmem:[%s1786_s0 + $0x98] sm:$0xff] }
   0x8   :  { %v1007_v20 = vld [vmem:[%s1786_s0 + $0x20] sm:$0xff]  ;;  %v1028_v23 = vld [vmem:[%s1786_s0 + $0xc8] sm:$0xff]  ;;  %v1029_v27 = vld [vmem:[%s1786_s0 + $0xd0] sm:$0xff] }
   0x9   :  { %v1015_v21 = vld [vmem:[%s1786_s0 + $0x60] sm:$0xff]  ;;  %v1008_v24 = vld [vmem:[%s1786_s0 + $0x28] sm:$0xff]  ;;  %v1009_v28 = vld [vmem:[%s1786_s0 + $0x30] sm:$0xff] }
   0xa   :  { %335 = vmatpush.bf16.msra.mxu0 %v1040_v2  ;;  %1240 = vmatpush.bf16.msra.mxu1 %v1040_v2  ;;  %v1016_v25 = vld [vmem:[%s1786_s0 + $0x68] sm:$0xff]  ;;  %v1023_v26 = vld [vmem:[%s1786_s0 + $0xa0] sm:$0xff]  ;;  %v1017_v29 = vld [vmem:[%s1786_s0 + $0x70] sm:$0xff] }
   0xb   :  { %1241 = vmatpush.bf16.msra.mxu2 %v1040_v2  ;;  %1242 = vmatpush.bf16.msra.mxu3 %v1040_v2  ;;  %v1024_v30 = vld [vmem:[%s1786_s0 + $0xa8] sm:$0xff]  ;;  %v1030_v31 = vld [vmem:[%s1786_s0 + $0xd8] sm:$0xff]  ;;  %v1025_v34 = vld [vmem:[%s1786_s0 + $0xb0] sm:$0xff] }
   0xc   :  { %v1010_v32 = vld [vmem:[%s1786_s0 + $0x38] sm:$0xff]  ;;  %v1031_v35 = vld [vmem:[%s1786_s0 + $0xe0] sm:$0xff]  ;;  %v1032_v39 = vld [vmem:[%s1786_s0 + $0xe8] sm:$0xff] }
   0xd   :  { %v1018_v33 = vld [vmem:[%s1786_s0 + $0x78] sm:$0xff]  ;;  %v1033_v53 = vld [vmem:[%s1786_s0 + $0xf0] sm:$0xff] }
   0xe   :  { %336 = vmatpush.bf16.msra.mxu0 %v1039_v3  ;;  %1243 = vmatpush.bf16.msra.mxu1 %v1039_v3  ;;  %v1026_v38 = vld [vmem:[%s1786_s0 + $0xb8] sm:$0xff] }
   0xf   :  { %1244 = vmatpush.bf16.msra.mxu2 %v1039_v3  ;;  %1245 = vmatpush.bf16.msra.mxu3 %v1039_v3 }
  0x12   :  { %337 = vmatpush.bf16.msra.mxu0 %v1038_v4  ;;  %1246 = vmatpush.bf16.msra.mxu1 %v1038_v4 }
  0x13   :  { %1247 = vmatpush.bf16.msra.mxu2 %v1038_v4  ;;  %1248 = vmatpush.bf16.msra.mxu3 %v1038_v4 }
  0x16   :  { %338 = vmatpush.bf16.msra.mxu0 %v1037_v5  ;;  %1249 = vmatpush.bf16.msra.mxu1 %v1037_v5 }
  0x17   :  { %1250 = vmatpush.bf16.msra.mxu2 %v1037_v5  ;;  %1251 = vmatpush.bf16.msra.mxu3 %v1037_v5  ;;  %v1034_v5 = vld [vmem:[%s1786_s0 + $0xf8] sm:$0xff] }
  0x1a   :  { %339 = vmatpush.bf16.msra.mxu0 %v1036_v6  ;;  %1252 = vmatpush.bf16.msra.mxu1 %v1036_v6 }
  0x1b   :  { %1253 = vmatpush.bf16.msra.mxu2 %v1036_v6  ;;  %1254 = vmatpush.bf16.msra.mxu3 %v1036_v6 }
  0x1e   :  { %340 = vmatpush.bf16.msra.mxu0 %v1035_v7  ;;  %1255 = vmatpush.bf16.msra.mxu1 %v1035_v7 }
  0x1f   :  { %1256 = vmatpush.bf16.msra.mxu2 %v1035_v7  ;;  %1257 = vmatpush.bf16.msra.mxu3 %v1035_v7 }
  0x21   :  { %341 = vmatmul.bf16.vlgmr.msra.gmra.mxu0 %v1003_v8  ;;  %381 = vmatmul.bf16.vlgmr.msra.gmra.mxu1 %v1011_v9 }
  0x22   :  { %421 = vmatmul.bf16.vlgmr.msra.gmra.mxu2 %v1019_v12  ;;  %461 = vmatmul.bf16.vlgmr.msra.gmra.mxu3 %v1027_v19 }
  0x31   :  { %346 = vmatmul.bf16.gmra.mxu0 %v1004_v10  ;;  %386 = vmatmul.bf16.gmra.mxu1 %v1012_v11 }
  0x32   :  { %426 = vmatmul.bf16.gmra.mxu2 %v1020_v15  ;;  %466 = vmatmul.bf16.gmra.mxu3 %v1028_v23 }
  0x41   :  { %351 = vmatmul.bf16.gmra.mxu0 %v1005_v13  ;;  %391 = vmatmul.bf16.gmra.mxu1 %v1013_v14 }
  0x42   :  { %431 = vmatmul.bf16.gmra.mxu2 %v1021_v18  ;;  %471 = vmatmul.bf16.gmra.mxu3 %v1029_v27 }
  0x51   :  { %356 = vmatmul.bf16.gmra.mxu0 %v1006_v16  ;;  %396 = vmatmul.bf16.gmra.mxu1 %v1014_v17 }
  0x52   :  { %436 = vmatmul.bf16.gmra.mxu2 %v1022_v22  ;;  %476 = vmatmul.bf16.gmra.mxu3 %v1030_v31 }
  0x61   :  { %361 = vmatmul.bf16.gmra.mxu0 %v1007_v20  ;;  %401 = vmatmul.bf16.gmra.mxu1 %v1015_v21 }
  0x62   :  { %441 = vmatmul.bf16.gmra.mxu2 %v1023_v26  ;;  %481 = vmatmul.bf16.gmra.mxu3 %v1031_v35 }
  0x71   :  { %366 = vmatmul.bf16.gmra.mxu0 %v1008_v24  ;;  %406 = vmatmul.bf16.gmra.mxu1 %v1016_v25 }
  0x72   :  { %446 = vmatmul.bf16.gmra.mxu2 %v1024_v30  ;;  %486 = vmatmul.bf16.gmra.mxu3 %v1032_v39 }
  0x81   :  { %371 = vmatmul.bf16.gmra.mxu0 %v1009_v28  ;;  %411 = vmatmul.bf16.gmra.mxu1 %v1017_v29 }
  0x82   :  { %451 = vmatmul.bf16.gmra.mxu2 %v1025_v34  ;;  %491 = vmatmul.bf16.gmra.mxu3 %v1033_v53 }
  0x91   :  { %376 = vmatmul.bf16.gmra.mxu0 %v1010_v32  ;;  %416 = vmatmul.bf16.gmra.mxu1 %v1018_v33 }
  0x92   :  { %456 = vmatmul.bf16.gmra.mxu2 %v1026_v38  ;;  %496 = vmatmul.bf16.gmra.mxu3 %v1034_v5 }
  0x9e   :  { %v342_v36 = vpop.f32.mrf.mxu0  ;;  %v1386_v37 = vpop.f32.mrf.mxu1 }
  0x9f   :  { %v699_v40 = vmul.f32 %v342_v36, %v342_v36 }
  0xa5   :  { %v1413_v60 = vpop.f32.mrf.mxu2  ;;  %v1464_v20 = vpop.f32.mrf.mxu3 }
  0xa6   :  { %v344_v41 = vpop.f32.mrf.mxu0  ;;  %v1394_v42 = vpop.f32.mrf.mxu1 }
  0xa7   :  { %v1046_v43 = vpack.c.bf16 %v344_v41, %v342_v36  ;;  %v630_v44 = vadd.f32 %v344_v41, %v342_v36  ;;  %v700_v45 = vmul.f32 %v344_v41, %v344_v41  ;;  %v1086_v46 = vpack.c.bf16 %v1394_v42, %v1386_v37 }
  0xa9   :  { %1047 = vst [vmem:[%s1787_s2] sm:$0xff] %v1046_v43   ;;  %v763_v47 = vadd.f32 %v700_v45, %v699_v40 }
  0xaa   :  { %1210 = vst [vmem:[%s1787_s2 + $0x40] sm:$0xff] %v1086_v46  }
  0xad   :  { %v1425_v2 = vpop.f32.mrf.mxu2  ;;  %v1476_v24 = vpop.f32.mrf.mxu3 }
  0xae   :  { %v347_v48 = vpop.f32.mrf.mxu0  ;;  %v1404_v49 = vpop.f32.mrf.mxu1  ;;  %v1126_v3 = vpack.c.bf16 %v1425_v2, %v1413_v60  ;;  %v1166_v26 = vpack.c.bf16 %v1476_v24, %v1464_v20 }
  0xaf   :  { %v631_v50 = vadd.f32 %v630_v44, %v347_v48  ;;  %v701_v51 = vmul.f32 %v347_v48, %v347_v48 }
  0xb0   :  { %1218 = vst [vmem:[%s1787_s2 + $0x80] sm:$0xff] %v1126_v3  }
  0xb1   :  { %v764_v52 = vadd.f32 %v763_v47, %v701_v51  ;;  %1226 = vst [vmem:[%s1787_s2 + $0xc0] sm:$0xff] %v1166_v26  }
  0xb5   :  { %v1441_v10 = vpop.f32.mrf.mxu2  ;;  %v1494_v32 = vpop.f32.mrf.mxu3 }
  0xb6   :  { %v349_v54 = vpop.f32.mrf.mxu0  ;;  %v1409_v55 = vpop.f32.mrf.mxu1 }
  0xb7   :  { %v1051_v56 = vpack.c.bf16 %v349_v54, %v347_v48  ;;  %v632_v57 = vadd.f32 %v631_v50, %v349_v54  ;;  %v702_v58 = vmul.f32 %v349_v54, %v349_v54  ;;  %v1091_v59 = vpack.c.bf16 %v1409_v55, %v1404_v49 }
  0xb9   :  { %1203 = vst [vmem:[%s1787_s2 + $0x8] sm:$0xff] %v1051_v56   ;;  %v765_v61 = vadd.f32 %v764_v52, %v702_v58 }
  0xba   :  { %1211 = vst [vmem:[%s1787_s2 + $0x48] sm:$0xff] %v1091_v59  }
  0xbd   :  { %v1451_v13 = vpop.f32.mrf.mxu2  ;;  %v1506_v36 = vpop.f32.mrf.mxu3 }
  0xbe   :  { %v352_v62 = vpop.f32.mrf.mxu0  ;;  %v1421_v63 = vpop.f32.mrf.mxu1  ;;  %v1131_v14 = vpack.c.bf16 %v1451_v13, %v1441_v10  ;;  %v1171_v39 = vpack.c.bf16 %v1506_v36, %v1494_v32 }
  0xbf   :  { %v1423_v0 = vadd.f32 %v632_v57, %v352_v62  ;;  %v703_v1 = vmul.f32 %v352_v62, %v352_v62 }
  0xc0   :  { %1219 = vst [vmem:[%s1787_s2 + $0x88] sm:$0xff] %v1131_v14  }
  0xc1   :  { %v1429_v4 = vadd.f32 %v765_v61, %v703_v1  ;;  %1227 = vst [vmem:[%s1787_s2 + $0xc8] sm:$0xff] %v1171_v39  }
  0xc5   :  { %v1462_v19 = vpop.f32.mrf.mxu2  ;;  %v1524_v46 = vpop.f32.mrf.mxu3 }
  0xc6   :  { %v354_v6 = vpop.f32.mrf.mxu0  ;;  %v1437_v7 = vpop.f32.mrf.mxu1 }
  0xc7   :  { %v1056_v8 = vpack.c.bf16 %v354_v6, %v352_v62  ;;  %v1096_v9 = vpack.c.bf16 %v1437_v7, %v1421_v63  ;;  %v704_v52 = vmul.f32 %v354_v6, %v354_v6  ;;  %v634_v57 = vadd.f32 %v1423_v0, %v354_v6 }
  0xc9   :  { %1204 = vst [vmem:[%s1787_s2 + $0x10] sm:$0xff] %v1056_v8   ;;  %v767_v58 = vadd.f32 %v1429_v4, %v704_v52 }
  0xca   :  { %1212 = vst [vmem:[%s1787_s2 + $0x50] sm:$0xff] %v1096_v9  }
  0xcd   :  { %v1474_v23 = vpop.f32.mrf.mxu2  ;;  %v1536_v51 = vpop.f32.mrf.mxu3 }
  0xce   :  { %v357_v11 = vpop.f32.mrf.mxu0  ;;  %v1449_v12 = vpop.f32.mrf.mxu1  ;;  %v1136_v25 = vpack.c.bf16 %v1474_v23, %v1462_v19  ;;  %v1176_v54 = vpack.c.bf16 %v1536_v51, %v1524_v46 }
  0xcf   :  { %v705_v56 = vmul.f32 %v357_v11, %v357_v11  ;;  %v635_v61 = vadd.f32 %v634_v57, %v357_v11 }
  0xd0   :  { %1220 = vst [vmem:[%s1787_s2 + $0x90] sm:$0xff] %v1136_v25  }
  0xd1   :  { %1228 = vst [vmem:[%s1787_s2 + $0xd0] sm:$0xff] %v1176_v54   ;;  %v768_v62 = vadd.f32 %v767_v58, %v705_v56 }
  0xd5   :  { %v1492_v31 = vpop.f32.mrf.mxu2  ;;  %v1556_v0 = vpop.f32.mrf.mxu3 }
  0xd6   :  { %v359_v15 = vpop.f32.mrf.mxu0  ;;  %v1458_v16 = vpop.f32.mrf.mxu1 }
  0xd7   :  { %v1061_v17 = vpack.c.bf16 %v359_v15, %v357_v11  ;;  %v1101_v18 = vpack.c.bf16 %v1458_v16, %v1449_v12  ;;  %v706_v59 = vmul.f32 %v359_v15, %v359_v15  ;;  %v636_v8 = vadd.f32 %v635_v61, %v359_v15 }
  0xd9   :  { %1205 = vst [vmem:[%s1787_s2 + $0x18] sm:$0xff] %v1061_v17   ;;  %v769_v6 = vadd.f32 %v768_v62, %v706_v59 }
  0xda   :  { %1213 = vst [vmem:[%s1787_s2 + $0x58] sm:$0xff] %v1101_v18  }
  0xdd   :  { %v1504_v35 = vpop.f32.mrf.mxu2 }
  0xde   :  { %v362_v21 = vpop.f32.mrf.mxu0  ;;  %v1472_v22 = vpop.f32.mrf.mxu1  ;;  %v1141_v38 = vpack.c.bf16 %v1504_v35, %v1492_v31 }
  0xdf   :  { %v707_v1 = vmul.f32 %v362_v21, %v362_v21  ;;  %v637_v25 = vadd.f32 %v636_v8, %v362_v21 }
  0xe0   :  { %1221 = vst [vmem:[%s1787_s2 + $0x98] sm:$0xff] %v1141_v38  }
  0xe1   :  { %v770_v4 = vadd.f32 %v769_v6, %v707_v1 }
  0xe5   :  { %v1522_v45 = vpop.f32.mrf.mxu2 }
  0xe6   :  { %v364_v27 = vpop.f32.mrf.mxu0  ;;  %v1488_v28 = vpop.f32.mrf.mxu1 }
  0xe7   :  { %v1066_v29 = vpack.c.bf16 %v364_v27, %v362_v21  ;;  %v1106_v30 = vpack.c.bf16 %v1488_v28, %v1472_v22  ;;  %v708_v18 = vmul.f32 %v364_v27, %v364_v27  ;;  %v638_v15 = vadd.f32 %v637_v25, %v364_v27 }
  0xe9   :  { %1206 = vst [vmem:[%s1787_s2 + $0x20] sm:$0xff] %v1066_v29   ;;  %v771_v26 = vadd.f32 %v770_v4, %v708_v18 }
  0xea   :  { %1214 = vst [vmem:[%s1787_s2 + $0x60] sm:$0xff] %v1106_v30  }
  0xed   :  { %v1534_v50 = vpop.f32.mrf.mxu2 }
  0xee   :  { %v367_v33 = vpop.f32.mrf.mxu0  ;;  %v1502_v34 = vpop.f32.mrf.mxu1  ;;  %v1146_v53 = vpack.c.bf16 %v1534_v50, %v1522_v45 }
  0xef   :  { %v709_v11 = vmul.f32 %v367_v33, %v367_v33  ;;  %v639_v30 = vadd.f32 %v638_v15, %v367_v33 }
  0xf0   :  { %1222 = vst [vmem:[%s1787_s2 + $0xa0] sm:$0xff] %v1146_v53   ;;  %v1568_v53 = vpop.f32.mrf.mxu3 }
  0xf1   :  { %v772_v38 = vadd.f32 %v771_v26, %v709_v11  ;;  %v1181_v27 = vpack.c.bf16 %v1568_v53, %v1556_v0  ;;  %v716_v26 = vmul.f32 %v1394_v42, %v1394_v42 }
  0xf3   :  { %1229 = vst [vmem:[%s1787_s2 + $0xd8] sm:$0xff] %v1181_v27  }
  0xf5   :  { %v1554_v17 = vpop.f32.mrf.mxu2 }
  0xf6   :  { %v369_v40 = vpop.f32.mrf.mxu0  ;;  %v1518_v41 = vpop.f32.mrf.mxu1 }
  0xf7   :  { %v1071_v43 = vpack.c.bf16 %v369_v40, %v367_v33  ;;  %v1111_v44 = vpack.c.bf16 %v1518_v41, %v1502_v34  ;;  %v710_v29 = vmul.f32 %v369_v40, %v369_v40  ;;  %v640_v21 = vadd.f32 %v639_v30, %v369_v40 }
  0xf8   :  { %v1586_v4 = vpop.f32.mrf.mxu3 }
  0xf9   :  { %1207 = vst [vmem:[%s1787_s2 + $0x28] sm:$0xff] %v1071_v43   ;;  %v773_v54 = vadd.f32 %v772_v38, %v710_v29  ;;  %v717_v38 = vmul.f32 %v1404_v49, %v1404_v49 }
  0xfa   :  { %1215 = vst [vmem:[%s1787_s2 + $0x68] sm:$0xff] %v1111_v44  }
  0xfd   :  { %v1566_v52 = vpop.f32.mrf.mxu2 }
  0xfe   :  { %v372_v47 = vpop.f32.mrf.mxu0  ;;  %v1532_v48 = vpop.f32.mrf.mxu1  ;;  %v1151_v57 = vpack.c.bf16 %v1566_v52, %v1554_v17 }
  0xff   :  { %v711_v39 = vmul.f32 %v372_v47, %v372_v47  ;;  %v641_v58 = vadd.f32 %v640_v21, %v372_v47 }
 0x100   :  { %1223 = vst [vmem:[%s1787_s2 + $0xa8] sm:$0xff] %v1151_v57   ;;  %v1608_v57 = vpop.f32.mrf.mxu3 }
 0x101   :  { %v774_v33 = vadd.f32 %v773_v54, %v711_v39  ;;  %v1186_v27 = vpack.c.bf16 %v1608_v57, %v1586_v4 }
 0x103   :  { %1230 = vst [vmem:[%s1787_s2 + $0xe0] sm:$0xff] %v1186_v27  }
 0x105   :  { %v1584_v25 = vpop.f32.mrf.mxu2 }
 0x106   :  { %v374_v3 = vpop.f32.mrf.mxu0  ;;  %v1550_v5 = vpop.f32.mrf.mxu1 }
 0x107   :  { %v1076_v9 = vpack.c.bf16 %v374_v3, %v372_v47  ;;  %v1116_v14 = vpack.c.bf16 %v1550_v5, %v1532_v48  ;;  %v712_v56 = vmul.f32 %v374_v3, %v374_v3  ;;  %v642_v40 = vadd.f32 %v641_v58, %v374_v3 }
 0x108   :  { %v715_v3 = vmul.f32 %v1386_v37, %v1386_v37  ;;  %v728_v27 = vmul.f32 %v1550_v5, %v1550_v5 }
 0x109   :  { %1208 = vst [vmem:[%s1787_s2 + $0x30] sm:$0xff] %v1076_v9   ;;  %v775_v61 = vadd.f32 %v774_v33, %v712_v56 }
 0x10a   :  { %1216 = vst [vmem:[%s1787_s2 + $0x70] sm:$0xff] %v1116_v14  }
 0x10d   :  { %v1606_v56 = vpop.f32.mrf.mxu2 }
 0x10e   :  { %v377_v43 = vpop.f32.mrf.mxu0  ;;  %v1564_v44 = vpop.f32.mrf.mxu1 }
 0x10f   :  { %v713_v59 = vmul.f32 %v377_v43, %v377_v43  ;;  %v643_v62 = vadd.f32 %v642_v40, %v377_v43 }
 0x111   :  { %v776_v1 = vadd.f32 %v775_v61, %v713_v59  ;;  %v721_v61 = vmul.f32 %v1449_v12, %v1449_v12 }
 0x116   :  { %v379_v8 = vpop.f32.mrf.mxu0  ;;  %v1580_v9 = vpop.f32.mrf.mxu1 }
 0x117   :  { %v1081_v14 = vpack.c.bf16 %v379_v8, %v377_v43  ;;  %v644_v6 = vadd.f32 %v643_v62, %v379_v8  ;;  %v714_v47 = vmul.f32 %v379_v8, %v379_v8  ;;  %v1121_v18 = vpack.c.bf16 %v1580_v9, %v1564_v44 }
 0x119   :  { %1209 = vst [vmem:[%s1787_s2 + $0x38] sm:$0xff] %v1081_v14   ;;  %v645_v11 = vadd.f32 %v644_v6, %v1386_v37  ;;  %v777_v15 = vadd.f32 %v776_v1, %v714_v47  ;;  %v718_v37 = vmul.f32 %v1409_v55, %v1409_v55  ;;  %v722_v1 = vmul.f32 %v1458_v16, %v1458_v16  ;;  %v1632_v6 = vpop.f32.mrf.mxu2 }
 0x11a   :  { %1217 = vst [vmem:[%s1787_s2 + $0x78] sm:$0xff] %v1121_v18   ;;  %v723_v47 = vmul.f32 %v1472_v22, %v1472_v22 }
 0x11b   :  { %v646_v29 = vadd.f32 %v645_v11, %v1394_v42  ;;  %v778_v30 = vadd.f32 %v777_v15, %v715_v3  ;;  %v1156_v42 = vpack.c.bf16 %v1606_v56, %v1584_v25  ;;  %v724_v11 = vmul.f32 %v1488_v28, %v1488_v28 }
 0x11d   :  { %v647_v39 = vadd.f32 %v646_v29, %v1404_v49  ;;  %v779_v43 = vadd.f32 %v778_v30, %v716_v26  ;;  %v719_v49 = vmul.f32 %v1421_v63, %v1421_v63  ;;  %1224 = vst [vmem:[%s1787_s2 + $0xb0] sm:$0xff] %v1156_v42   ;;  %v726_v30 = vmul.f32 %v1518_v41, %v1518_v41 }
 0x11f   :  { %v648_v21 = vadd.f32 %v647_v39, %v1409_v55  ;;  %v780_v54 = vadd.f32 %v779_v43, %v717_v38  ;;  %v720_v55 = vmul.f32 %v1437_v7, %v1437_v7 }
 0x121   :  { %v649_v58 = vadd.f32 %v648_v21, %v1421_v63  ;;  %v781_v33 = vadd.f32 %v780_v54, %v718_v37 }
 0x123   :  { %v650_v59 = vadd.f32 %v649_v58, %v1437_v7  ;;  %v782_v40 = vadd.f32 %v781_v33, %v719_v49  ;;  %v1634_v7 = vpop.f32.mrf.mxu3 }
 0x125   :  { %v783_v62 = vadd.f32 %v782_v40, %v720_v55  ;;  %v651_v63 = vadd.f32 %v650_v59, %v1449_v12  ;;  %v730_v59 = vmul.f32 %v1580_v9, %v1580_v9 }
 0x127   :  { %v652_v8 = vadd.f32 %v651_v63, %v1458_v16  ;;  %v784_v14 = vadd.f32 %v783_v62, %v721_v61  ;;  %v725_v16 = vmul.f32 %v1502_v34, %v1502_v34  ;;  %v732_v63 = vmul.f32 %v1425_v2, %v1425_v2 }
 0x129   :  { %v653_v18 = vadd.f32 %v652_v8, %v1472_v22  ;;  %v785_v3 = vadd.f32 %v784_v14, %v722_v1  ;;  %v1648_v22 = vpop.f32.mrf.mxu2  ;;  %v733_v8 = vmul.f32 %v1441_v10, %v1441_v10 }
 0x12b   :  { %v654_v12 = vadd.f32 %v653_v18, %v1488_v28  ;;  %v786_v15 = vadd.f32 %v785_v3, %v723_v47  ;;  %v1650_v43 = vpop.f32.mrf.mxu3  ;;  %v1161_v28 = vpack.c.bf16 %v1648_v22, %v1632_v6  ;;  %v734_v47 = vmul.f32 %v1451_v13, %v1451_v13 }
 0x12c   :  { %v1191_v37 = vpack.c.bf16 %v1650_v43, %v1634_v7 }
 0x12d   :  { %v655_v26 = vadd.f32 %v654_v12, %v1502_v34  ;;  %v787_v29 = vadd.f32 %v786_v15, %v724_v11  ;;  %v727_v34 = vmul.f32 %v1532_v48, %v1532_v48  ;;  %1225 = vst [vmem:[%s1787_s2 + $0xb8] sm:$0xff] %v1161_v28  }
 0x12e   :  { %1231 = vst [vmem:[%s1787_s2 + $0xe8] sm:$0xff] %v1191_v37   ;;  %v739_v37 = vmul.f32 %v1522_v45, %v1522_v45 }
 0x12f   :  { %v656_v38 = vadd.f32 %v655_v26, %v1518_v41  ;;  %v788_v39 = vadd.f32 %v787_v29, %v725_v16  ;;  %v737_v26 = vmul.f32 %v1492_v31, %v1492_v31 }
 0x131   :  { %v657_v21 = vadd.f32 %v656_v38, %v1532_v48  ;;  %v789_v54 = vadd.f32 %v788_v39, %v726_v30  ;;  %v729_v48 = vmul.f32 %v1564_v44, %v1564_v44 }
 0x133   :  { %v790_v41 = vadd.f32 %v789_v54, %v727_v34  ;;  %v658_v42 = vadd.f32 %v657_v21, %v1550_v5  ;;  %v1674_v40 = vpop.f32.mrf.mxu3  ;;  %v731_v5 = vmul.f32 %v1413_v60, %v1413_v60  ;;  %v740_v34 = vmul.f32 %v1534_v50, %v1534_v50 }
 0x135   :  { %v791_v49 = vadd.f32 %v790_v41, %v728_v27  ;;  %v659_v58 = vadd.f32 %v658_v42, %v1564_v44  ;;  %v741_v41 = vmul.f32 %v1554_v17, %v1554_v17 }
 0x137   :  { %v792_v33 = vadd.f32 %v791_v49, %v729_v48  ;;  %v660_v55 = vadd.f32 %v659_v58, %v1580_v9  ;;  %v742_v49 = vmul.f32 %v1566_v52, %v1566_v52 }
 0x139   :  { %v661_v61 = vadd.f32 %v660_v55, %v1413_v60  ;;  %v793_v62 = vadd.f32 %v792_v33, %v730_v59 }
 0x13b   :  { %v662_v1 = vadd.f32 %v661_v61, %v1425_v2  ;;  %v794_v44 = vadd.f32 %v793_v62, %v731_v5  ;;  %v1688_v60 = vpop.f32.mrf.mxu3  ;;  %v735_v2 = vmul.f32 %v1462_v19, %v1462_v19  ;;  %v745_v62 = vmul.f32 %v1632_v6, %v1632_v6 }
 0x13c   :  { %v1196_v11 = vpack.c.bf16 %v1688_v60, %v1674_v40 }
 0x13d   :  { %v663_v14 = vadd.f32 %v662_v1, %v1441_v10  ;;  %v795_v9 = vadd.f32 %v794_v44, %v732_v63  ;;  %v736_v10 = vmul.f32 %v1474_v23, %v1474_v23  ;;  %v747_v44 = vmul.f32 %v1464_v20, %v1464_v20 }
 0x13e   :  { %1232 = vst [vmem:[%s1787_s2 + $0xf0] sm:$0xff] %v1196_v11  }
 0x13f   :  { %v664_v18 = vadd.f32 %v663_v14, %v1451_v13  ;;  %v796_v3 = vadd.f32 %v795_v9, %v733_v8 }
 0x141   :  { %v665_v12 = vadd.f32 %v664_v18, %v1462_v19  ;;  %v797_v15 = vadd.f32 %v796_v3, %v734_v47  ;;  %v738_v19 = vmul.f32 %v1504_v35, %v1504_v35 }
 0x143   :  { %v666_v13 = vadd.f32 %v665_v12, %v1474_v23  ;;  %v798_v16 = vadd.f32 %v797_v15, %v735_v2  ;;  %v1707_v28 = vpop.f32.mrf.mxu3 }
 0x145   :  { %v799_v29 = vadd.f32 %v798_v16, %v736_v10  ;;  %v667_v30 = vadd.f32 %v666_v13, %v1492_v31 }
 0x147   :  { %v668_v38 = vadd.f32 %v667_v30, %v1504_v35  ;;  %v800_v39 = vadd.f32 %v799_v29, %v737_v26 }
 0x149   :  { %v669_v23 = vadd.f32 %v668_v38, %v1522_v45  ;;  %v801_v21 = vadd.f32 %v800_v39, %v738_v19 }
 0x14b   :  { %v670_v54 = vadd.f32 %v669_v23, %v1534_v50  ;;  %v802_v31 = vadd.f32 %v801_v21, %v739_v37  ;;  %v499_v45 = vpop.f32.mrf.mxu3  ;;  %v743_v50 = vmul.f32 %v1584_v25, %v1584_v25 }
 0x14c   :  { %v1201_v48 = vpack.c.bf16 %v499_v45, %v1707_v28 }
 0x14d   :  { %v671_v35 = vadd.f32 %v670_v54, %v1554_v17  ;;  %v803_v42 = vadd.f32 %v802_v31, %v740_v34  ;;  %v758_v34 = vmul.f32 %v1650_v43, %v1650_v43 }
 0x14e   :  { %1233 = vst [vmem:[%s1787_s2 + $0xf8] sm:$0xff] %v1201_v48   ;;  %v762_v48 = vmul.f32 %v499_v45, %v499_v45 }
 0x14f   :  { %v672_v27 = vadd.f32 %v671_v35, %v1566_v52  ;;  %v804_v58 = vadd.f32 %v803_v42, %v741_v41  ;;  %v744_v52 = vmul.f32 %v1606_v56, %v1606_v56  ;;  %v759_v41 = vmul.f32 %v1674_v40, %v1674_v40 }
 0x150   :  { %v760_v42 = vmul.f32 %v1688_v60, %v1688_v60 }
 0x151   :  { %v805_v33 = vadd.f32 %v804_v58, %v742_v49  ;;  %v673_v55 = vadd.f32 %v672_v27, %v1584_v25  ;;  %v746_v25 = vmul.f32 %v1648_v22, %v1648_v22  ;;  %v761_v49 = vmul.f32 %v1707_v28, %v1707_v28 }
 0x153   :  { %v806_v17 = vadd.f32 %v805_v33, %v743_v50  ;;  %v674_v59 = vadd.f32 %v673_v55, %v1606_v56  ;;  %v748_v56 = vmul.f32 %v1476_v24, %v1476_v24 }
 0x155   :  { %v807_v5 = vadd.f32 %v806_v17, %v744_v52  ;;  %v675_v61 = vadd.f32 %v674_v59, %v1632_v6  ;;  %v749_v6 = vmul.f32 %v1494_v32, %v1494_v32 }
 0x157   :  { %v808_v63 = vadd.f32 %v807_v5, %v745_v62  ;;  %v676_v1 = vadd.f32 %v675_v61, %v1648_v22  ;;  %v750_v22 = vmul.f32 %v1506_v36, %v1506_v36 }
 0x159   :  { %v677_v8 = vadd.f32 %v676_v1, %v1464_v20  ;;  %v809_v14 = vadd.f32 %v808_v63, %v746_v25  ;;  %v751_v20 = vmul.f32 %v1524_v46, %v1524_v46 }
 0x15b   :  { %v678_v9 = vadd.f32 %v677_v8, %v1476_v24  ;;  %v810_v47 = vadd.f32 %v809_v14, %v747_v44  ;;  %v752_v24 = vmul.f32 %v1536_v51, %v1536_v51 }
 0x15d   :  { %v679_v18 = vadd.f32 %v678_v9, %v1494_v32  ;;  %v811_v3 = vadd.f32 %v810_v47, %v748_v56  ;;  %v753_v32 = vmul.f32 %v1556_v0, %v1556_v0 }
 0x15f   :  { %v680_v11 = vadd.f32 %v679_v18, %v1506_v36  ;;  %v812_v2 = vadd.f32 %v811_v3, %v749_v6  ;;  %v754_v36 = vmul.f32 %v1568_v53, %v1568_v53 }
 0x161   :  { %v681_v12 = vadd.f32 %v680_v11, %v1524_v46  ;;  %v813_v15 = vadd.f32 %v812_v2, %v750_v22  ;;  %v755_v46 = vmul.f32 %v1586_v4, %v1586_v4 }
 0x163   :  { %v682_v10 = vadd.f32 %v681_v12, %v1536_v51  ;;  %v814_v13 = vadd.f32 %v813_v15, %v751_v20  ;;  %v756_v51 = vmul.f32 %v1608_v57, %v1608_v57 }
 0x165   :  { %v815_v16 = vadd.f32 %v814_v13, %v752_v24  ;;  %v683_v26 = vadd.f32 %v682_v10, %v1556_v0  ;;  %v757_v0 = vmul.f32 %v1634_v7, %v1634_v7 }
 0x167   :  { %v684_v29 = vadd.f32 %v683_v26, %v1568_v53  ;;  %v816_v30 = vadd.f32 %v815_v16, %v753_v32 }
 0x169   :  { %v685_v19 = vadd.f32 %v684_v29, %v1586_v4  ;;  %v817_v38 = vadd.f32 %v816_v30, %v754_v36 }
 0x16b   :  { %v686_v39 = vadd.f32 %v685_v19, %v1608_v57  ;;  %v818_v37 = vadd.f32 %v817_v38, %v755_v46 }
 0x16d   :  { %v687_v23 = vadd.f32 %v686_v39, %v1634_v7  ;;  %v819_v21 = vadd.f32 %v818_v37, %v756_v51 }
 0x16f   :  { %v688_v53 = vadd.f32 %v687_v23, %v1650_v43  ;;  %v820_v54 = vadd.f32 %v819_v21, %v757_v0 }
 0x171   :  { %v821_v4 = vadd.f32 %v820_v54, %v758_v34  ;;  %v689_v31 = vadd.f32 %v688_v53, %v1674_v40 }
 0x173   :  { %v822_v57 = vadd.f32 %v821_v4, %v759_v41  ;;  %v690_v35 = vadd.f32 %v689_v31, %v1688_v60 }
 0x175   :  { %v823_v7 = vadd.f32 %v822_v57, %v760_v42  ;;  %v691_v27 = vadd.f32 %v690_v35, %v1707_v28 }
 0x177   :  { %v824_v43 = vadd.f32 %v823_v7, %v761_v49  ;;  %v692_v58 = vadd.f32 %v691_v27, %v499_v45 }
 0x179   :  { %v693_v33 = vrot.slane %v692_v58, 4  ;;  %v825_v55 = vadd.f32 %v824_v43, %v762_v48 }
 0x17b   :  { %v694_v50 = vadd.f32 %v693_v33, %v692_v58  ;;  %v826_v17 = vrot.slane %v825_v55, 4 }
 0x17d   :  { %v695_v40 = vrot.slane %v694_v50, 2  ;;  %v827_v59 = vadd.f32 %v826_v17, %v825_v55 }
 0x17f   :  { %v696_v52 = vadd.f32 %v695_v40, %v694_v50  ;;  %v828_v5 = vrot.slane %v827_v59, 2 }
 0x181   :  { %v697_v61 = vrot.slane %v696_v52, 1  ;;  %v829_v62 = vadd.f32 %v828_v5, %v827_v59 }
 0x183   :  { %v830_v60 = vrot.slane %v829_v62, 1  ;;  %v698_v63 = vadd.f32 %v697_v61, %v696_v52 }
 0x185   :  { %v831_v1 = vadd.f32 %v830_v60, %v829_v62 }
 0x187   :  { %v833_v25 = vsel %vm832_vm0, %v698_v63, %v831_v1 }
 0x188   :  { %834 = vst [vmem:[%s1788_s3] sm:$0x3] %v833_v25 }

// kernel: bottleneck.7
= control target key start
LH: loop header
LB: loop body
LE: loop exit
PB: predicated region body
PF: predicated region fallthrough
CT: control target
= control target key end

     0   :  { %s1460_s0 = inlined_call_operand.vmem [shape: bf16[512,128], index: 0, kind: input, shape index: {}]   ;;  %s1461_s1 = inlined_call_operand.vmem [shape: f32[2,128], index: 1, kind: input, shape index: {}]   ;;  %s1462_s2 = inlined_call_operand.vmem [shape: bf16[512,128], index: 2, kind: input, shape index: {}]   ;;  %s1463_s3 = inlined_call_operand.vmem [shape: f32[512,128], index: 3, kind: output, shape index: {}]  }
   0x1   :  { %v599_v0 = vld [vmem:[%s1460_s0] sm:$0xff]   ;;  %v854_v8 = vld [vmem:[%s1460_s0 + $0x8] sm:$0xff]   ;;  %v855_v10 = vld [vmem:[%s1460_s0 + $0x10] sm:$0xff]  }
   0x2   :  { %v600_v1 = vunpack.c.l.bf16 %v599_v0  ;;  %v944_v2 = vld [vmem:[%s1461_s1] ss:$0 sm:$0xff]  ;;  %v949_v3 = vld [vmem:[%s1461_s1 + $0x1] ss:$0 sm:$0xff]  ;;  %v601_v5 = vunpack.c.h.bf16 %v599_v0  ;;  %v885_v9 = vld [vmem:[%s1462_s2 + $0x8] sm:$0xff]   ;;  %v604_v13 = vunpack.c.l.bf16 %v854_v8  ;;  %v605_v17 = vunpack.c.h.bf16 %v854_v8 }
   0x3   :  { %v727_v4 = vld [vmem:[%s1462_s2] sm:$0xff]   ;;  %v732_v14 = vunpack.c.l.bf16 %v885_v9  ;;  %v886_v15 = vld [vmem:[%s1462_s2 + $0x10] sm:$0xff]   ;;  %v856_v16 = vld [vmem:[%s1460_s0 + $0x18] sm:$0xff]   ;;  %v733_v18 = vunpack.c.h.bf16 %v885_v9  ;;  %v608_v19 = vunpack.c.l.bf16 %v855_v10  ;;  %v609_v24 = vunpack.c.h.bf16 %v855_v10 }
   0x4   :  { %v728_v6 = vunpack.c.l.bf16 %v727_v4  ;;  %v729_v7 = vunpack.c.h.bf16 %v727_v4  ;;  %v145_v11 = vmul.f32 %v944_v2, %v600_v1  ;;  %v146_v12 = vmul.f32 %v944_v2, %v601_v5  ;;  %v887_v25 = vld [vmem:[%s1462_s2 + $0x18] sm:$0xff]   ;;  %v857_v38 = vld [vmem:[%s1460_s0 + $0x20] sm:$0xff]   ;;  %v858_v52 = vld [vmem:[%s1460_s0 + $0x28] sm:$0xff]  }
   0x5   :  { %v736_v20 = vunpack.c.l.bf16 %v886_v15  ;;  %v147_v23 = vmul.f32 %v944_v2, %v604_v13  ;;  %v148_v26 = vmul.f32 %v944_v2, %v605_v17  ;;  %v149_v27 = vmul.f32 %v944_v2, %v608_v19  ;;  %v888_v47 = vld [vmem:[%s1462_s2 + $0x20] sm:$0xff]   ;;  %v889_v57 = vld [vmem:[%s1462_s2 + $0x28] sm:$0xff]   ;;  %v859_v62 = vld [vmem:[%s1460_s0 + $0x30] sm:$0xff]  }
   0x6   :  { %v210_v21 = vadd.f32 %v949_v3, %v145_v11  ;;  %v211_v22 = vadd.f32 %v949_v3, %v146_v12  ;;  %v737_v28 = vunpack.c.h.bf16 %v886_v15  ;;  %v612_v29 = vunpack.c.l.bf16 %v856_v16  ;;  %v890_v5 = vld [vmem:[%s1462_s2 + $0x30] sm:$0xff]  }
   0x7   :  { %v212_v32 = vadd.f32 %v949_v3, %v147_v23  ;;  %v150_v33 = vmul.f32 %v944_v2, %v609_v24  ;;  %v213_v34 = vadd.f32 %v949_v3, %v148_v26  ;;  %v214_v35 = vadd.f32 %v949_v3, %v149_v27  ;;  %v891_v23 = vld [vmem:[%s1462_s2 + $0x38] sm:$0xff]  }
   0x8   :  { %v402_v30 = vadd.f32 %v728_v6, %v210_v21  ;;  %v403_v31 = vadd.f32 %v729_v7, %v211_v22  ;;  %v151_v36 = vmul.f32 %v944_v2, %v612_v29  ;;  %v740_v37 = vunpack.c.l.bf16 %v887_v25 }
   0x9   :  { %v404_v41 = vadd.f32 %v732_v14, %v212_v32  ;;  %v215_v42 = vadd.f32 %v949_v3, %v150_v33  ;;  %v405_v43 = vadd.f32 %v733_v18, %v213_v34  ;;  %v406_v44 = vadd.f32 %v736_v20, %v214_v35  ;;  %v860_v18 = vld [vmem:[%s1460_s0 + $0x38] sm:$0xff]   ;;  %v861_v32 = vld [vmem:[%s1460_s0 + $0x40] sm:$0xff]  }
   0xa   :  { %v466_v39 = vmax.f32 %v402_v30, 0.0  ;;  %v467_v40 = vmax.f32 %v403_v31, 0.0  ;;  %v216_v45 = vadd.f32 %v949_v3, %v151_v36  ;;  %v613_v46 = vunpack.c.h.bf16 %v856_v16 }
   0xb   :  { %v468_v48 = vmax.f32 %v404_v41, 0.0  ;;  %v407_v49 = vadd.f32 %v737_v28, %v215_v42  ;;  %v741_v50 = vunpack.c.h.bf16 %v887_v25  ;;  %v616_v51 = vunpack.c.l.bf16 %v857_v38 }
   0xc   :  { %530 = vst [vmem:[%s1463_s3] sm:$0xff] %v466_v39  ;;  %v469_v53 = vmax.f32 %v405_v43, 0.0  ;;  %v470_v54 = vmax.f32 %v406_v44, 0.0  ;;  %v408_v55 = vadd.f32 %v740_v37, %v216_v45  ;;  %v152_v56 = vmul.f32 %v944_v2, %v613_v46  ;;  %v892_v37 = vld [vmem:[%s1462_s2 + $0x40] sm:$0xff]   ;;  %v862_v46 = vld [vmem:[%s1460_s0 + $0x48] sm:$0xff]  }
   0xd   :  { %531 = vst [vmem:[%s1463_s3 + $0x8] sm:$0xff] %v467_v40  ;;  %v471_v58 = vmax.f32 %v407_v49, 0.0  ;;  %v153_v59 = vmul.f32 %v944_v2, %v616_v51  ;;  %v744_v60 = vunpack.c.l.bf16 %v888_v47  ;;  %v617_v61 = vunpack.c.h.bf16 %v857_v38 }
   0xe   :  { %532 = vst [vmem:[%s1463_s3 + $0x10] sm:$0xff] %v468_v48  ;;  %v472_v63 = vmax.f32 %v408_v55, 0.0  ;;  %v217_v0 = vadd.f32 %v949_v3, %v152_v56  ;;  %v745_v1 = vunpack.c.h.bf16 %v888_v47  ;;  %v620_v4 = vunpack.c.l.bf16 %v858_v52  ;;  %v893_v47 = vld [vmem:[%s1462_s2 + $0x48] sm:$0xff]   ;;  %v863_v56 = vld [vmem:[%s1460_s0 + $0x50] sm:$0xff]  }
   0xf   :  { %533 = vst [vmem:[%s1463_s3 + $0x18] sm:$0xff] %v469_v53  ;;  %v218_v6 = vadd.f32 %v949_v3, %v153_v59  ;;  %v154_v7 = vmul.f32 %v944_v2, %v617_v61  ;;  %v748_v8 = vunpack.c.l.bf16 %v889_v57  ;;  %v621_v9 = vunpack.c.h.bf16 %v858_v52 }
  0x10   :  { %534 = vst [vmem:[%s1463_s3 + $0x20] sm:$0xff] %v470_v54  ;;  %v409_v10 = vadd.f32 %v741_v50, %v217_v0  ;;  %v155_v11 = vmul.f32 %v944_v2, %v620_v4  ;;  %v749_v12 = vunpack.c.h.bf16 %v889_v57  ;;  %v624_v13 = vunpack.c.l.bf16 %v859_v62 }
  0x11   :  { %535 = vst [vmem:[%s1463_s3 + $0x28] sm:$0xff] %v471_v58  ;;  %v410_v14 = vadd.f32 %v744_v60, %v218_v6  ;;  %v219_v15 = vadd.f32 %v949_v3, %v154_v7  ;;  %v156_v16 = vmul.f32 %v944_v2, %v621_v9  ;;  %v752_v17 = vunpack.c.l.bf16 %v890_v5 }
  0x12   :  { %536 = vst [vmem:[%s1463_s3 + $0x30] sm:$0xff] %v472_v63  ;;  %v473_v19 = vmax.f32 %v409_v10, 0.0  ;;  %v220_v20 = vadd.f32 %v949_v3, %v155_v11  ;;  %v157_v21 = vmul.f32 %v944_v2, %v624_v13  ;;  %v625_v22 = vunpack.c.h.bf16 %v859_v62 }
  0x13   :  { %v474_v24 = vmax.f32 %v410_v14, 0.0  ;;  %v411_v25 = vadd.f32 %v745_v1, %v219_v15  ;;  %v221_v26 = vadd.f32 %v949_v3, %v156_v16  ;;  %v753_v27 = vunpack.c.h.bf16 %v890_v5  ;;  %v894_v1 = vld [vmem:[%s1462_s2 + $0x50] sm:$0xff]  }
  0x14   :  { %537 = vst [vmem:[%s1463_s3 + $0x38] sm:$0xff] %v473_v19  ;;  %v412_v28 = vadd.f32 %v748_v8, %v220_v20  ;;  %v222_v29 = vadd.f32 %v949_v3, %v157_v21  ;;  %v158_v30 = vmul.f32 %v944_v2, %v625_v22  ;;  %v628_v31 = vunpack.c.l.bf16 %v860_v18 }
  0x15   :  { %538 = vst [vmem:[%s1463_s3 + $0x40] sm:$0xff] %v474_v24  ;;  %v475_v33 = vmax.f32 %v411_v25, 0.0  ;;  %v413_v34 = vadd.f32 %v749_v12, %v221_v26  ;;  %v756_v35 = vunpack.c.l.bf16 %v891_v23  ;;  %v629_v36 = vunpack.c.h.bf16 %v860_v18  ;;  %v864_v12 = vld [vmem:[%s1460_s0 + $0x58] sm:$0xff]   ;;  %v865_v26 = vld [vmem:[%s1460_s0 + $0x60] sm:$0xff]  }
  0x16   :  { %v476_v38 = vmax.f32 %v412_v28, 0.0  ;;  %v414_v39 = vadd.f32 %v752_v17, %v222_v29  ;;  %v223_v40 = vadd.f32 %v949_v3, %v158_v30  ;;  %v159_v41 = vmul.f32 %v944_v2, %v628_v31  ;;  %v895_v17 = vld [vmem:[%s1462_s2 + $0x58] sm:$0xff]   ;;  %v896_v31 = vld [vmem:[%s1462_s2 + $0x60] sm:$0xff]  }
  0x17   :  { %539 = vst [vmem:[%s1463_s3 + $0x48] sm:$0xff] %v475_v33  ;;  %v477_v42 = vmax.f32 %v413_v34, 0.0  ;;  %v160_v43 = vmul.f32 %v944_v2, %v629_v36  ;;  %v757_v44 = vunpack.c.h.bf16 %v891_v23  ;;  %v632_v45 = vunpack.c.l.bf16 %v861_v32 }
  0x18   :  { %540 = vst [vmem:[%s1463_s3 + $0x50] sm:$0xff] %v476_v38  ;;  %v478_v48 = vmax.f32 %v414_v39, 0.0  ;;  %v415_v49 = vadd.f32 %v753_v27, %v223_v40  ;;  %v224_v50 = vadd.f32 %v949_v3, %v159_v41  ;;  %v760_v51 = vunpack.c.l.bf16 %v892_v37  ;;  %v866_v40 = vld [vmem:[%s1460_s0 + $0x68] sm:$0xff]  }
  0x19   :  { %541 = vst [vmem:[%s1463_s3 + $0x58] sm:$0xff] %v477_v42  ;;  %v225_v52 = vadd.f32 %v949_v3, %v160_v43  ;;  %v161_v53 = vmul.f32 %v944_v2, %v632_v45  ;;  %v633_v54 = vunpack.c.h.bf16 %v861_v32  ;;  %v761_v55 = vunpack.c.h.bf16 %v892_v37  ;;  %v897_v41 = vld [vmem:[%s1462_s2 + $0x68] sm:$0xff]  }
  0x1a   :  { %542 = vst [vmem:[%s1463_s3 + $0x60] sm:$0xff] %v478_v48  ;;  %v479_v57 = vmax.f32 %v415_v49, 0.0  ;;  %v416_v58 = vadd.f32 %v756_v35, %v224_v50  ;;  %v636_v59 = vunpack.c.l.bf16 %v862_v46  ;;  %v764_v60 = vunpack.c.l.bf16 %v893_v47  ;;  %v867_v50 = vld [vmem:[%s1460_s0 + $0x70] sm:$0xff]  }
  0x1b   :  { %v417_v61 = vadd.f32 %v757_v44, %v225_v52  ;;  %v226_v62 = vadd.f32 %v949_v3, %v161_v53  ;;  %v162_v63 = vmul.f32 %v944_v2, %v633_v54  ;;  %v637_v0 = vunpack.c.h.bf16 %v862_v46 }
  0x1c   :  { %543 = vst [vmem:[%s1463_s3 + $0x68] sm:$0xff] %v479_v57  ;;  %v480_v4 = vmax.f32 %v416_v58, 0.0  ;;  %v163_v5 = vmul.f32 %v944_v2, %v636_v59  ;;  %v765_v6 = vunpack.c.h.bf16 %v893_v47  ;;  %v640_v7 = vunpack.c.l.bf16 %v863_v56  ;;  %v898_v59 = vld [vmem:[%s1462_s2 + $0x70] sm:$0xff]  }
  0x1d   :  { %v481_v8 = vmax.f32 %v417_v61, 0.0  ;;  %v418_v9 = vadd.f32 %v760_v51, %v226_v62  ;;  %v227_v10 = vadd.f32 %v949_v3, %v162_v63  ;;  %v164_v11 = vmul.f32 %v944_v2, %v637_v0 }
  0x1e   :  { %544 = vst [vmem:[%s1463_s3 + $0x70] sm:$0xff] %v480_v4  ;;  %v228_v13 = vadd.f32 %v949_v3, %v163_v5  ;;  %v165_v14 = vmul.f32 %v944_v2, %v640_v7  ;;  %v768_v15 = vunpack.c.l.bf16 %v894_v1  ;;  %v641_v16 = vunpack.c.h.bf16 %v863_v56 }
  0x1f   :  { %545 = vst [vmem:[%s1463_s3 + $0x78] sm:$0xff] %v481_v8  ;;  %v482_v18 = vmax.f32 %v418_v9, 0.0  ;;  %v419_v19 = vadd.f32 %v761_v55, %v227_v10  ;;  %v229_v20 = vadd.f32 %v949_v3, %v164_v11  ;;  %v769_v21 = vunpack.c.h.bf16 %v894_v1  ;;  %v899_v11 = vld [vmem:[%s1462_s2 + $0x78] sm:$0xff]  }
  0x20   :  { %v420_v22 = vadd.f32 %v764_v60, %v228_v13  ;;  %v230_v23 = vadd.f32 %v949_v3, %v165_v14  ;;  %v166_v24 = vmul.f32 %v944_v2, %v641_v16  ;;  %v644_v25 = vunpack.c.l.bf16 %v864_v12 }
  0x21   :  { %546 = vst [vmem:[%s1463_s3 + $0x80] sm:$0xff] %v482_v18  ;;  %v483_v27 = vmax.f32 %v419_v19, 0.0  ;;  %v421_v28 = vadd.f32 %v765_v6, %v229_v20  ;;  %v772_v29 = vunpack.c.l.bf16 %v895_v17  ;;  %v645_v30 = vunpack.c.h.bf16 %v864_v12  ;;  %v868_v6 = vld [vmem:[%s1460_s0 + $0x78] sm:$0xff]   ;;  %v869_v20 = vld [vmem:[%s1460_s0 + $0x80] sm:$0xff]  }
  0x22   :  { %v484_v32 = vmax.f32 %v420_v22, 0.0  ;;  %v422_v33 = vadd.f32 %v768_v15, %v230_v23  ;;  %v231_v34 = vadd.f32 %v949_v3, %v166_v24  ;;  %v167_v35 = vmul.f32 %v944_v2, %v644_v25  ;;  %v900_v25 = vld [vmem:[%s1462_s2 + $0x80] sm:$0xff]  }
  0x23   :  { %547 = vst [vmem:[%s1463_s3 + $0x88] sm:$0xff] %v483_v27  ;;  %v485_v36 = vmax.f32 %v421_v28, 0.0  ;;  %v168_v37 = vmul.f32 %v944_v2, %v645_v30  ;;  %v773_v38 = vunpack.c.h.bf16 %v895_v17  ;;  %v648_v39 = vunpack.c.l.bf16 %v865_v26 }
  0x24   :  { %548 = vst [vmem:[%s1463_s3 + $0x90] sm:$0xff] %v484_v32  ;;  %v486_v42 = vmax.f32 %v422_v33, 0.0  ;;  %v423_v43 = vadd.f32 %v769_v21, %v231_v34  ;;  %v232_v44 = vadd.f32 %v949_v3, %v167_v35  ;;  %v776_v45 = vunpack.c.l.bf16 %v896_v31  ;;  %v870_v34 = vld [vmem:[%s1460_s0 + $0x88] sm:$0xff]  }
  0x25   :  { %549 = vst [vmem:[%s1463_s3 + $0x98] sm:$0xff] %v485_v36  ;;  %v233_v46 = vadd.f32 %v949_v3, %v168_v37  ;;  %v169_v47 = vmul.f32 %v944_v2, %v648_v39  ;;  %v649_v48 = vunpack.c.h.bf16 %v865_v26  ;;  %v777_v49 = vunpack.c.h.bf16 %v896_v31  ;;  %v901_v35 = vld [vmem:[%s1462_s2 + $0x88] sm:$0xff]  }
  0x26   :  { %550 = vst [vmem:[%s1463_s3 + $0xa0] sm:$0xff] %v486_v42  ;;  %v487_v51 = vmax.f32 %v423_v43, 0.0  ;;  %v424_v52 = vadd.f32 %v772_v29, %v232_v44  ;;  %v652_v53 = vunpack.c.l.bf16 %v866_v40  ;;  %v780_v54 = vunpack.c.l.bf16 %v897_v41  ;;  %v871_v44 = vld [vmem:[%s1460_s0 + $0x90] sm:$0xff]  }
  0x27   :  { %v425_v55 = vadd.f32 %v773_v38, %v233_v46  ;;  %v234_v56 = vadd.f32 %v949_v3, %v169_v47  ;;  %v170_v57 = vmul.f32 %v944_v2, %v649_v48  ;;  %v653_v58 = vunpack.c.h.bf16 %v866_v40 }
  0x28   :  { %551 = vst [vmem:[%s1463_s3 + $0xa8] sm:$0xff] %v487_v51  ;;  %v488_v60 = vmax.f32 %v424_v52, 0.0  ;;  %v171_v61 = vmul.f32 %v944_v2, %v652_v53  ;;  %v781_v62 = vunpack.c.h.bf16 %v897_v41  ;;  %v656_v63 = vunpack.c.l.bf16 %v867_v50  ;;  %v902_v53 = vld [vmem:[%s1462_s2 + $0x90] sm:$0xff]  }
  0x29   :  { %v489_v0 = vmax.f32 %v425_v55, 0.0  ;;  %v426_v1 = vadd.f32 %v776_v45, %v234_v56  ;;  %v235_v4 = vadd.f32 %v949_v3, %v170_v57  ;;  %v172_v5 = vmul.f32 %v944_v2, %v653_v58 }
  0x2a   :  { %552 = vst [vmem:[%s1463_s3 + $0xb0] sm:$0xff] %v488_v60  ;;  %v236_v7 = vadd.f32 %v949_v3, %v171_v61  ;;  %v173_v8 = vmul.f32 %v944_v2, %v656_v63  ;;  %v784_v9 = vunpack.c.l.bf16 %v898_v59  ;;  %v657_v10 = vunpack.c.h.bf16 %v867_v50 }
  0x2b   :  { %553 = vst [vmem:[%s1463_s3 + $0xb8] sm:$0xff] %v489_v0  ;;  %v490_v12 = vmax.f32 %v426_v1, 0.0  ;;  %v427_v13 = vadd.f32 %v777_v49, %v235_v4  ;;  %v237_v14 = vadd.f32 %v949_v3, %v172_v5  ;;  %v785_v15 = vunpack.c.h.bf16 %v898_v59  ;;  %v903_v5 = vld [vmem:[%s1462_s2 + $0x98] sm:$0xff]  }
  0x2c   :  { %v428_v16 = vadd.f32 %v780_v54, %v236_v7  ;;  %v238_v17 = vadd.f32 %v949_v3, %v173_v8  ;;  %v174_v18 = vmul.f32 %v944_v2, %v657_v10  ;;  %v660_v19 = vunpack.c.l.bf16 %v868_v6 }
  0x2d   :  { %554 = vst [vmem:[%s1463_s3 + $0xc0] sm:$0xff] %v490_v12  ;;  %v491_v21 = vmax.f32 %v427_v13, 0.0  ;;  %v429_v22 = vadd.f32 %v781_v62, %v237_v14  ;;  %v788_v23 = vunpack.c.l.bf16 %v899_v11  ;;  %v661_v24 = vunpack.c.h.bf16 %v868_v6  ;;  %v872_v62 = vld [vmem:[%s1460_s0 + $0x98] sm:$0xff]   ;;  %v873_v14 = vld [vmem:[%s1460_s0 + $0xa0] sm:$0xff]  }
  0x2e   :  { %v492_v26 = vmax.f32 %v428_v16, 0.0  ;;  %v430_v27 = vadd.f32 %v784_v9, %v238_v17  ;;  %v239_v28 = vadd.f32 %v949_v3, %v174_v18  ;;  %v175_v29 = vmul.f32 %v944_v2, %v660_v19  ;;  %v904_v19 = vld [vmem:[%s1462_s2 + $0xa0] sm:$0xff]  }
  0x2f   :  { %555 = vst [vmem:[%s1463_s3 + $0xc8] sm:$0xff] %v491_v21  ;;  %v493_v30 = vmax.f32 %v429_v22, 0.0  ;;  %v176_v31 = vmul.f32 %v944_v2, %v661_v24  ;;  %v789_v32 = vunpack.c.h.bf16 %v899_v11  ;;  %v664_v33 = vunpack.c.l.bf16 %v869_v20 }
  0x30   :  { %556 = vst [vmem:[%s1463_s3 + $0xd0] sm:$0xff] %v492_v26  ;;  %v494_v36 = vmax.f32 %v430_v27, 0.0  ;;  %v431_v37 = vadd.f32 %v785_v15, %v239_v28  ;;  %v240_v38 = vadd.f32 %v949_v3, %v175_v29  ;;  %v792_v39 = vunpack.c.l.bf16 %v900_v25  ;;  %v874_v28 = vld [vmem:[%s1460_s0 + $0xa8] sm:$0xff]  }
  0x31   :  { %557 = vst [vmem:[%s1463_s3 + $0xd8] sm:$0xff] %v493_v30  ;;  %v241_v40 = vadd.f32 %v949_v3, %v176_v31  ;;  %v177_v41 = vmul.f32 %v944_v2, %v664_v33  ;;  %v665_v42 = vunpack.c.h.bf16 %v869_v20  ;;  %v793_v43 = vunpack.c.h.bf16 %v900_v25  ;;  %v905_v29 = vld [vmem:[%s1462_s2 + $0xa8] sm:$0xff]  }
  0x32   :  { %558 = vst [vmem:[%s1463_s3 + $0xe0] sm:$0xff] %v494_v36  ;;  %v495_v45 = vmax.f32 %v431_v37, 0.0  ;;  %v432_v46 = vadd.f32 %v788_v23, %v240_v38  ;;  %v668_v47 = vunpack.c.l.bf16 %v870_v34  ;;  %v796_v48 = vunpack.c.l.bf16 %v901_v35  ;;  %v875_v38 = vld [vmem:[%s1460_s0 + $0xb0] sm:$0xff]  }
  0x33   :  { %v433_v49 = vadd.f32 %v789_v32, %v241_v40  ;;  %v242_v50 = vadd.f32 %v949_v3, %v177_v41  ;;  %v178_v51 = vmul.f32 %v944_v2, %v665_v42  ;;  %v669_v52 = vunpack.c.h.bf16 %v870_v34 }
  0x34   :  { %559 = vst [vmem:[%s1463_s3 + $0xe8] sm:$0xff] %v495_v45  ;;  %v496_v54 = vmax.f32 %v432_v46, 0.0  ;;  %v179_v55 = vmul.f32 %v944_v2, %v668_v47  ;;  %v797_v56 = vunpack.c.h.bf16 %v901_v35  ;;  %v672_v57 = vunpack.c.l.bf16 %v871_v44  ;;  %v906_v47 = vld [vmem:[%s1462_s2 + $0xb0] sm:$0xff]  }
  0x35   :  { %v497_v58 = vmax.f32 %v433_v49, 0.0  ;;  %v434_v59 = vadd.f32 %v792_v39, %v242_v50  ;;  %v243_v60 = vadd.f32 %v949_v3, %v178_v51  ;;  %v180_v61 = vmul.f32 %v944_v2, %v669_v52 }
  0x36   :  { %560 = vst [vmem:[%s1463_s3 + $0xf0] sm:$0xff] %v496_v54  ;;  %v244_v63 = vadd.f32 %v949_v3, %v179_v55  ;;  %v181_v0 = vmul.f32 %v944_v2, %v672_v57  ;;  %v800_v1 = vunpack.c.l.bf16 %v902_v53  ;;  %v673_v4 = vunpack.c.h.bf16 %v871_v44 }
  0x37   :  { %561 = vst [vmem:[%s1463_s3 + $0xf8] sm:$0xff] %v497_v58  ;;  %v498_v6 = vmax.f32 %v434_v59, 0.0  ;;  %v435_v7 = vadd.f32 %v793_v43, %v243_v60  ;;  %v245_v8 = vadd.f32 %v949_v3, %v180_v61  ;;  %v801_v9 = vunpack.c.h.bf16 %v902_v53  ;;  %v907_v61 = vld [vmem:[%s1462_s2 + $0xb8] sm:$0xff]  }
  0x38   :  { %v436_v10 = vadd.f32 %v796_v48, %v244_v63  ;;  %v246_v11 = vadd.f32 %v949_v3, %v181_v0  ;;  %v182_v12 = vmul.f32 %v944_v2, %v673_v4  ;;  %v676_v13 = vunpack.c.l.bf16 %v872_v62 }
  0x39   :  { %562 = vst [vmem:[%s1463_s3 + $0x100] sm:$0xff] %v498_v6  ;;  %v499_v15 = vmax.f32 %v435_v7, 0.0  ;;  %v437_v16 = vadd.f32 %v797_v56, %v245_v8  ;;  %v804_v17 = vunpack.c.l.bf16 %v903_v5  ;;  %v677_v18 = vunpack.c.h.bf16 %v872_v62  ;;  %v876_v56 = vld [vmem:[%s1460_s0 + $0xb8] sm:$0xff]   ;;  %v877_v8 = vld [vmem:[%s1460_s0 + $0xc0] sm:$0xff]  }
  0x3a   :  { %v500_v20 = vmax.f32 %v436_v10, 0.0  ;;  %v438_v21 = vadd.f32 %v800_v1, %v246_v11  ;;  %v247_v22 = vadd.f32 %v949_v3, %v182_v12  ;;  %v183_v23 = vmul.f32 %v944_v2, %v676_v13  ;;  %v908_v13 = vld [vmem:[%s1462_s2 + $0xc0] sm:$0xff]  }
  0x3b   :  { %563 = vst [vmem:[%s1463_s3 + $0x108] sm:$0xff] %v499_v15  ;;  %v501_v24 = vmax.f32 %v437_v16, 0.0  ;;  %v184_v25 = vmul.f32 %v944_v2, %v677_v18  ;;  %v805_v26 = vunpack.c.h.bf16 %v903_v5  ;;  %v680_v27 = vunpack.c.l.bf16 %v873_v14 }
  0x3c   :  { %564 = vst [vmem:[%s1463_s3 + $0x110] sm:$0xff] %v500_v20  ;;  %v502_v30 = vmax.f32 %v438_v21, 0.0  ;;  %v439_v31 = vadd.f32 %v801_v9, %v247_v22  ;;  %v248_v32 = vadd.f32 %v949_v3, %v183_v23  ;;  %v808_v33 = vunpack.c.l.bf16 %v904_v19  ;;  %v878_v22 = vld [vmem:[%s1460_s0 + $0xc8] sm:$0xff]  }
  0x3d   :  { %565 = vst [vmem:[%s1463_s3 + $0x118] sm:$0xff] %v501_v24  ;;  %v249_v34 = vadd.f32 %v949_v3, %v184_v25  ;;  %v185_v35 = vmul.f32 %v944_v2, %v680_v27  ;;  %v681_v36 = vunpack.c.h.bf16 %v873_v14  ;;  %v809_v37 = vunpack.c.h.bf16 %v904_v19  ;;  %v909_v23 = vld [vmem:[%s1462_s2 + $0xc8] sm:$0xff]  }
  0x3e   :  { %566 = vst [vmem:[%s1463_s3 + $0x120] sm:$0xff] %v502_v30  ;;  %v503_v39 = vmax.f32 %v439_v31, 0.0  ;;  %v440_v40 = vadd.f32 %v804_v17, %v248_v32  ;;  %v684_v41 = vunpack.c.l.bf16 %v874_v28  ;;  %v812_v42 = vunpack.c.l.bf16 %v905_v29  ;;  %v879_v32 = vld [vmem:[%s1460_s0 + $0xd0] sm:$0xff]  }
  0x3f   :  { %v441_v43 = vadd.f32 %v805_v26, %v249_v34  ;;  %v250_v44 = vadd.f32 %v949_v3, %v185_v35  ;;  %v186_v45 = vmul.f32 %v944_v2, %v681_v36  ;;  %v685_v46 = vunpack.c.h.bf16 %v874_v28 }
  0x40   :  { %567 = vst [vmem:[%s1463_s3 + $0x128] sm:$0xff] %v503_v39  ;;  %v504_v48 = vmax.f32 %v440_v40, 0.0  ;;  %v187_v49 = vmul.f32 %v944_v2, %v684_v41  ;;  %v813_v50 = vunpack.c.h.bf16 %v905_v29  ;;  %v688_v51 = vunpack.c.l.bf16 %v875_v38  ;;  %v910_v41 = vld [vmem:[%s1462_s2 + $0xd0] sm:$0xff]  }
  0x41   :  { %v505_v52 = vmax.f32 %v441_v43, 0.0  ;;  %v442_v53 = vadd.f32 %v808_v33, %v250_v44  ;;  %v251_v54 = vadd.f32 %v949_v3, %v186_v45  ;;  %v188_v55 = vmul.f32 %v944_v2, %v685_v46 }
  0x42   :  { %568 = vst [vmem:[%s1463_s3 + $0x130] sm:$0xff] %v504_v48  ;;  %v252_v57 = vadd.f32 %v949_v3, %v187_v49  ;;  %v189_v58 = vmul.f32 %v944_v2, %v688_v51  ;;  %v816_v59 = vunpack.c.l.bf16 %v906_v47  ;;  %v689_v60 = vunpack.c.h.bf16 %v875_v38 }
  0x43   :  { %569 = vst [vmem:[%s1463_s3 + $0x138] sm:$0xff] %v505_v52  ;;  %v506_v62 = vmax.f32 %v442_v53, 0.0  ;;  %v443_v63 = vadd.f32 %v809_v37, %v251_v54  ;;  %v253_v0 = vadd.f32 %v949_v3, %v188_v55  ;;  %v817_v1 = vunpack.c.h.bf16 %v906_v47  ;;  %v911_v55 = vld [vmem:[%s1462_s2 + $0xd8] sm:$0xff]  }
  0x44   :  { %v444_v4 = vadd.f32 %v812_v42, %v252_v57  ;;  %v254_v5 = vadd.f32 %v949_v3, %v189_v58  ;;  %v190_v6 = vmul.f32 %v944_v2, %v689_v60  ;;  %v692_v7 = vunpack.c.l.bf16 %v876_v56 }
  0x45   :  { %570 = vst [vmem:[%s1463_s3 + $0x140] sm:$0xff] %v506_v62  ;;  %v507_v9 = vmax.f32 %v443_v63, 0.0  ;;  %v445_v10 = vadd.f32 %v813_v50, %v253_v0  ;;  %v820_v11 = vunpack.c.l.bf16 %v907_v61  ;;  %v693_v12 = vunpack.c.h.bf16 %v876_v56  ;;  %v880_v50 = vld [vmem:[%s1460_s0 + $0xd8] sm:$0xff]   ;;  %v881_v0 = vld [vmem:[%s1460_s0 + $0xe0] sm:$0xff]  }
  0x46   :  { %v508_v14 = vmax.f32 %v444_v4, 0.0  ;;  %v446_v15 = vadd.f32 %v816_v59, %v254_v5  ;;  %v255_v16 = vadd.f32 %v949_v3, %v190_v6  ;;  %v191_v17 = vmul.f32 %v944_v2, %v692_v7  ;;  %v912_v7 = vld [vmem:[%s1462_s2 + $0xe0] sm:$0xff]  }
  0x47   :  { %571 = vst [vmem:[%s1463_s3 + $0x148] sm:$0xff] %v507_v9  ;;  %v509_v18 = vmax.f32 %v445_v10, 0.0  ;;  %v192_v19 = vmul.f32 %v944_v2, %v693_v12  ;;  %v821_v20 = vunpack.c.h.bf16 %v907_v61  ;;  %v696_v21 = vunpack.c.l.bf16 %v877_v8 }
  0x48   :  { %572 = vst [vmem:[%s1463_s3 + $0x150] sm:$0xff] %v508_v14  ;;  %v510_v24 = vmax.f32 %v446_v15, 0.0  ;;  %v447_v25 = vadd.f32 %v817_v1, %v255_v16  ;;  %v256_v26 = vadd.f32 %v949_v3, %v191_v17  ;;  %v824_v27 = vunpack.c.l.bf16 %v908_v13  ;;  %v882_v16 = vld [vmem:[%s1460_s0 + $0xe8] sm:$0xff]  }
  0x49   :  { %573 = vst [vmem:[%s1463_s3 + $0x158] sm:$0xff] %v509_v18  ;;  %v257_v28 = vadd.f32 %v949_v3, %v192_v19  ;;  %v193_v29 = vmul.f32 %v944_v2, %v696_v21  ;;  %v697_v30 = vunpack.c.h.bf16 %v877_v8  ;;  %v825_v31 = vunpack.c.h.bf16 %v908_v13  ;;  %v913_v17 = vld [vmem:[%s1462_s2 + $0xe8] sm:$0xff]  }
  0x4a   :  { %574 = vst [vmem:[%s1463_s3 + $0x160] sm:$0xff] %v510_v24  ;;  %v511_v33 = vmax.f32 %v447_v25, 0.0  ;;  %v448_v34 = vadd.f32 %v820_v11, %v256_v26  ;;  %v700_v35 = vunpack.c.l.bf16 %v878_v22  ;;  %v828_v36 = vunpack.c.l.bf16 %v909_v23  ;;  %v883_v26 = vld [vmem:[%s1460_s0 + $0xf0] sm:$0xff]  }
  0x4b   :  { %v449_v37 = vadd.f32 %v821_v20, %v257_v28  ;;  %v258_v38 = vadd.f32 %v949_v3, %v193_v29  ;;  %v194_v39 = vmul.f32 %v944_v2, %v697_v30  ;;  %v701_v40 = vunpack.c.h.bf16 %v878_v22 }
  0x4c   :  { %575 = vst [vmem:[%s1463_s3 + $0x168] sm:$0xff] %v511_v33  ;;  %v512_v42 = vmax.f32 %v448_v34, 0.0  ;;  %v195_v43 = vmul.f32 %v944_v2, %v700_v35  ;;  %v829_v44 = vunpack.c.h.bf16 %v909_v23  ;;  %v704_v45 = vunpack.c.l.bf16 %v879_v32  ;;  %v914_v35 = vld [vmem:[%s1462_s2 + $0xf0] sm:$0xff]  }
  0x4d   :  { %v513_v46 = vmax.f32 %v449_v37, 0.0  ;;  %v450_v47 = vadd.f32 %v824_v27, %v258_v38  ;;  %v259_v48 = vadd.f32 %v949_v3, %v194_v39  ;;  %v196_v49 = vmul.f32 %v944_v2, %v701_v40 }
  0x4e   :  { %576 = vst [vmem:[%s1463_s3 + $0x170] sm:$0xff] %v512_v42  ;;  %v260_v51 = vadd.f32 %v949_v3, %v195_v43  ;;  %v197_v52 = vmul.f32 %v944_v2, %v704_v45  ;;  %v832_v53 = vunpack.c.l.bf16 %v910_v41  ;;  %v705_v54 = vunpack.c.h.bf16 %v879_v32 }
  0x4f   :  { %577 = vst [vmem:[%s1463_s3 + $0x178] sm:$0xff] %v513_v46  ;;  %v514_v56 = vmax.f32 %v450_v47, 0.0  ;;  %v451_v57 = vadd.f32 %v825_v31, %v259_v48  ;;  %v261_v58 = vadd.f32 %v949_v3, %v196_v49  ;;  %v833_v59 = vunpack.c.h.bf16 %v910_v41  ;;  %v915_v49 = vld [vmem:[%s1462_s2 + $0xf8] sm:$0xff]  }
  0x50   :  { %v452_v60 = vadd.f32 %v828_v36, %v260_v51  ;;  %v262_v61 = vadd.f32 %v949_v3, %v197_v52  ;;  %v198_v62 = vmul.f32 %v944_v2, %v705_v54  ;;  %v708_v63 = vunpack.c.l.bf16 %v880_v50 }
  0x51   :  { %578 = vst [vmem:[%s1463_s3 + $0x180] sm:$0xff] %v514_v56  ;;  %v515_v1 = vmax.f32 %v451_v57, 0.0  ;;  %v453_v4 = vadd.f32 %v829_v44, %v261_v58  ;;  %v836_v5 = vunpack.c.l.bf16 %v911_v55  ;;  %v709_v6 = vunpack.c.h.bf16 %v880_v50  ;;  %v884_v44 = vld [vmem:[%s1460_s0 + $0xf8] sm:$0xff]  }
  0x52   :  { %v516_v8 = vmax.f32 %v452_v60, 0.0  ;;  %v454_v9 = vadd.f32 %v832_v53, %v262_v61  ;;  %v263_v10 = vadd.f32 %v949_v3, %v198_v62  ;;  %v199_v11 = vmul.f32 %v944_v2, %v708_v63 }
  0x53   :  { %579 = vst [vmem:[%s1463_s3 + $0x188] sm:$0xff] %v515_v1  ;;  %v517_v12 = vmax.f32 %v453_v4, 0.0  ;;  %v200_v13 = vmul.f32 %v944_v2, %v709_v6  ;;  %v837_v14 = vunpack.c.h.bf16 %v911_v55  ;;  %v712_v15 = vunpack.c.l.bf16 %v881_v0 }
  0x54   :  { %580 = vst [vmem:[%s1463_s3 + $0x190] sm:$0xff] %v516_v8  ;;  %v518_v18 = vmax.f32 %v454_v9, 0.0  ;;  %v455_v19 = vadd.f32 %v833_v59, %v263_v10  ;;  %v264_v20 = vadd.f32 %v949_v3, %v199_v11  ;;  %v840_v21 = vunpack.c.l.bf16 %v912_v7 }
  0x55   :  { %581 = vst [vmem:[%s1463_s3 + $0x198] sm:$0xff] %v517_v12  ;;  %v265_v22 = vadd.f32 %v949_v3, %v200_v13  ;;  %v201_v23 = vmul.f32 %v944_v2, %v712_v15  ;;  %v713_v24 = vunpack.c.h.bf16 %v881_v0  ;;  %v841_v25 = vunpack.c.h.bf16 %v912_v7 }
  0x56   :  { %582 = vst [vmem:[%s1463_s3 + $0x1a0] sm:$0xff] %v518_v18  ;;  %v519_v27 = vmax.f32 %v455_v19, 0.0  ;;  %v456_v28 = vadd.f32 %v836_v5, %v264_v20  ;;  %v716_v29 = vunpack.c.l.bf16 %v882_v16  ;;  %v844_v30 = vunpack.c.l.bf16 %v913_v17 }
  0x57   :  { %v457_v31 = vadd.f32 %v837_v14, %v265_v22  ;;  %v266_v32 = vadd.f32 %v949_v3, %v201_v23  ;;  %v202_v33 = vmul.f32 %v944_v2, %v713_v24  ;;  %v717_v34 = vunpack.c.h.bf16 %v882_v16 }
  0x58   :  { %583 = vst [vmem:[%s1463_s3 + $0x1a8] sm:$0xff] %v519_v27  ;;  %v520_v36 = vmax.f32 %v456_v28, 0.0  ;;  %v203_v37 = vmul.f32 %v944_v2, %v716_v29  ;;  %v845_v38 = vunpack.c.h.bf16 %v913_v17  ;;  %v720_v39 = vunpack.c.l.bf16 %v883_v26 }
  0x59   :  { %v521_v40 = vmax.f32 %v457_v31, 0.0  ;;  %v458_v41 = vadd.f32 %v840_v21, %v266_v32  ;;  %v267_v42 = vadd.f32 %v949_v3, %v202_v33  ;;  %v204_v43 = vmul.f32 %v944_v2, %v717_v34 }
  0x5a   :  { %584 = vst [vmem:[%s1463_s3 + $0x1b0] sm:$0xff] %v520_v36  ;;  %v268_v45 = vadd.f32 %v949_v3, %v203_v37  ;;  %v205_v46 = vmul.f32 %v944_v2, %v720_v39  ;;  %v848_v47 = vunpack.c.l.bf16 %v914_v35  ;;  %v721_v48 = vunpack.c.h.bf16 %v883_v26 }
  0x5b   :  { %585 = vst [vmem:[%s1463_s3 + $0x1b8] sm:$0xff] %v521_v40  ;;  %v522_v50 = vmax.f32 %v458_v41, 0.0  ;;  %v459_v51 = vadd.f32 %v841_v25, %v267_v42  ;;  %v269_v52 = vadd.f32 %v949_v3, %v204_v43  ;;  %v849_v53 = vunpack.c.h.bf16 %v914_v35 }
  0x5c   :  { %v460_v54 = vadd.f32 %v844_v30, %v268_v45  ;;  %v270_v55 = vadd.f32 %v949_v3, %v205_v46  ;;  %v206_v56 = vmul.f32 %v944_v2, %v721_v48  ;;  %v724_v57 = vunpack.c.l.bf16 %v884_v44 }
  0x5d   :  { %586 = vst [vmem:[%s1463_s3 + $0x1c0] sm:$0xff] %v522_v50  ;;  %v523_v58 = vmax.f32 %v459_v51, 0.0  ;;  %v461_v59 = vadd.f32 %v845_v38, %v269_v52  ;;  %v852_v60 = vunpack.c.l.bf16 %v915_v49  ;;  %v725_v61 = vunpack.c.h.bf16 %v884_v44 }
  0x5e   :  { %v524_v62 = vmax.f32 %v460_v54, 0.0  ;;  %v462_v63 = vadd.f32 %v848_v47, %v270_v55  ;;  %v271_v0 = vadd.f32 %v949_v3, %v206_v56  ;;  %v207_v1 = vmul.f32 %v944_v2, %v724_v57 }
  0x5f   :  { %587 = vst [vmem:[%s1463_s3 + $0x1c8] sm:$0xff] %v523_v58  ;;  %v525_v4 = vmax.f32 %v461_v59, 0.0  ;;  %v208_v5 = vmul.f32 %v944_v2, %v725_v61  ;;  %v853_v6 = vunpack.c.h.bf16 %v915_v49 }
  0x60   :  { %588 = vst [vmem:[%s1463_s3 + $0x1d0] sm:$0xff] %v524_v62  ;;  %v526_v7 = vmax.f32 %v462_v63, 0.0  ;;  %v463_v8 = vadd.f32 %v849_v53, %v271_v0  ;;  %v272_v9 = vadd.f32 %v949_v3, %v207_v1 }
  0x61   :  { %589 = vst [vmem:[%s1463_s3 + $0x1d8] sm:$0xff] %v525_v4  ;;  %v273_v10 = vadd.f32 %v949_v3, %v208_v5 }
  0x62   :  { %590 = vst [vmem:[%s1463_s3 + $0x1e0] sm:$0xff] %v526_v7  ;;  %v527_v2 = vmax.f32 %v463_v8, 0.0  ;;  %v464_v11 = vadd.f32 %v852_v60, %v272_v9 }
  0x63   :  { %v465_v12 = vadd.f32 %v853_v6, %v273_v10 }
  0x64   :  { %591 = vst [vmem:[%s1463_s3 + $0x1e8] sm:$0xff] %v527_v2  ;;  %v528_v13 = vmax.f32 %v464_v11, 0.0 }
  0x65   :  { %v529_v14 = vmax.f32 %v465_v12, 0.0 }
  0x66   :  { %592 = vst [vmem:[%s1463_s3 + $0x1f0] sm:$0xff] %v528_v13 }
  0x67   :  { %593 = vst [vmem:[%s1463_s3 + $0x1f8] sm:$0xff] %v529_v14 }

// kernel: bottleneck.5
= control target key start
LH: loop header
LB: loop body
LE: loop exit
PB: predicated region body
PF: predicated region fallthrough
CT: control target
= control target key end

     0   :  { %s3241_s15 = smov 0   ;;  %s4247_s0 = inlined_call_operand.vmem [shape: bf16[512,128], index: 0, kind: input, shape index: {}]   ;;  %s4248_s1 = inlined_call_operand.vmem [shape: f32[2,128], index: 1, kind: input, shape index: {}]   ;;  %s4249_s2 = inlined_call_operand.vmem [shape: bf16[1152,128], index: 2, kind: input, shape index: {}]   ;;  %s4250_s3 = inlined_call_operand.vmem [shape: bf16[512,128], index: 3, kind: output, shape index: {0}]   ;;  %s4251_s4 = inlined_call_operand.vmem [shape: f32[2,2,128], index: 4, kind: output, shape index: {1}]  }
   0x1 LB: > { %s3247_s16 = sadd.s32 4294967295, %s3213_s15   ;;  %p2628_p0 = scmp.ge.s32.totalorder %s3213_s15, 1  ;;  %s3213_s15 = sphi %s3241_s15, %s15_s15  }
   0x2   : > { %p166_p1 = scmp.lt.s32.totalorder %s3213_s15, 3 }
   0x4   : > { %p167_p2 = pnand %p2628_p0, %p166_p1 }
   0x6   : > { %170 = sbr.rel (%p167_p2) target bundleno = 767 (0x2ff), region = 32 }
   0xb   : > { %v2931_v0 = vld [vmem:[%s4249_s2 + $0x38] sm:$0xff]  ;;  %s2629_s19 = sshll.u32 %s3247_s16, 5  ;;  %v2930_v1 = vld [vmem:[%s4249_s2 + $0x30] sm:$0xff]  ;;  %v2929_v2 = vld [vmem:[%s4249_s2 + $0x28] sm:$0xff]  ;;  %vm633_vm0 = vcmask 1040384   ;;  %vm904_vm4 = vcmask 1046528  }
   0xc   : > { %p197_p3 = scmp.lt.s32.totalorder %s2629_s19, 63  ;;  %3170 = vmatpush.bf16.msra.mxu1 %v2931_v0  ;;  %3171 = vmatpush.bf16.msra.mxu2 %v2931_v0  ;;  %v3274_v3 = vld [vmem:[%s4248_s1] ss:$0 sm:$0xff]  ;;  %v3282_v9 = vld [vmem:[%s4248_s1 + $0x1] ss:$0 sm:$0xff]  ;;  %v2927_v35 = vld [vmem:[%s4249_s2 + $0x18] sm:$0xff] }
   0xd   : > { %3172 = vmatpush.bf16.msra.mxu3 %v2931_v0  ;;  %1563 = vmatpush.bf16.msra.mxu0 %v2931_v0  ;;  %v2928_v18 = vld [vmem:[%s4249_s2 + $0x20] sm:$0xff]  ;;  %vm634_vm1 = vsmask.f32 256  ;;  %v2926_v52 = vld [vmem:[%s4249_s2 + $0x10] sm:$0xff]  ;;  %vm668_vm3 = vsmask.f32 7424 }
   0xe   : > { %s4344_s19 = smov (!%p197_p3, %s2629_s19), 63  ;;  %vm3328_vm2 = vmand %vm633_vm0, %vm634_vm1  ;;  %p208_p4 = scmp.lt.s32.totalorder %s3247_s16, 1 }
   0xf   : > { %s2630_s22 = sshll.u32 %s4344_s19, 2 }
  0x10   : > { %3173 = vmatpush.bf16.msra.mxu1 %v2930_v1  ;;  %3174 = vmatpush.bf16.msra.mxu2 %v2930_v1  ;;  %s3269_s27 = scalar_lea.vmem %s4247_s0, %s2630_s22  ;;  %s4163_s28 = scalar_lea.vmem %s4250_s3, %s2630_s22 }
  0x11   : > { %3175 = vmatpush.bf16.msra.mxu3 %v2930_v1  ;;  %1564 = vmatpush.bf16.msra.mxu0 %v2930_v1  ;;  %v3142_v4 = vld [vmem:[%s3269_s27 + $0x18] sm:$0xff]   ;;  %v3143_v12 = vld [vmem:[%s3269_s27 + $0x20] sm:$0xff]   ;;  %s4346_s16 = smov (!%p208_p4, %s3247_s16), 1 }
  0x12   : > { %v3146_v5 = vld [vmem:[%s3269_s27 + $0x38] sm:$0xff]   ;;  %v3010_v7 = vunpack.c.l.bf16 %v3142_v4  ;;  %v3011_v8 = vunpack.c.h.bf16 %v3142_v4  ;;  %v3286_v13 = vld [vmem:[%s3269_s27 + $0x40] sm:$0xff]   ;;  %v3014_v16 = vunpack.c.l.bf16 %v3143_v12  ;;  %v3015_v17 = vunpack.c.h.bf16 %v3143_v12  ;;  %s2633_s19 = sshll.u32 %s4346_s16, 1 }
  0x13   : > { %v3150_v6 = vld [vmem:[%s3269_s27 + $0x58] sm:$0xff]   ;;  %v3026_v10 = vunpack.c.l.bf16 %v3146_v5  ;;  %v3027_v11 = vunpack.c.h.bf16 %v3146_v5  ;;  %v3030_v22 = vunpack.c.l.bf16 %v3286_v13  ;;  %v3031_v26 = vunpack.c.h.bf16 %v3286_v13  ;;  %v3151_v57 = vld [vmem:[%s3269_s27 + $0x60] sm:$0xff]   ;;  %s211_s30 = scalar_lea.vmem %s4251_s4, %s2633_s19 }
  0x14   : > { %v3042_v14 = vunpack.c.l.bf16 %v3150_v6  ;;  %v3043_v15 = vunpack.c.h.bf16 %v3150_v6  ;;  %3176 = vmatpush.bf16.msra.mxu1 %v2929_v2  ;;  %3177 = vmatpush.bf16.msra.mxu2 %v2929_v2  ;;  %v286_v19 = vmul.f32 %v3274_v3, %v3010_v7  ;;  %v287_v20 = vmul.f32 %v3274_v3, %v3011_v8  ;;  %v2925_v7 = vld [vmem:[%s4249_s2 + $0x8] sm:$0xff] }
  0x15   : > { %v294_v21 = vmul.f32 %v3274_v3, %v3026_v10  ;;  %3178 = vmatpush.bf16.msra.mxu3 %v2929_v2  ;;  %1565 = vmatpush.bf16.msra.mxu0 %v2929_v2  ;;  %v295_v23 = vmul.f32 %v3274_v3, %v3027_v11  ;;  %v288_v30 = vmul.f32 %v3274_v3, %v3014_v16  ;;  %v3046_v6 = vunpack.c.l.bf16 %v3151_v57 }
  0x16   : > { %v302_v24 = vmul.f32 %v3274_v3, %v3042_v14  ;;  %v303_v25 = vmul.f32 %v3274_v3, %v3043_v15  ;;  %v319_v27 = vadd.f32 %v3282_v9, %v286_v19  ;;  %v320_v28 = vadd.f32 %v3282_v9, %v287_v20 }
  0x17   : > { %v327_v29 = vadd.f32 %v3282_v9, %v294_v21  ;;  %v328_v31 = vadd.f32 %v3282_v9, %v295_v23  ;;  %v289_v34 = vmul.f32 %v3274_v3, %v3015_v17  ;;  %v321_v39 = vadd.f32 %v3282_v9, %v288_v30  ;;  %v2997_v21 = vld [vmem:[%s3269_s27] sm:$0xff]  }
  0x18   : > { %v335_v32 = vadd.f32 %v3282_v9, %v302_v24  ;;  %v336_v33 = vadd.f32 %v3282_v9, %v303_v25  ;;  %3179 = vmatpush.bf16.msra.mxu1 %v2928_v18  ;;  %3180 = vmatpush.bf16.msra.mxu2 %v2928_v18  ;;  %v351_v36 = vmax.f32 %v319_v27, 0.0  ;;  %v352_v37 = vmax.f32 %v320_v28, 0.0  ;;  %v2924_v27 = vld [vmem:[%s4249_s2] sm:$0xff] }
  0x19   : > { %v359_v38 = vmax.f32 %v327_v29, 0.0  ;;  %3181 = vmatpush.bf16.msra.mxu3 %v2928_v18  ;;  %1566 = vmatpush.bf16.msra.mxu0 %v2928_v18  ;;  %v360_v40 = vmax.f32 %v328_v31, 0.0  ;;  %v322_v43 = vadd.f32 %v3282_v9, %v289_v34  ;;  %v353_v47 = vmax.f32 %v321_v39, 0.0 }
  0x1a   : > { %v367_v41 = vmax.f32 %v335_v32, 0.0  ;;  %v368_v42 = vmax.f32 %v336_v33, 0.0  ;;  %v383_v44 = vpack.c.bf16 %v351_v36, %v351_v36  ;;  %v384_v45 = vpack.c.bf16 %v352_v37, %v352_v37  ;;  %v2947_v37 = vld [vmem:[%s4249_s2 + $0xb8] sm:$0xff] }
  0x1b   : > { %v391_v46 = vpack.c.bf16 %v359_v38, %v359_v38  ;;  %v392_v48 = vpack.c.bf16 %v360_v40, %v360_v40  ;;  %v354_v51 = vmax.f32 %v322_v43, 0.0  ;;  %v385_v56 = vpack.c.bf16 %v353_v47, %v353_v47  ;;  %v2955_v38 = vld [vmem:[%s4249_s2 + $0xf8] sm:$0xff] }
  0x1c   : > { %v399_v49 = vpack.c.bf16 %v367_v41, %v367_v41  ;;  %v400_v50 = vpack.c.bf16 %v368_v42, %v368_v42  ;;  %3182 = vmatpush.bf16.msra.mxu1 %v2927_v35  ;;  %3183 = vmatpush.bf16.msra.mxu2 %v2927_v35  ;;  %v447_v53 = vunpack.c.l.b16 %v383_v44  ;;  %v448_v54 = vunpack.c.l.b16 %v384_v45  ;;  %v3144_v42 = vld [vmem:[%s3269_s27 + $0x28] sm:$0xff]  }
  0x1d   : > { %v455_v55 = vunpack.c.l.b16 %v391_v46  ;;  %3184 = vmatpush.bf16.msra.mxu3 %v2927_v35  ;;  %1567 = vmatpush.bf16.msra.mxu0 %v2927_v35  ;;  %v456_v58 = vunpack.c.l.b16 %v392_v48  ;;  %v386_v61 = vpack.c.bf16 %v354_v51, %v354_v51  ;;  %v449_v63 = vunpack.c.l.b16 %v385_v56  ;;  %v2939_v51 = vld [vmem:[%s4249_s2 + $0x78] sm:$0xff] }
  0x1e   : > { %v463_v59 = vunpack.c.l.b16 %v399_v49  ;;  %v464_v60 = vunpack.c.l.b16 %v400_v50  ;;  %v476_v62 = vpack.c.b16 %v448_v54, %v447_v53  ;;  %v296_v0 = vmul.f32 %v3274_v3, %v3030_v22 }
  0x1f   : > { %v297_v1 = vmul.f32 %v3274_v3, %v3031_v26  ;;  %v480_v2 = vpack.c.b16 %v456_v58, %v455_v55  ;;  %v450_v5 = vunpack.c.l.b16 %v386_v61  ;;  %v3047_v25 = vunpack.c.h.bf16 %v3151_v57  ;;  %v2946_v57 = vld [vmem:[%s4249_s2 + $0xb0] sm:$0xff] }
  0x20   : > { %v484_v4 = vpack.c.b16 %v464_v60, %v463_v59  ;;  %3185 = vmatpush.bf16.msra.mxu1 %v2926_v52  ;;  %3186 = vmatpush.bf16.msra.mxu2 %v2926_v52  ;;  %v511_v8 = vshrl.u32 %v476_v62, 16  ;;  %v514_v10 = vshll.u32 %v476_v62, 16  ;;  %v329_v11 = vadd.f32 %v3282_v9, %v296_v0  ;;  %v2954_v58 = vld [vmem:[%s4249_s2 + $0xf0] sm:$0xff] }
  0x21   : > { %v330_v12 = vadd.f32 %v3282_v9, %v297_v1  ;;  %3187 = vmatpush.bf16.msra.mxu3 %v2926_v52  ;;  %1568 = vmatpush.bf16.msra.mxu0 %v2926_v52  ;;  %v539_v13 = vshrl.u32 %v480_v2, 16  ;;  %v542_v14 = vshll.u32 %v480_v2, 16  ;;  %v477_v18 = vpack.c.b16 %v450_v5, %v449_v63  ;;  %v2963_v52 = vld [vmem:[%s4249_s2 + $0x138] sm:$0xff]  ;;  %v3148_v63 = vld [vmem:[%s3269_s27 + $0x48] sm:$0xff]  }
  0x22   : > { %v567_v15 = vshrl.u32 %v484_v4, 16  ;;  %v570_v16 = vshll.u32 %v484_v4, 16  ;;  %v3323_v17 = vrot.slane %v511_v8, 7  ;;  %v361_v19 = vmax.f32 %v329_v11, 0.0  ;;  %v2938_v11 = vld [vmem:[%s4249_s2 + $0x70] sm:$0xff] }
  0x23   : > { %v362_v20 = vmax.f32 %v330_v12, 0.0  ;;  %v3332_v23 = vrot.slane %v539_v13, 7  ;;  %v304_v26 = vmul.f32 %v3274_v3, %v3046_v6  ;;  %v518_v29 = vshrl.u32 %v477_v18, 16 }
  0x24   : > { %v3334_v24 = vrot.slane %v567_v15, 7  ;;  %3188 = vmatpush.bf16.msra.mxu1 %v2925_v7  ;;  %3189 = vmatpush.bf16.msra.mxu2 %v2925_v7  ;;  %v516_v28 = vor.u32 %v514_v10, %v3323_v17  ;;  %v521_v30 = vshll.u32 %v477_v18, 16  ;;  %v393_v31 = vpack.c.bf16 %v361_v19, %v361_v19  ;;  %v2945_v19 = vld [vmem:[%s4249_s2 + $0xa8] sm:$0xff] }
  0x25   : > { %3190 = vmatpush.bf16.msra.mxu3 %v2925_v7  ;;  %1569 = vmatpush.bf16.msra.mxu0 %v2925_v7  ;;  %v544_v32 = vor.u32 %v542_v14, %v3332_v23  ;;  %v394_v34 = vpack.c.bf16 %v362_v20, %v362_v20  ;;  %v2998_v35 = vunpack.c.l.bf16 %v2997_v21  ;;  %v3353_v39 = vrot.slane %v518_v29, 7  ;;  %v2962_v14 = vld [vmem:[%s4249_s2 + $0x130] sm:$0xff] }
  0x26   : > { %v572_v33 = vor.u32 %v570_v16, %v3334_v24  ;;  %v3345_v36 = vsel %vm3328_vm2, 0, %v516_v28  ;;  %v457_v40 = vunpack.c.l.b16 %v393_v31  ;;  %v305_v41 = vmul.f32 %v3274_v3, %v3047_v25  ;;  %v2953_v25 = vld [vmem:[%s4249_s2 + $0xe8] sm:$0xff] }
  0x27   : > { %v3359_v43 = vsel %vm3328_vm2, 0, %v544_v32  ;;  %v458_v45 = vunpack.c.l.b16 %v394_v34  ;;  %v337_v46 = vadd.f32 %v3282_v9, %v304_v26  ;;  %v523_v47 = vor.u32 %v521_v30, %v3353_v39 }
  0x28   : > { %4276 = vst [vmem:[#allocation2_spill] sm:$0xff] %v3359_v43  ;;  %v3363_v44 = vsel %vm3328_vm2, 0, %v572_v33  ;;  %3191 = vmatpush.bf16.msra.mxu1 %v2924_v27  ;;  %3192 = vmatpush.bf16.msra.mxu2 %v2924_v27  ;;  %v338_v48 = vadd.f32 %v3282_v9, %v305_v41  ;;  %v2999_v49 = vunpack.c.h.bf16 %v2997_v21  ;;  %v280_v50 = vmul.f32 %v3274_v3, %v2998_v35  ;;  %v3152_v35 = vld [vmem:[%s3269_s27 + $0x68] sm:$0xff]  }
  0x29   : > { %3193 = vmatpush.bf16.msra.mxu3 %v2924_v27  ;;  %1570 = vmatpush.bf16.msra.mxu0 %v2924_v27  ;;  %v481_v53 = vpack.c.b16 %v458_v45, %v457_v40  ;;  %v369_v54 = vmax.f32 %v337_v46, 0.0  ;;  %v3018_v55 = vunpack.c.l.bf16 %v3144_v42  ;;  %v3019_v56 = vunpack.c.h.bf16 %v3144_v42  ;;  %v2961_v40 = vld [vmem:[%s4249_s2 + $0x128] sm:$0xff] }
  0x2a   : > { %v3383_v59 = vsel %vm3328_vm2, 0, %v523_v47  ;;  %v370_v60 = vmax.f32 %v338_v48, 0.0  ;;  %v281_v61 = vmul.f32 %v3274_v3, %v2999_v49  ;;  %v313_v62 = vadd.f32 %v3282_v9, %v280_v50  ;;  %v2944_v49 = vld [vmem:[%s4249_s2 + $0xa0] sm:$0xff] }
  0x2b   : > { %4277 = vst [vmem:[#allocation3_spill] sm:$0xff] %v3383_v59  ;;  %1591 = vmatmul.bf16.vlgmr.msra.gmra.mxu1 %v3345_v36  ;;  %1611 = vmatmul.bf16.vlgmr.msra.gmra.mxu2 %v3359_v43  ;;  %v546_v0 = vshrl.u32 %v481_v53, 16  ;;  %v549_v1 = vshll.u32 %v481_v53, 16  ;;  %v401_v2 = vpack.c.bf16 %v369_v54, %v369_v54  ;;  %v290_v4 = vmul.f32 %v3274_v3, %v3018_v55  ;;  %v2952_v50 = vld [vmem:[%s4249_s2 + $0xe0] sm:$0xff] }
  0x2c   : > { %1741 = vmatpush.bf16.msrb.mxu2 %v2947_v37  ;;  %1631 = vmatmul.bf16.vlgmr.msra.gmra.mxu3 %v3363_v44  ;;  %v4252_v5 = vmov 0   ;;  %v402_v6 = vpack.c.bf16 %v370_v60, %v370_v60  ;;  %v314_v7 = vadd.f32 %v3282_v9, %v281_v61  ;;  %v345_v8 = vmax.f32 %v313_v62, 0.0  ;;  %v2936_v62 = vld [vmem:[%s4249_s2 + $0x60] sm:$0xff] }
  0x2d   : > { %1830 = vmatpush.bf16.msrb.mxu3 %v2955_v38  ;;  %1571 = vmatmul.bf16.vlgmr.msra.gmra.mxu0 %v4252_v5  ;;  %v291_v10 = vmul.f32 %v3274_v3, %v3019_v56  ;;  %v3398_v12 = vrot.slane %v546_v0, 7  ;;  %v465_v13 = vunpack.c.l.b16 %v401_v2  ;;  %v323_v15 = vadd.f32 %v3282_v9, %v290_v4  ;;  %v2937_v38 = vld [vmem:[%s4249_s2 + $0x68] sm:$0xff]  ;;  %v2960_v4 = vld [vmem:[%s4249_s2 + $0x120] sm:$0xff] }
  0x2e   : > { %1652 = vmatpush.bf16.msrb.mxu1 %v2939_v51  ;;  %1919 = vmatpush.bf16.msrb.mxu0 %v2963_v52  ;;  %v3034_v16 = vunpack.c.l.bf16 %v3148_v63  ;;  %v466_v18 = vunpack.c.l.b16 %v402_v6  ;;  %v346_v20 = vmax.f32 %v314_v7, 0.0  ;;  %v377_v21 = vpack.c.bf16 %v345_v8, %v345_v8  ;;  %v3140_v52 = vld [vmem:[%s3269_s27 + $0x8] sm:$0xff]  }
  0x2f   : > { %v324_v26 = vadd.f32 %v3282_v9, %v291_v10  ;;  %v551_v27 = vor.u32 %v549_v1, %v3398_v12  ;;  %v355_v28 = vmax.f32 %v323_v15, 0.0  ;;  %v3035_v29 = vunpack.c.h.bf16 %v3148_v63 }
  0x30   : > { %1742 = vmatpush.bf16.msrb.mxu2 %v2946_v57  ;;  %v298_v30 = vmul.f32 %v3274_v3, %v3034_v16  ;;  %v485_v31 = vpack.c.b16 %v466_v18, %v465_v13  ;;  %v378_v32 = vpack.c.bf16 %v346_v20, %v346_v20  ;;  %v441_v33 = vunpack.c.l.b16 %v377_v21  ;;  %v2951_v13 = vld [vmem:[%s4249_s2 + $0xd8] sm:$0xff] }
  0x31   : > { %1831 = vmatpush.bf16.msrb.mxu3 %v2954_v58  ;;  %v356_v34 = vmax.f32 %v324_v26, 0.0  ;;  %v3416_v37 = vsel %vm3328_vm2, 0, %v551_v27  ;;  %v387_v41 = vpack.c.bf16 %v355_v28, %v355_v28  ;;  %v299_v42 = vmul.f32 %v3274_v3, %v3035_v29 }
  0x32   : > { %1653 = vmatpush.bf16.msrb.mxu1 %v2938_v11  ;;  %1920 = vmatpush.bf16.msrb.mxu0 %v2962_v14  ;;  %v331_v45 = vadd.f32 %v3282_v9, %v298_v30  ;;  %v574_v46 = vshrl.u32 %v485_v31, 16  ;;  %v577_v47 = vshll.u32 %v485_v31, 16  ;;  %v442_v48 = vunpack.c.l.b16 %v378_v32  ;;  %v2943_v11 = vld [vmem:[%s4249_s2 + $0x98] sm:$0xff] }
  0x33   : > { %v388_v51 = vpack.c.bf16 %v356_v34, %v356_v34  ;;  %v451_v53 = vunpack.c.l.b16 %v387_v41  ;;  %v332_v54 = vadd.f32 %v3282_v9, %v299_v42  ;;  %v3050_v56 = vunpack.c.l.bf16 %v3152_v35  ;;  %v2935_v31 = vld [vmem:[%s4249_s2 + $0x58] sm:$0xff] }
  0x34   : > { %1743 = vmatpush.bf16.msrb.mxu2 %v2945_v19  ;;  %v363_v55 = vmax.f32 %v331_v45, 0.0  ;;  %v3434_v57 = vrot.slane %v574_v46, 7  ;;  %v473_v58 = vpack.c.b16 %v442_v48, %v441_v33  ;;  %v3051_v61 = vunpack.c.h.bf16 %v3152_v35  ;;  %v3145_v19 = vld [vmem:[%s3269_s27 + $0x30] sm:$0xff]  }
  0x35   : > { %1832 = vmatpush.bf16.msrb.mxu3 %v2953_v25  ;;  %v452_v60 = vunpack.c.l.b16 %v388_v51  ;;  %v364_v63 = vmax.f32 %v332_v54, 0.0  ;;  %v306_v1 = vmul.f32 %v3274_v3, %v3050_v56  ;;  %v3002_v2 = vunpack.c.l.bf16 %v3140_v52  ;;  %v2942_v35 = vld [vmem:[%s4249_s2 + $0x90] sm:$0xff] }
  0x36   : > { %1654 = vmatpush.bf16.msrb.mxu1 %v2937_v38  ;;  %1921 = vmatpush.bf16.msrb.mxu0 %v2961_v40  ;;  %v395_v0 = vpack.c.bf16 %v363_v55, %v363_v55  ;;  %v579_v6 = vor.u32 %v577_v47, %v3434_v57  ;;  %v490_v7 = vshrl.u32 %v473_v58, 16  ;;  %v493_v8 = vshll.u32 %v473_v58, 16  ;;  %v2950_v38 = vld [vmem:[%s4249_s2 + $0xd0] sm:$0xff]  ;;  %v2959_v47 = vld [vmem:[%s4249_s2 + $0x118] sm:$0xff] }
  0x37   : > { %v478_v10 = vpack.c.b16 %v452_v60, %v451_v53  ;;  %v396_v14 = vpack.c.bf16 %v364_v63, %v364_v63  ;;  %v307_v16 = vmul.f32 %v3274_v3, %v3051_v61  ;;  %v339_v18 = vadd.f32 %v3282_v9, %v306_v1  ;;  %v2934_v58 = vld [vmem:[%s4249_s2 + $0x50] sm:$0xff] }
  0x38   : > { %1744 = vmatpush.bf16.msrb.mxu2 %v2944_v49  ;;  %v459_v15 = vunpack.c.l.b16 %v395_v0  ;;  %v3455_v20 = vsel %vm3328_vm2, 0, %v579_v6  ;;  %v3457_v21 = vrot.slane %v490_v7, 7  ;;  %v3003_v30 = vunpack.c.h.bf16 %v3140_v52  ;;  %v3149_v52 = vld [vmem:[%s3269_s27 + $0x50] sm:$0xff]   ;;  %v2941_v0 = vld [vmem:[%s4249_s2 + $0x88] sm:$0xff] }
  0x39   : > { %1833 = vmatpush.bf16.msrb.mxu3 %v2952_v50  ;;  %4278 = vst [vmem:[#allocation4_spill] sm:$0xff] %v3455_v20  ;;  %v525_v25 = vshrl.u32 %v478_v10, 16  ;;  %v528_v26 = vshll.u32 %v478_v10, 16  ;;  %v460_v27 = vunpack.c.l.b16 %v396_v14  ;;  %v340_v28 = vadd.f32 %v3282_v9, %v307_v16 }
  0x3a   : > { %1655 = vmatpush.bf16.msrb.mxu1 %v2936_v62  ;;  %v371_v29 = vmax.f32 %v339_v18, 0.0  ;;  %1922 = vmatpush.bf16.msrb.mxu0 %v2960_v4  ;;  %v495_v32 = vor.u32 %v493_v8, %v3457_v21  ;;  %v282_v34 = vmul.f32 %v3274_v3, %v3002_v2  ;;  %v3022_v40 = vunpack.c.l.bf16 %v3145_v19  ;;  %v2949_v18 = vld [vmem:[%s4249_s2 + $0xc8] sm:$0xff] }
  0x3b   : > { %v3464_v33 = vrot.slane %v525_v25, 7  ;;  %1596 = vmatmul.bf16.gmra.mxu1 %v3383_v59  ;;  %1616 = vmatmul.bf16.gmra.mxu2 %v3416_v37  ;;  %v482_v41 = vpack.c.b16 %v460_v27, %v459_v15  ;;  %v372_v42 = vmax.f32 %v340_v28, 0.0  ;;  %v283_v46 = vmul.f32 %v3274_v3, %v3003_v30  ;;  %v2933_v25 = vld [vmem:[%s4249_s2 + $0x48] sm:$0xff]  ;;  %v3153_v30 = vld [vmem:[%s3269_s27 + $0x70] sm:$0xff]  }
  0x3c   : > { %1745 = vmatpush.bf16.msrb.mxu2 %v2943_v11  ;;  %v403_v45 = vpack.c.bf16 %v371_v29, %v371_v29  ;;  %1636 = vmatmul.bf16.gmra.mxu3 %v3455_v20  ;;  %v3482_v48 = vsel %vm3328_vm2, 0, %v495_v32  ;;  %v315_v50 = vadd.f32 %v3282_v9, %v282_v34  ;;  %v3023_v51 = vunpack.c.h.bf16 %v3145_v19  ;;  %v2958_v19 = vld [vmem:[%s4249_s2 + $0x110] sm:$0xff] }
  0x3d   : > { %1834 = vmatpush.bf16.msrb.mxu3 %v2951_v13  ;;  %v530_v49 = vor.u32 %v528_v26, %v3464_v33  ;;  %1576 = vmatmul.bf16.gmra.mxu0 %v3482_v48  ;;  %v553_v53 = vshrl.u32 %v482_v41, 16  ;;  %v556_v54 = vshll.u32 %v482_v41, 16  ;;  %v404_v55 = vpack.c.bf16 %v372_v42, %v372_v42  ;;  %v2957_v41 = vld [vmem:[%s4249_s2 + $0x108] sm:$0xff] }
  0x3e   : > { %v467_v56 = vunpack.c.l.b16 %v403_v45  ;;  %1656 = vmatpush.bf16.msrb.mxu1 %v2935_v31  ;;  %v316_v61 = vadd.f32 %v3282_v9, %v283_v46  ;;  %v347_v62 = vmax.f32 %v315_v50, 0.0  ;;  %v292_v63 = vmul.f32 %v3274_v3, %v3022_v40  ;;  %1923 = vmatpush.bf16.msrb.mxu0 %v2959_v47  ;;  %v2940_v31 = vld [vmem:[%s4249_s2 + $0x80] sm:$0xff] }
  0x3f   : > { %v3493_v60 = vsel %vm3328_vm2, 0, %v530_v49  ;;  %v3500_v1 = vrot.slane %v553_v53, 7  ;;  %v468_v2 = vunpack.c.l.b16 %v404_v55  ;;  %v293_v4 = vmul.f32 %v3274_v3, %v3023_v51  ;;  %v2948_v40 = vld [vmem:[%s4249_s2 + $0xc0] sm:$0xff] }
  0x40   : > { %4279 = vst [vmem:[#allocation5_spill] sm:$0xff] %v3493_v60  ;;  %1746 = vmatpush.bf16.msrb.mxu2 %v2942_v35  ;;  %v3038_v6 = vunpack.c.l.bf16 %v3149_v52  ;;  %v348_v7 = vmax.f32 %v316_v61, 0.0  ;;  %v379_v8 = vpack.c.bf16 %v347_v62, %v347_v62  ;;  %v325_v10 = vadd.f32 %v3282_v9, %v292_v63  ;;  %v2932_v53 = vld [vmem:[%s4249_s2 + $0x40] sm:$0xff] }
  0x41   : > { %1835 = vmatpush.bf16.msrb.mxu3 %v2950_v38  ;;  %v3039_v11 = vunpack.c.h.bf16 %v3149_v52  ;;  %v558_v13 = vor.u32 %v556_v54, %v3500_v1  ;;  %v486_v14 = vpack.c.b16 %v468_v2, %v467_v56  ;;  %v326_v15 = vadd.f32 %v3282_v9, %v293_v4  ;;  %v3141_v2 = vld [vmem:[%s3269_s27 + $0x10] sm:$0xff]  }
  0x42   : > { %1657 = vmatpush.bf16.msrb.mxu1 %v2934_v58  ;;  %v300_v16 = vmul.f32 %v3274_v3, %v3038_v6  ;;  %v380_v26 = vpack.c.bf16 %v348_v7, %v348_v7  ;;  %v443_v27 = vunpack.c.l.b16 %v379_v8  ;;  %v357_v28 = vmax.f32 %v325_v10, 0.0  ;;  %1924 = vmatpush.bf16.msrb.mxu0 %v2958_v19  ;;  %v2956_v10 = vld [vmem:[%s4249_s2 + $0x100] sm:$0xff] }
  0x43   : > { %v301_v29 = vmul.f32 %v3274_v3, %v3039_v11  ;;  %v3523_v32 = vsel %vm3328_vm2, 0, %v558_v13  ;;  %v581_v34 = vshrl.u32 %v486_v14, 16  ;;  %v584_v35 = vshll.u32 %v486_v14, 16 }
  0x44   : > { %1747 = vmatpush.bf16.msrb.mxu2 %v2941_v0  ;;  %v358_v38 = vmax.f32 %v326_v15, 0.0  ;;  %v444_v42 = vunpack.c.l.b16 %v380_v26  ;;  %v389_v45 = vpack.c.bf16 %v357_v28, %v357_v28  ;;  %v333_v46 = vadd.f32 %v3282_v9, %v300_v16 }
  0x45   : > { %1836 = vmatpush.bf16.msrb.mxu3 %v2949_v18  ;;  %v334_v47 = vadd.f32 %v3282_v9, %v301_v29  ;;  %v3533_v49 = vrot.slane %v581_v34, 7  ;;  %v3054_v51 = vunpack.c.l.bf16 %v3153_v30  ;;  %v3055_v52 = vunpack.c.h.bf16 %v3153_v30 }
  0x46   : > { %v390_v50 = vpack.c.bf16 %v358_v38, %v358_v38  ;;  %1658 = vmatpush.bf16.msrb.mxu1 %v2933_v25  ;;  %v474_v54 = vpack.c.b16 %v444_v42, %v443_v27  ;;  %v453_v55 = vunpack.c.l.b16 %v389_v45  ;;  %v365_v56 = vmax.f32 %v333_v46, 0.0  ;;  %1925 = vmatpush.bf16.msrb.mxu0 %v2957_v41 }
  0x47   : > { %v366_v58 = vmax.f32 %v334_v47, 0.0  ;;  %v586_v61 = vor.u32 %v584_v35, %v3533_v49  ;;  %v308_v63 = vmul.f32 %v3274_v3, %v3054_v51  ;;  %v309_v0 = vmul.f32 %v3274_v3, %v3055_v52  ;;  %v2979_v35 = vld [vmem:[%s4249_s2 + $0x1b8] sm:$0xff] }
  0x48   : > { %1748 = vmatpush.bf16.msrb.mxu2 %v2940_v31  ;;  %v454_v62 = vunpack.c.l.b16 %v390_v50  ;;  %v497_v4 = vshrl.u32 %v474_v54, 16  ;;  %v500_v6 = vshll.u32 %v474_v54, 16  ;;  %v397_v7 = vpack.c.bf16 %v365_v56, %v365_v56 }
  0x49   : > { %1837 = vmatpush.bf16.msrb.mxu3 %v2948_v40  ;;  %v398_v8 = vpack.c.bf16 %v366_v58, %v366_v58  ;;  %v3547_v11 = vsel %vm3328_vm2, 0, %v586_v61  ;;  %v341_v14 = vadd.f32 %v3282_v9, %v308_v63  ;;  %v342_v15 = vadd.f32 %v3282_v9, %v309_v0  ;;  %v2971_v61 = vld [vmem:[%s4249_s2 + $0x178] sm:$0xff] }
  0x4a   : > { %v479_v13 = vpack.c.b16 %v454_v62, %v453_v55  ;;  %1659 = vmatpush.bf16.msrb.mxu1 %v2932_v53  ;;  %v3551_v16 = vrot.slane %v497_v4, 7  ;;  %v461_v18 = vunpack.c.l.b16 %v397_v7  ;;  %v3006_v25 = vunpack.c.l.bf16 %v3141_v2  ;;  %1926 = vmatpush.bf16.msrb.mxu0 %v2956_v10  ;;  %v2995_v62 = vld [vmem:[%s4249_s2 + $0x238] sm:$0xff] }
  0x4b   : > { %v462_v19 = vunpack.c.l.b16 %v398_v8  ;;  %1601 = vmatmul.bf16.gmra.mxu1 %v3493_v60  ;;  %1621 = vmatmul.bf16.gmra.mxu2 %v3523_v32  ;;  %v373_v27 = vmax.f32 %v341_v14, 0.0  ;;  %v374_v28 = vmax.f32 %v342_v15, 0.0  ;;  %v3007_v31 = vunpack.c.h.bf16 %v3141_v2 }
  0x4c   : > { %v532_v26 = vshrl.u32 %v479_v13, 16  ;;  %1641 = vmatmul.bf16.gmra.mxu3 %v3547_v11  ;;  %v502_v29 = vor.u32 %v500_v6, %v3551_v16  ;;  %v284_v34 = vmul.f32 %v3274_v3, %v3006_v25  ;;  %2097 = vmatpush.bf16.msra.mxu2 %v2979_v35  ;;  %v535_v46 = vshll.u32 %v479_v13, 16 }
  0x4d   : > { %v483_v30 = vpack.c.b16 %v462_v19, %v461_v18  ;;  %v405_v38 = vpack.c.bf16 %v373_v27, %v373_v27  ;;  %v406_v40 = vpack.c.bf16 %v374_v28, %v374_v28  ;;  %v285_v45 = vmul.f32 %v3274_v3, %v3007_v31  ;;  %v2987_v3 = vld [vmem:[%s4249_s2 + $0x1f8] sm:$0xff] }
  0x4e   : > { %v3563_v41 = vsel %vm3328_vm2, 0, %v502_v29  ;;  %v317_v51 = vadd.f32 %v3282_v9, %v284_v34  ;;  %v3568_v52 = vrot.slane %v532_v26, 7  ;;  %2186 = vmatpush.bf16.msra.mxu3 %v2987_v3  ;;  %2008 = vmatpush.bf16.msra.mxu1 %v2971_v61  ;;  %v680_v31 = vshll.u32 %v3482_v48, 16 }
  0x4f   : > { %v560_v42 = vshrl.u32 %v483_v30, 16  ;;  %1581 = vmatmul.bf16.gmra.mxu0 %v3563_v41  ;;  %v469_v47 = vunpack.c.l.b16 %v405_v38  ;;  %v470_v50 = vunpack.c.l.b16 %v406_v40  ;;  %v563_v54 = vshll.u32 %v483_v30, 16 }
  0x50   : > { %v318_v55 = vadd.f32 %v3282_v9, %v285_v45  ;;  %v349_v58 = vmax.f32 %v317_v51, 0.0  ;;  %v537_v9 = vor.u32 %v535_v46, %v3568_v52  ;;  %2275 = vmatpush.bf16.msra.mxu0 %v2995_v62  ;;  %v652_v34 = vsel %vm3328_vm2, %v3457_v21, 0  ;;  %v2978_v21 = vld [vmem:[%s4249_s2 + $0x1b0] sm:$0xff] }
  0x51   : > { %v3570_v53 = vrot.slane %v560_v42, 7  ;;  %v487_v56 = vpack.c.b16 %v470_v50, %v469_v47  ;;  %v678_v35 = vshrl.u32 %v3482_v48, 16  ;;  %v682_v38 = vrot.slane %v680_v31, 1  ;;  %2098 = vmatpush.bf16.msra.mxu2 %v2978_v21  ;;  %v2986_v50 = vld [vmem:[%s4249_s2 + $0x1f0] sm:$0xff]  ;;  %v2985_v31 = vld [vmem:[%s4249_s2 + $0x1e8] sm:$0xff] }
  0x52   : > { %v350_v63 = vmax.f32 %v318_v55, 0.0  ;;  %v381_v4 = vpack.c.bf16 %v349_v58, %v349_v58  ;;  %v3589_v15 = vsel %vm3328_vm2, 0, %v537_v9  ;;  %v685_v40 = vshll.u32 %v652_v34, 16  ;;  %v2970_v51 = vld [vmem:[%s4249_s2 + $0x170] sm:$0xff]  ;;  %2187 = vmatpush.bf16.msra.mxu3 %v2986_v50 }
  0x53   : > { %v588_v0 = vshrl.u32 %v487_v56, 16  ;;  %v591_v2 = vshll.u32 %v487_v56, 16  ;;  %v565_v6 = vor.u32 %v563_v54, %v3570_v53  ;;  %4280 = vst [vmem:[#allocation6_spill] sm:$0xff] %v3589_v15  ;;  %v3613_v42 = vrot.slane %v4252_v5, 1  ;;  %v2994_v54 = vld [vmem:[%s4249_s2 + $0x230] sm:$0xff]  ;;  %2009 = vmatpush.bf16.msra.mxu1 %v2970_v51 }
  0x54   : > { %v382_v7 = vpack.c.bf16 %v350_v63, %v350_v63  ;;  %v445_v10 = vunpack.c.l.b16 %v381_v4  ;;  %v683_v45 = vor.u32 %v682_v38, %v678_v35  ;;  %v687_v46 = vrot.slane %v685_v40, 1  ;;  %2276 = vmatpush.bf16.msra.mxu0 %v2994_v54  ;;  %v2993_v35 = vld [vmem:[%s4249_s2 + $0x228] sm:$0xff] }
  0x55   : > { %v3584_v8 = vrot.slane %v588_v0, 7  ;;  %v3593_v18 = vsel %vm3328_vm2, 0, %v565_v6  ;;  %4281 = vst [vmem:[#allocation7_spill] sm:$0xff] %v3613_v42  ;;  %v692_v55 = vshll.u32 %v3563_v41, 16  ;;  %v653_v56 = vsel %vm3328_vm2, %v3551_v16, 0 }
  0x56   : > { %v446_v13 = vunpack.c.l.b16 %v382_v7  ;;  %v688_v47 = vsel %vm668_vm3, %v683_v45, %v687_v46  ;;  %v907_v58 = vrot.slane %v3482_v48, 1  ;;  %v908_v3 = vrot.slane %v652_v34, 1  ;;  %v2969_v34 = vld [vmem:[%s4249_s2 + $0x168] sm:$0xff]  ;;  %2188 = vmatpush.bf16.msra.mxu3 %v2985_v31  ;;  %v2968_v31 = vld [vmem:[%s4249_s2 + $0x160] sm:$0xff] }
  0x57   : > { %v593_v14 = vor.u32 %v591_v2, %v3584_v8  ;;  %v690_v61 = vshrl.u32 %v3563_v41, 16  ;;  %v694_v62 = vrot.slane %v692_v55, 1  ;;  %v697_v63 = vshll.u32 %v653_v56, 16  ;;  %2010 = vmatpush.bf16.msra.mxu1 %v2969_v34 }
  0x58   : > { %v475_v19 = vpack.c.b16 %v446_v13, %v445_v10  ;;  %v3638_v0 = vsel %vm904_vm4, %v907_v58, %v908_v3  ;;  %v910_v6 = vrot.slane %v3563_v41, 1  ;;  %v911_v7 = vrot.slane %v653_v56, 1  ;;  %2277 = vmatpush.bf16.msra.mxu0 %v2993_v35 }
  0x59   : > { %v3597_v25 = vsel %vm3328_vm2, 0, %v593_v14  ;;  %v695_v2 = vor.u32 %v694_v62, %v690_v61  ;;  %v699_v4 = vrot.slane %v697_v63, 1  ;;  %v716_v38 = vshll.u32 %v3345_v36, 16 }
  0x5a   : > { %v504_v26 = vshrl.u32 %v475_v19, 16  ;;  %v507_v27 = vshll.u32 %v475_v19, 16  ;;  %v3652_v19 = vsel %vm904_vm4, %v910_v6, %v911_v7  ;;  %v655_v40 = vsel %vm3328_vm2, %v3323_v17, 0 }
  0x5b   : > { %1606 = vmatmul.bf16.gmra.mxu1 %v3589_v15  ;;  %1626 = vmatmul.bf16.gmra.mxu2 %v3593_v18  ;;  %v3643_v16 = vsel %vm668_vm3, %v695_v2, %v699_v4  ;;  %v714_v21 = vshrl.u32 %v3345_v36, 16  ;;  %v721_v50 = vshll.u32 %v655_v40, 16  ;;  %v728_v56 = vshll.u32 %v3383_v59, 16 }
  0x5c   : > { %1646 = vmatmul.bf16.gmra.mxu3 %v3597_v25  ;;  %v506_v28 = vrot.slane %v504_v26, 7  ;;  %v656_v58 = vsel %vm3328_vm2, %v3353_v39, 0  ;;  %v916_v3 = vrot.slane %v3345_v36, 1  ;;  %v917_v61 = vrot.slane %v655_v40, 1  ;;  %v2976_v39 = vld [vmem:[%s4249_s2 + $0x1a0] sm:$0xff]  ;;  %2011 = vmatpush.bf16.msra.mxu1 %v2968_v31 }
  0x5d   : > { %v723_v55 = vrot.slane %v721_v50, 1  ;;  %v726_v62 = vshrl.u32 %v3383_v59, 16  ;;  %v730_v63 = vrot.slane %v728_v56, 1  ;;  %v733_v2 = vshll.u32 %v656_v58, 16 }
  0x5e   : > { %v509_v29 = vor.u32 %v507_v27, %v506_v28  ;;  %v654_v9 = vsel %vm3328_vm2, %v506_v28, 0  ;;  %v2977_v28 = vld [vmem:[%s4249_s2 + $0x1a8] sm:$0xff]  ;;  %v740_v34 = vshll.u32 %v3493_v60, 16  ;;  %v657_v35 = vsel %vm3328_vm2, %v3464_v33, 0 }
  0x5f   : > { %v709_v14 = vshll.u32 %v654_v9, 16  ;;  %2099 = vmatpush.bf16.msra.mxu2 %v2977_v28  ;;  %v914_v46 = vrot.slane %v654_v9, 1  ;;  %v731_v6 = vor.u32 %v730_v63, %v726_v62  ;;  %v735_v7 = vrot.slane %v733_v2, 1  ;;  %v2984_v28 = vld [vmem:[%s4249_s2 + $0x1e0] sm:$0xff] }
  0x60   : > { %v3604_v30 = vsel %vm3328_vm2, 0, %v509_v29  ;;  %2189 = vmatpush.bf16.msra.mxu3 %v2984_v28  ;;  %v920_v40 = vrot.slane %v656_v58, 1  ;;  %v745_v50 = vshll.u32 %v657_v35, 16  ;;  %v922_v28 = vrot.slane %v3493_v60, 1 }
  0x61   : > { %1586 = vmatmul.bf16.gmra.mxu0 %v3604_v30  ;;  %v702_v10 = vshrl.u32 %v3604_v30, 16  ;;  %v711_v27 = vrot.slane %v709_v14, 1  ;;  %v913_v45 = vrot.slane %v3604_v30, 1  ;;  %v923_v31 = vrot.slane %v657_v35, 1 }
  0x63   : > { %v3680_v51 = vsel %vm904_vm4, %v913_v45, %v914_v46  ;;  %2100 = vmatpush.bf16.msra.mxu2 %v2976_v39  ;;  %v2992_v45 = vld [vmem:[%s4249_s2 + $0x220] sm:$0xff]  ;;  %v658_v39 = vsel %vm3328_vm2, %v3568_v52, 0 }
  0x64   : > { %2278 = vmatpush.bf16.msra.mxu0 %v2992_v45  ;;  %v757_v45 = vshll.u32 %v658_v39, 16 }
  0x6b   : > { %1660 = vmatmul.bf16.vlgmr.msrb.gmra.mxu1 %v3613_v42  ;;  %1749 = vmatmul.bf16.vlgmr.msrb.gmra.mxu2 %v3613_v42  ;;  %v926_v42 = vrot.slane %v658_v39, 1 }
  0x6c   : > { %1838 = vmatmul.bf16.vlgmr.msrb.gmra.mxu3 %v3482_v48  ;;  %v704_v48 = vshll.u32 %v3604_v30, 16 }
  0x6e   : > { %v706_v13 = vrot.slane %v704_v48, 1  ;;  %v3698_v48 = vsel %vm904_vm4, %v916_v3, %v917_v61  ;;  %v747_v3 = vrot.slane %v745_v50, 1  ;;  %v3774_v50 = vsel %vm904_vm4, %v922_v28, %v923_v31  ;;  %v2975_v28 = vld [vmem:[%s4249_s2 + $0x198] sm:$0xff] }
  0x6f   : > { %4289 = vst [vmem:[#allocation15_spill] sm:$0xff] %v3774_v50  ;;  %2101 = vmatpush.bf16.msra.mxu2 %v2975_v28  ;;  %v925_v28 = vrot.slane %v3589_v15, 1 }
  0x70   : > { %v707_v26 = vor.u32 %v706_v13, %v702_v10  ;;  %v3709_v10 = vsel %vm668_vm3, %v731_v6, %v735_v7  ;;  %v752_v7 = vshll.u32 %v3589_v15, 16 }
  0x71   : > { %1927 = vmatmul.bf16.vlgmr.msrb.gmra.mxu0 %v688_v47  ;;  %4282 = vst [vmem:[#allocation8_spill] sm:$0xff] %v3709_v10 }
  0x72   : > { %v3661_v29 = vsel %vm668_vm3, %v707_v26, %v711_v27 }
  0x7b   : > { %1665 = vmatmul.bf16.gmra.mxu1 %v688_v47  ;;  %1754 = vmatmul.bf16.gmra.mxu2 %v3638_v0  ;;  %v718_v47 = vrot.slane %v716_v38, 1  ;;  %v919_v38 = vrot.slane %v3383_v59, 1 }
  0x7c   : > { %1843 = vmatmul.bf16.gmra.mxu3 %v3563_v41 }
  0x7d   : > { %v719_v54 = vor.u32 %v718_v47, %v714_v21  ;;  %v738_v21 = vshrl.u32 %v3493_v60, 16  ;;  %v742_v47 = vrot.slane %v740_v34, 1  ;;  %v3742_v33 = vsel %vm904_vm4, %v919_v38, %v920_v40 }
  0x7e   : > { %4285 = vst [vmem:[#allocation11_spill] sm:$0xff] %v3742_v33  ;;  %v750_v38 = vshrl.u32 %v3589_v15, 16  ;;  %v754_v40 = vrot.slane %v752_v7, 1 }
  0x7f   : > { %v3686_v17 = vsel %vm668_vm3, %v719_v54, %v723_v55  ;;  %v743_v58 = vor.u32 %v742_v47, %v738_v21 }
  0x81   : > { %1932 = vmatmul.bf16.gmra.mxu0 %v3643_v16  ;;  %v3750_v61 = vsel %vm668_vm3, %v743_v58, %v747_v3  ;;  %v755_v58 = vor.u32 %v754_v40, %v750_v38  ;;  %v759_v3 = vrot.slane %v757_v45, 1  ;;  %v2983_v40 = vld [vmem:[%s4249_s2 + $0x1d8] sm:$0xff] }
  0x82   : > { %4286 = vst [vmem:[#allocation12_spill] sm:$0xff] %v3750_v61  ;;  %v2967_v45 = vld [vmem:[%s4249_s2 + $0x158] sm:$0xff]  ;;  %2190 = vmatpush.bf16.msra.mxu3 %v2983_v40  ;;  %v3818_v40 = vsel %vm904_vm4, %v925_v28, %v926_v42 }
  0x83   : > { %v3782_v35 = vsel %vm668_vm3, %v755_v58, %v759_v3  ;;  %v764_v58 = vshll.u32 %v3359_v43, 16  ;;  %v659_v3 = vsel %vm3328_vm2, %v3332_v23, 0  ;;  %2012 = vmatpush.bf16.msra.mxu1 %v2967_v45  ;;  %4293 = vst [vmem:[#allocation19_spill] sm:$0xff] %v3818_v40 }
  0x84   : > { %4290 = vst [vmem:[#allocation16_spill] sm:$0xff] %v3782_v35 }
  0x8b   : > { %1670 = vmatmul.bf16.gmra.mxu1 %v3643_v16  ;;  %1759 = vmatmul.bf16.gmra.mxu2 %v3652_v19 }
  0x8c   : > { %1848 = vmatmul.bf16.gmra.mxu3 %v3604_v30 }
  0x91   : > { %1937 = vmatmul.bf16.gmra.mxu0 %v3661_v29 }
  0x9b   : > { %1675 = vmatmul.bf16.gmra.mxu1 %v3661_v29  ;;  %1764 = vmatmul.bf16.gmra.mxu2 %v3680_v51 }
  0x9c   : > { %1853 = vmatmul.bf16.gmra.mxu3 %v3345_v36 }
  0xa1   : > { %1942 = vmatmul.bf16.gmra.mxu0 %v3686_v17 }
  0xa8   : > { %v3695_v4 = vpop.f32.mrf.mxu1 }
  0xaa   : > { %v3700_v9 = vpop.f32.mrf.mxu0 }
  0xab   : > { %1680 = vmatmul.bf16.gmra.mxu1 %v3686_v17  ;;  %1769 = vmatmul.bf16.gmra.mxu2 %v3698_v48 }
  0xac   : > { %1858 = vmatmul.bf16.gmra.mxu3 %v3383_v59 }
  0xae   : > { %v3711_v13 = vpop.f32.mrf.mxu2 }
  0xaf   : > { %v3713_v14 = vpop.f32.mrf.mxu3 }
  0xb0   : > { %4283 = vst [vmem:[#allocation9_spill] sm:$0xff] %v3713_v14  ;;  %v3715_v26 = vpop.f32.mrf.mxu1 }
  0xb1   : > { %1947 = vmatmul.bf16.gmra.mxu0 %v3709_v10 }
  0xb2   : > { %v3718_v27 = vpop.f32.mrf.mxu0 }
  0xb6   : > { %v3734_v46 = vpop.f32.mrf.mxu2 }
  0xb7   : > { %v3737_v54 = vpop.f32.mrf.mxu3 }
  0xb8   : > { %4284 = vst [vmem:[#allocation10_spill] sm:$0xff] %v3737_v54  ;;  %v3739_v55 = vpop.f32.mrf.mxu1  ;;  %v769_v54 = vshll.u32 %v659_v3, 16 }
  0xba   : > { %v3744_v56 = vpop.f32.mrf.mxu0  ;;  %v771_v39 = vrot.slane %v769_v54, 1  ;;  %v776_v54 = vshll.u32 %v3416_v37, 16 }
  0xbb   : > { %1685 = vmatmul.bf16.gmra.mxu1 %v3709_v10  ;;  %1774 = vmatmul.bf16.gmra.mxu2 %v3742_v33 }
  0xbc   : > { %1863 = vmatmul.bf16.gmra.mxu3 %v3493_v60 }
  0xbe   : > { %v3752_v62 = vpop.f32.mrf.mxu2 }
  0xbf   : > { %v3754_v63 = vpop.f32.mrf.mxu3 }
  0xc0   : > { %4287 = vst [vmem:[#allocation13_spill] sm:$0xff] %v3754_v63  ;;  %v3756_v2 = vpop.f32.mrf.mxu1  ;;  %v766_v63 = vrot.slane %v764_v58, 1 }
  0xc1   : > { %1952 = vmatmul.bf16.gmra.mxu0 %v3750_v61 }
  0xc2   : > { %v3759_v6 = vpop.f32.mrf.mxu0 }
  0xc6   : > { %v3766_v34 = vpop.f32.mrf.mxu2 }
  0xc7   : > { %v3769_v21 = vpop.f32.mrf.mxu3 }
  0xc8   : > { %4288 = vst [vmem:[#allocation14_spill] sm:$0xff] %v3769_v21  ;;  %v3771_v47 = vpop.f32.mrf.mxu1  ;;  %v762_v21 = vshrl.u32 %v3359_v43, 16 }
  0xca   : > { %v767_v45 = vor.u32 %v766_v63, %v762_v21  ;;  %v660_v63 = vsel %vm3328_vm2, %v3398_v12, 0  ;;  %v928_v21 = vrot.slane %v3359_v43, 1 }
  0xcb   : > { %1690 = vmatmul.bf16.gmra.mxu1 %v3750_v61  ;;  %1779 = vmatmul.bf16.gmra.mxu2 %v3774_v50  ;;  %v2991_v50 = vld [vmem:[%s4249_s2 + $0x218] sm:$0xff] }
  0xcc   : > { %v3778_v52 = vpop.f32.mrf.mxu0  ;;  %1868 = vmatmul.bf16.gmra.mxu3 %v3589_v15  ;;  %2279 = vmatpush.bf16.msra.mxu0 %v2991_v50  ;;  %v3826_v15 = vsel %vm668_vm3, %v767_v45, %v771_v39  ;;  %v929_v50 = vrot.slane %v659_v3, 1  ;;  %v774_v39 = vshrl.u32 %v3416_v37, 16 }
  0xcd   : > { %4294 = vst [vmem:[#allocation20_spill] sm:$0xff] %v3826_v15 }
  0xce   : > { %v3784_v7 = vpop.f32.mrf.mxu2  ;;  %v3848_v33 = vsel %vm904_vm4, %v928_v21, %v929_v50  ;;  %v2974_v21 = vld [vmem:[%s4249_s2 + $0x190] sm:$0xff] }
  0xcf   : > { %v3789_v31 = vpop.f32.mrf.mxu3  ;;  %4299 = vst [vmem:[#allocation25_spill] sm:$0xff] %v3848_v33  ;;  %2102 = vmatpush.bf16.msra.mxu2 %v2974_v21 }
  0xd0   : > { %4291 = vst [vmem:[#allocation17_spill] sm:$0xff] %v3789_v31  ;;  %v3791_v38 = vpop.f32.mrf.mxu1 }
  0xd1   : > { %1957 = vmatmul.bf16.gmra.mxu0 %v3782_v35 }
  0xd4   : > { %v3804_v5 = vpop.f32.mrf.mxu0 }
  0xd6   : > { %v3807_v31 = vpop.f32.mrf.mxu2 }
  0xd7   : > { %v3813_v14 = vpop.f32.mrf.mxu3 }
  0xd8   : > { %4292 = vst [vmem:[#allocation18_spill] sm:$0xff] %v3813_v14  ;;  %v3815_v23 = vpop.f32.mrf.mxu1 }
  0xdb   : > { %1695 = vmatmul.bf16.gmra.mxu1 %v3782_v35  ;;  %1784 = vmatmul.bf16.gmra.mxu2 %v3818_v40  ;;  %v781_v40 = vshll.u32 %v660_v63, 16 }
  0xdc   : > { %1873 = vmatmul.bf16.gmra.mxu3 %v3359_v43 }
  0xdd   : > { %v783_v10 = vrot.slane %v781_v40, 1  ;;  %v2982_v40 = vld [vmem:[%s4249_s2 + $0x1d0] sm:$0xff] }
  0xde   : > { %v3823_v58 = vpop.f32.mrf.mxu0  ;;  %v3828_v14 = vpop.f32.mrf.mxu2  ;;  %2191 = vmatpush.bf16.msra.mxu3 %v2982_v40 }
  0xdf   : > { %4295 = vst [vmem:[#allocation21_spill] sm:$0xff] %v3828_v14  ;;  %v3830_v61 = vpop.f32.mrf.mxu3 }
  0xe0   : > { %4296 = vst [vmem:[#allocation22_spill] sm:$0xff] %v3830_v61  ;;  %v3832_v42 = vpop.f32.mrf.mxu1  ;;  %v778_v61 = vrot.slane %v776_v54, 1 }
  0xe1   : > { %1962 = vmatmul.bf16.gmra.mxu0 %v3826_v15 }
  0xe2   : > { %v779_v12 = vor.u32 %v778_v61, %v774_v39  ;;  %v788_v39 = vshll.u32 %v3523_v32, 16 }
  0xe4   : > { %v3855_v54 = vsel %vm668_vm3, %v779_v12, %v783_v10  ;;  %v2966_v10 = vld [vmem:[%s4249_s2 + $0x150] sm:$0xff] }
  0xe5   : > { %2013 = vmatpush.bf16.msra.mxu1 %v2966_v10 }
  0xe6   : > { %v3840_v28 = vpop.f32.mrf.mxu0  ;;  %v3842_v45 = vpop.f32.mrf.mxu2 }
  0xe7   : > { %4297 = vst [vmem:[#allocation23_spill] sm:$0xff] %v3842_v45  ;;  %v3845_v35 = vpop.f32.mrf.mxu3 }
  0xe8   : > { %4298 = vst [vmem:[#allocation24_spill] sm:$0xff] %v3845_v35  ;;  %v1661_v60 = vpop.f32.mrf.mxu1 }
  0xe9   : > { %v1662_v14 = vadd.f32 %v1661_v60, %v3700_v9 }
  0xeb   : > { %1700 = vmatmul.bf16.gmra.mxu1 %v3826_v15  ;;  %1789 = vmatmul.bf16.gmra.mxu2 %v3848_v33  ;;  %v2990_v15 = vld [vmem:[%s4249_s2 + $0x210] sm:$0xff] }
  0xec   : > { %1878 = vmatmul.bf16.gmra.mxu3 %v3416_v37  ;;  %2280 = vmatpush.bf16.msra.mxu0 %v2990_v15 }
  0xee   : > { %v1928_v3 = vpop.f32.mrf.mxu0  ;;  %v1750_v43 = vpop.f32.mrf.mxu2 }
  0xef   : > { %v1751_v50 = vadd.f32 %v1750_v43, %v1662_v14  ;;  %v1839_v35 = vpop.f32.mrf.mxu3  ;;  %v661_v43 = vsel %vm3328_vm2, %v3500_v1, 0 }
  0xf0   : > { %v1663_v60 = vpop.f32.mrf.mxu1  ;;  %v793_v33 = vshll.u32 %v661_v43, 16 }
  0xf1   : > { %1967 = vmatmul.bf16.gmra.mxu0 %v3855_v54  ;;  %v1840_v9 = vadd.f32 %v1839_v35, %v1751_v50  ;;  %v1664_v61 = vadd.f32 %v1663_v60, %v3718_v27  ;;  %v931_v27 = vrot.slane %v3416_v37, 1  ;;  %v932_v35 = vrot.slane %v660_v63, 1 }
  0xf2   : > { %v786_v50 = vshrl.u32 %v3523_v32, 16  ;;  %v790_v60 = vrot.slane %v788_v39, 1  ;;  %v795_v10 = vrot.slane %v793_v33, 1 }
  0xf3   : > { %v3872_v14 = vadd.f32 %v1928_v3, %v1840_v9  ;;  %v3880_v40 = vsel %vm904_vm4, %v931_v27, %v932_v35 }
  0xf4   : > { %v791_v9 = vor.u32 %v790_v60, %v786_v50  ;;  %v934_v60 = vrot.slane %v3523_v32, 1 }
  0xf6   : > { %v1930_v12 = vpop.f32.mrf.mxu0  ;;  %v1752_v21 = vpop.f32.mrf.mxu2 }
  0xf7   : > { %v1753_v45 = vadd.f32 %v1752_v21, %v1664_v61  ;;  %v1841_v59 = vpop.f32.mrf.mxu3  ;;  %v3889_v21 = vsel %vm668_vm3, %v791_v9, %v795_v10  ;;  %v798_v9 = vshrl.u32 %v3593_v18, 16 }
  0xf8   : > { %v1666_v1 = vpop.f32.mrf.mxu1 }
  0xf9   : > { %v1842_v3 = vadd.f32 %v1841_v59, %v1753_v45  ;;  %v1667_v63 = vadd.f32 %v1666_v1, %v3744_v56  ;;  %v800_v45 = vshll.u32 %v3593_v18, 16  ;;  %v935_v1 = vrot.slane %v661_v43, 1 }
  0xfb   : > { %1705 = vmatmul.bf16.gmra.mxu1 %v3855_v54  ;;  %1794 = vmatmul.bf16.gmra.mxu2 %v3880_v40  ;;  %v3885_v39 = vadd.f32 %v1930_v12, %v1842_v3  ;;  %v662_v12 = vsel %vm3328_vm2, %v3570_v53, 0  ;;  %v802_v10 = vrot.slane %v800_v45, 1 }
  0xfc   : > { %1883 = vmatmul.bf16.gmra.mxu3 %v3523_v32 }
  0xfd   : > { %4300 = vst [vmem:[#allocation26_spill] sm:$0xff] %v3885_v39 }
  0xfe   : > { %v1933_v61 = vpop.f32.mrf.mxu0  ;;  %v1755_v27 = vpop.f32.mrf.mxu2 }
  0xff   : > { %v1756_v35 = vadd.f32 %v1755_v27, %v1667_v63  ;;  %v1844_v15 = vpop.f32.mrf.mxu3  ;;  %v805_v27 = vshll.u32 %v662_v12, 16 }
 0x100   : > { %v1668_v59 = vpop.f32.mrf.mxu1 }
 0x101   : > { %1972 = vmatmul.bf16.gmra.mxu0 %v3889_v21  ;;  %v1845_v56 = vadd.f32 %v1844_v15, %v1756_v35  ;;  %v1669_v33 = vadd.f32 %v1668_v59, %v3759_v6  ;;  %v3902_v59 = vsel %vm904_vm4, %v934_v60, %v935_v1  ;;  %v2973_v60 = vld [vmem:[%s4249_s2 + $0x188] sm:$0xff] }
 0x102   : > { %2103 = vmatpush.bf16.msra.mxu2 %v2973_v60 }
 0x103   : > { %v3897_v50 = vadd.f32 %v1933_v61, %v1845_v56  ;;  %v803_v61 = vor.u32 %v802_v10, %v798_v9  ;;  %v807_v56 = vrot.slane %v805_v27, 1  ;;  %v2965_v27 = vld [vmem:[%s4249_s2 + $0x148] sm:$0xff] }
 0x104   : > { %2014 = vmatpush.bf16.msra.mxu1 %v2965_v27 }
 0x106   : > { %v1935_v3 = vpop.f32.mrf.mxu0  ;;  %v1757_v63 = vpop.f32.mrf.mxu2 }
 0x107   : > { %v1758_v35 = vadd.f32 %v1757_v63, %v1669_v33  ;;  %v1846_v15 = vpop.f32.mrf.mxu3  ;;  %v3911_v33 = vsel %vm668_vm3, %v803_v61, %v807_v56 }
 0x108   : > { %v1671_v6 = vpop.f32.mrf.mxu1 }
 0x109   : > { %v1847_v39 = vadd.f32 %v1846_v15, %v1758_v35  ;;  %v1672_v53 = vadd.f32 %v1671_v6, %v3778_v52  ;;  %v812_v35 = vshll.u32 %v3363_v44, 16  ;;  %v663_v15 = vsel %vm3328_vm2, %v3334_v24, 0 }
 0x10b   : > { %1710 = vmatmul.bf16.gmra.mxu1 %v3889_v21  ;;  %1799 = vmatmul.bf16.gmra.mxu2 %v3902_v59  ;;  %v3907_v43 = vadd.f32 %v1935_v3, %v1847_v39  ;;  %v2981_v3 = vld [vmem:[%s4249_s2 + $0x1c8] sm:$0xff]  ;;  %v814_v60 = vrot.slane %v812_v35, 1 }
 0x10c   : > { %1888 = vmatmul.bf16.gmra.mxu3 %v3593_v18 }
 0x10d   : > { %4301 = vst [vmem:[#allocation27_spill] sm:$0xff] %v3907_v43  ;;  %2192 = vmatpush.bf16.msra.mxu3 %v2981_v3 }
 0x10e   : > { %v1938_v45 = vpop.f32.mrf.mxu0  ;;  %v1760_v63 = vpop.f32.mrf.mxu2 }
 0x10f   : > { %v1761_v52 = vadd.f32 %v1760_v63, %v1672_v53  ;;  %v1849_v1 = vpop.f32.mrf.mxu3  ;;  %v938_v53 = vrot.slane %v662_v12, 1  ;;  %v810_v63 = vshrl.u32 %v3363_v44, 16 }
 0x110   : > { %v1673_v9 = vpop.f32.mrf.mxu1 }
 0x111   : > { %1977 = vmatmul.bf16.gmra.mxu0 %v3911_v33  ;;  %v1850_v10 = vadd.f32 %v1849_v1, %v1761_v52  ;;  %v1674_v39 = vadd.f32 %v1673_v9, %v3804_v5  ;;  %v937_v5 = vrot.slane %v3593_v18, 1  ;;  %v817_v52 = vshll.u32 %v663_v15, 16  ;;  %v2989_v1 = vld [vmem:[%s4249_s2 + $0x208] sm:$0xff] }
 0x112   : > { %2281 = vmatpush.bf16.msra.mxu0 %v2989_v1 }
 0x113   : > { %v3928_v6 = vadd.f32 %v1938_v45, %v1850_v10  ;;  %v3936_v3 = vsel %vm904_vm4, %v937_v5, %v938_v53  ;;  %v815_v10 = vor.u32 %v814_v60, %v810_v63  ;;  %v819_v27 = vrot.slane %v817_v52, 1 }
 0x114   : > { %v824_v60 = vshll.u32 %v3455_v20, 16 }
 0x115   : > { %4302 = vst [vmem:[#allocation28_spill] sm:$0xff] %v3928_v6 }
 0x116   : > { %v1940_v61 = vpop.f32.mrf.mxu0  ;;  %v1762_v56 = vpop.f32.mrf.mxu2 }
 0x117   : > { %v1763_v9 = vadd.f32 %v1762_v56, %v1674_v39  ;;  %v1851_v43 = vpop.f32.mrf.mxu3  ;;  %v3945_v56 = vsel %vm668_vm3, %v815_v10, %v819_v27  ;;  %v822_v27 = vshrl.u32 %v3455_v20, 16 }
 0x118   : > { %v1676_v24 = vpop.f32.mrf.mxu1 }
 0x119   : > { %v1852_v45 = vadd.f32 %v1851_v43, %v1763_v9  ;;  %v1677_v12 = vadd.f32 %v1676_v24, %v3823_v58  ;;  %v940_v9 = vrot.slane %v3363_v44, 1  ;;  %v941_v24 = vrot.slane %v663_v15, 1  ;;  %v3205_v15 = vld [vmem:[%s4248_s1] ss:$0 sm:$0xff] }
 0x11b   : > { %1715 = vmatmul.bf16.gmra.mxu1 %v3911_v33  ;;  %1804 = vmatmul.bf16.gmra.mxu2 %v3936_v3  ;;  %v3941_v35 = vadd.f32 %v1940_v61, %v1852_v45  ;;  %v3953_v61 = vsel %vm3328_vm2, %v3434_v57, 0  ;;  %v3154_v45 = vld [vmem:[%s3269_s27 + $0x78] sm:$0xff]   ;;  %v3962_v57 = vsel %vm904_vm4, %v940_v9, %v941_v24 }
 0x11c   : > { %1893 = vmatmul.bf16.gmra.mxu3 %v3363_v44  ;;  %4305 = vst [vmem:[#allocation31_spill] sm:$0xff] %v3962_v57 }
 0x11d   : > { %4303 = vst [vmem:[#allocation29_spill] sm:$0xff] %v3941_v35  ;;  %v3059_v35 = vunpack.c.h.bf16 %v3154_v45 }
 0x11e   : > { %v1943_v39 = vpop.f32.mrf.mxu0  ;;  %v1765_v5 = vpop.f32.mrf.mxu2 }
 0x11f   : > { %v1766_v53 = vadd.f32 %v1765_v5, %v1677_v12  ;;  %v1854_v43 = vpop.f32.mrf.mxu3  ;;  %v826_v5 = vrot.slane %v824_v60, 1 }
 0x120   : > { %v1678_v1 = vpop.f32.mrf.mxu1 }
 0x121   : > { %1982 = vmatmul.bf16.gmra.mxu0 %v3945_v56  ;;  %v1855_v58 = vadd.f32 %v1854_v43, %v1766_v53  ;;  %v1679_v63 = vadd.f32 %v1678_v1, %v3840_v28  ;;  %v829_v28 = vshll.u32 %v3953_v61, 16  ;;  %v3058_v1 = vunpack.c.l.bf16 %v3154_v45 }
 0x123   : > { %v3955_v52 = vadd.f32 %v1943_v39, %v1855_v58  ;;  %v827_v58 = vor.u32 %v826_v5, %v822_v27  ;;  %v310_v60 = vmul.f32 %v3205_v15, %v3058_v1  ;;  %v2972_v5 = vld [vmem:[%s4249_s2 + $0x180] sm:$0xff] }
 0x124   : > { %2104 = vmatpush.bf16.msra.mxu2 %v2972_v5 }
 0x125   : > { %4304 = vst [vmem:[#allocation30_spill] sm:$0xff] %v3955_v52  ;;  %v831_v52 = vrot.slane %v829_v28, 1 }
 0x126   : > { %v1945_v12 = vpop.f32.mrf.mxu0  ;;  %v1767_v10 = vpop.f32.mrf.mxu2 }
 0x127   : > { %v1768_v53 = vadd.f32 %v1767_v10, %v1679_v63  ;;  %v1856_v43 = vpop.f32.mrf.mxu3  ;;  %v311_v63 = vmul.f32 %v3205_v15, %v3059_v35  ;;  %v3974_v45 = vsel %vm668_vm3, %v827_v58, %v831_v52  ;;  %v3206_v35 = vld [vmem:[%s4248_s1 + $0x1] ss:$0 sm:$0xff]  ;;  %v665_v58 = vsel %vm3328_vm2, %v3533_v49, 0 }
 0x128   : > { %v1681_v6 = vpop.f32.mrf.mxu1  ;;  %v2964_v52 = vld [vmem:[%s4249_s2 + $0x140] sm:$0xff] }
 0x129   : > { %v1857_v39 = vadd.f32 %v1856_v43, %v1768_v53  ;;  %v1682_v9 = vadd.f32 %v1681_v6, %v3695_v4  ;;  %v344_v43 = vadd.f32 %v3206_v35, %v311_v63  ;;  %v2980_v6 = vld [vmem:[%s4249_s2 + $0x1c0] sm:$0xff]  ;;  %2015 = vmatpush.bf16.msra.mxu1 %v2964_v52 }
 0x12a   : > { %2193 = vmatpush.bf16.msra.mxu3 %v2980_v6  ;;  %v2988_v49 = vld [vmem:[%s4249_s2 + $0x200] sm:$0xff] }
 0x12b   : > { %1720 = vmatmul.bf16.gmra.mxu1 %v3945_v56  ;;  %1809 = vmatmul.bf16.gmra.mxu2 %v3962_v57  ;;  %v3969_v10 = vadd.f32 %v1945_v12, %v1857_v39  ;;  %v343_v12 = vadd.f32 %v3206_v35, %v310_v60  ;;  %v836_v39 = vshll.u32 %v3547_v11, 16  ;;  %v376_v60 = vmax.f32 %v344_v43, 0.0 }
 0x12c   : > { %1898 = vmatmul.bf16.gmra.mxu3 %v3455_v20  ;;  %v834_v35 = vshrl.u32 %v3547_v11, 16  ;;  %v841_v57 = vshll.u32 %v665_v58, 16  ;;  %2282 = vmatpush.bf16.msra.mxu0 %v2988_v49  ;;  %v848_v49 = vshll.u32 %v3597_v25, 16 }
 0x12d   : > { %4306 = vst [vmem:[#allocation32_spill] sm:$0xff] %v3969_v10  ;;  %v375_v15 = vmax.f32 %v343_v12, 0.0  ;;  %v838_v10 = vrot.slane %v836_v39, 1 }
 0x12e   : > { %v1948_v24 = vpop.f32.mrf.mxu0  ;;  %v1770_v27 = vpop.f32.mrf.mxu2 }
 0x12f   : > { %v1771_v28 = vadd.f32 %v1770_v27, %v1682_v9  ;;  %v1859_v53 = vpop.f32.mrf.mxu3  ;;  %v943_v9 = vrot.slane %v3455_v20, 1  ;;  %v944_v27 = vrot.slane %v3953_v61, 1  ;;  %v839_v61 = vor.u32 %v838_v10, %v834_v35 }
 0x130   : > { %v1683_v1 = vpop.f32.mrf.mxu1 }
 0x131   : > { %1987 = vmatmul.bf16.gmra.mxu0 %v3974_v45  ;;  %v1860_v4 = vadd.f32 %v1859_v53, %v1771_v28  ;;  %v1684_v5 = vadd.f32 %v1683_v1, %v3715_v26  ;;  %v4003_v52 = vsel %vm904_vm4, %v943_v9, %v944_v27  ;;  %v843_v1 = vrot.slane %v841_v57, 1 }
 0x133   : > { %v3993_v63 = vadd.f32 %v1948_v24, %v1860_v4  ;;  %v407_v24 = vpack.c.bf16 %v375_v15, %v375_v15  ;;  %v408_v4 = vpack.c.bf16 %v376_v60, %v376_v60  ;;  %v4012_v9 = vsel %vm668_vm3, %v839_v61, %v843_v1 }
 0x134   : > { %v850_v61 = vrot.slane %v848_v49, 1 }
 0x135   : > { %4307 = vst [vmem:[#allocation33_spill] sm:$0xff] %v3993_v63  ;;  %v471_v39 = vunpack.c.l.b16 %v407_v24  ;;  %v472_v63 = vunpack.c.l.b16 %v408_v4  ;;  %v947_v24 = vrot.slane %v665_v58, 1 }
 0x136   : > { %v1950_v28 = vpop.f32.mrf.mxu0  ;;  %v1772_v53 = vpop.f32.mrf.mxu2 }
 0x137   : > { %v1773_v12 = vadd.f32 %v1772_v53, %v1684_v5  ;;  %v1861_v43 = vpop.f32.mrf.mxu3  ;;  %v488_v57 = vpack.c.b16 %v472_v63, %v471_v39 }
 0x138   : > { %v1686_v6 = vpop.f32.mrf.mxu1 }
 0x139   : > { %v1862_v26 = vadd.f32 %v1861_v43, %v1773_v12  ;;  %v1687_v15 = vadd.f32 %v1686_v6, %v3739_v55  ;;  %v595_v12 = vshrl.u32 %v488_v57, 16  ;;  %v946_v43 = vrot.slane %v3547_v11, 1 }
 0x13b   : > { %1725 = vmatmul.bf16.gmra.mxu1 %v3974_v45  ;;  %1814 = vmatmul.bf16.gmra.mxu2 %v4003_v52  ;;  %v4007_v20 = vadd.f32 %v1950_v28, %v1862_v26  ;;  %v666_v28 = vsel %vm3328_vm2, %v3584_v8, 0  ;;  %v846_v26 = vshrl.u32 %v3597_v25, 16  ;;  %v4025_v8 = vsel %vm904_vm4, %v946_v43, %v947_v24 }
 0x13c   : > { %1903 = vmatmul.bf16.gmra.mxu3 %v3547_v11  ;;  %v853_v1 = vshll.u32 %v666_v28, 16 }
 0x13e   : > { %v1953_v60 = vpop.f32.mrf.mxu0  ;;  %v1775_v27 = vpop.f32.mrf.mxu2 }
 0x13f   : > { %v1776_v5 = vadd.f32 %v1775_v27, %v1687_v15  ;;  %v1864_v10 = vpop.f32.mrf.mxu3  ;;  %v597_v27 = vrot.slane %v595_v12, 7 }
 0x140   : > { %v1688_v53 = vpop.f32.mrf.mxu1 }
 0x141   : > { %1992 = vmatmul.bf16.gmra.mxu0 %v4012_v9  ;;  %v1865_v35 = vadd.f32 %v1864_v10, %v1776_v5  ;;  %v1689_v4 = vadd.f32 %v1688_v53, %v3756_v2  ;;  %v598_v5 = vshll.u32 %v488_v57, 16 }
 0x143   : > { %v4019_v55 = vadd.f32 %v1953_v60, %v1865_v35  ;;  %v851_v35 = vor.u32 %v850_v61, %v846_v26  ;;  %v600_v2 = vor.u32 %v598_v5, %v597_v27 }
 0x145   : > { %4308 = vst [vmem:[#allocation34_spill] sm:$0xff] %v4019_v55  ;;  %v855_v55 = vrot.slane %v853_v1, 1  ;;  %v950_v1 = vrot.slane %v666_v28, 1 }
 0x146   : > { %v1955_v6 = vpop.f32.mrf.mxu0  ;;  %v1777_v63 = vpop.f32.mrf.mxu2 }
 0x147   : > { %v1778_v39 = vadd.f32 %v1777_v63, %v1689_v4  ;;  %v1866_v15 = vpop.f32.mrf.mxu3  ;;  %v4034_v57 = vsel %vm668_vm3, %v851_v35, %v855_v55  ;;  %v4038_v4 = vsel %vm3328_vm2, 0, %v600_v2  ;;  %v949_v55 = vrot.slane %v3597_v25, 1 }
 0x148   : > { %v1691_v10 = vpop.f32.mrf.mxu1  ;;  %v971_v26 = vshll.u32 %v4038_v4, 16 }
 0x149   : > { %v1867_v60 = vadd.f32 %v1866_v15, %v1778_v39  ;;  %v1692_v53 = vadd.f32 %v1691_v10, %v3771_v47  ;;  %v4044_v47 = vsel %vm3328_vm2, %v597_v27, 0  ;;  %v969_v10 = vshrl.u32 %v4038_v4, 16 }
 0x14a   : > { %v976_v35 = vshll.u32 %v4044_v47, 16  ;;  %v4053_v22 = vsel %vm904_vm4, %v949_v55, %v950_v1 }
 0x14b   : > { %1730 = vmatmul.bf16.gmra.mxu1 %v4012_v9  ;;  %1819 = vmatmul.bf16.gmra.mxu2 %v4025_v8  ;;  %v4029_v58 = vadd.f32 %v1955_v6, %v1867_v60  ;;  %v973_v60 = vrot.slane %v971_v26, 1 }
 0x14c   : > { %1908 = vmatmul.bf16.gmra.mxu3 %v3597_v25 }
 0x14e   : > { %v1958_v49 = vpop.f32.mrf.mxu0  ;;  %v1780_v12 = vpop.f32.mrf.mxu2 }
 0x14f   : > { %v1781_v43 = vadd.f32 %v1780_v12, %v1692_v53  ;;  %v1869_v24 = vpop.f32.mrf.mxu3 }
 0x150   : > { %v1693_v63 = vpop.f32.mrf.mxu1 }
 0x151   : > { %1997 = vmatmul.bf16.gmra.mxu0 %v4034_v57  ;;  %v1870_v6 = vadd.f32 %v1869_v24, %v1781_v43  ;;  %v1694_v39 = vadd.f32 %v1693_v63, %v3791_v38  ;;  %v978_v43 = vrot.slane %v976_v35, 1 }
 0x153   : > { %v4046_v61 = vadd.f32 %v1958_v49, %v1870_v6  ;;  %v974_v49 = vor.u32 %v973_v60, %v969_v10 }
 0x155   : > { %v4062_v63 = vsel %vm668_vm3, %v974_v49, %v978_v43 }
 0x156   : > { %v1960_v15 = vpop.f32.mrf.mxu0  ;;  %v1782_v5 = vpop.f32.mrf.mxu2 }
 0x157   : > { %v1783_v2 = vadd.f32 %v1782_v5, %v1694_v39  ;;  %v1871_v53 = vpop.f32.mrf.mxu3 }
 0x158   : > { %v1696_v12 = vpop.f32.mrf.mxu1 }
 0x159   : > { %v1872_v27 = vadd.f32 %v1871_v53, %v1783_v2  ;;  %v1697_v28 = vadd.f32 %v1696_v12, %v3815_v23 }
 0x15b   : > { %1735 = vmatmul.bf16.gmra.mxu1 %v4034_v57  ;;  %1824 = vmatmul.bf16.gmra.mxu2 %v4053_v22  ;;  %v4057_v38 = vadd.f32 %v1960_v15, %v1872_v27 }
 0x15c   : > { %1913 = vmatmul.bf16.gmra.mxu3 %v4038_v4 }
 0x15e   : > { %v1963_v24 = vpop.f32.mrf.mxu0  ;;  %v1785_v6 = vpop.f32.mrf.mxu2 }
 0x15f   : > { %v1786_v26 = vadd.f32 %v1785_v6, %v1697_v28  ;;  %v1874_v55 = vpop.f32.mrf.mxu3 }
 0x160   : > { %v1698_v1 = vpop.f32.mrf.mxu1 }
 0x161   : > { %2002 = vmatmul.bf16.gmra.mxu0 %v4062_v63  ;;  %v1875_v39 = vadd.f32 %v1874_v55, %v1786_v26  ;;  %v1699_v15 = vadd.f32 %v1698_v1, %v3832_v42 }
 0x163   : > { %v4065_v5 = vadd.f32 %v1963_v24, %v1875_v39 }
 0x166   : > { %v1965_v10 = vpop.f32.mrf.mxu0  ;;  %v1787_v60 = vpop.f32.mrf.mxu2 }
 0x167   : > { %v1788_v35 = vadd.f32 %v1787_v60, %v1699_v15  ;;  %v1876_v2 = vpop.f32.mrf.mxu3 }
 0x168   : > { %v1701_v23 = vpop.f32.mrf.mxu1 }
 0x169   : > { %v1877_v53 = vadd.f32 %v1876_v2, %v1788_v35  ;;  %v1702_v27 = vadd.f32 %v1701_v23, %v3711_v13 }
 0x16b   : > { %2016 = vmatmul.bf16.vlgmr.msra.gmra.mxu1 %v3638_v0  ;;  %2105 = vmatmul.bf16.vlgmr.msra.gmra.mxu2 %v3563_v41  ;;  %v4070_v12 = vadd.f32 %v1965_v10, %v1877_v53 }
 0x16c   : > { %2194 = vmatmul.bf16.vlgmr.msra.gmra.mxu3 %v3643_v16 }
 0x16e   : > { %v1968_v49 = vpop.f32.mrf.mxu0  ;;  %v1790_v43 = vpop.f32.mrf.mxu2 }
 0x16f   : > { %v1791_v28 = vadd.f32 %v1790_v43, %v1702_v27  ;;  %v1879_v42 = vpop.f32.mrf.mxu3 }
 0x170   : > { %v1703_v24 = vpop.f32.mrf.mxu1 }
 0x171   : > { %2283 = vmatmul.bf16.vlgmr.msra.gmra.mxu0 %v3652_v19  ;;  %v1880_v6 = vadd.f32 %v1879_v42, %v1791_v28  ;;  %v1704_v0 = vadd.f32 %v1703_v24, %v3734_v46 }
 0x173   : > { %v4075_v26 = vadd.f32 %v1968_v49, %v1880_v6 }
 0x176   : > { %v1970_v55 = vpop.f32.mrf.mxu0  ;;  %v1792_v41 = vpop.f32.mrf.mxu2 }
 0x177   : > { %v1793_v1 = vadd.f32 %v1792_v41, %v1704_v0  ;;  %v1881_v39 = vpop.f32.mrf.mxu3 }
 0x178   : > { %v1706_v15 = vpop.f32.mrf.mxu1 }
 0x179   : > { %v1882_v16 = vadd.f32 %v1881_v39, %v1793_v1  ;;  %v1707_v10 = vadd.f32 %v1706_v15, %v3752_v62 }
 0x17b   : > { %2021 = vmatmul.bf16.gmra.mxu1 %v3652_v19  ;;  %2110 = vmatmul.bf16.gmra.mxu2 %v3604_v30  ;;  %v4080_v13 = vadd.f32 %v1970_v55, %v1882_v16 }
 0x17c   : > { %2199 = vmatmul.bf16.gmra.mxu3 %v3661_v29 }
 0x17e   : > { %v1973_v60 = vpop.f32.mrf.mxu0  ;;  %v1795_v35 = vpop.f32.mrf.mxu2 }
 0x17f   : > { %v1796_v2 = vadd.f32 %v1795_v35, %v1707_v10  ;;  %v1884_v46 = vpop.f32.mrf.mxu3 }
 0x180   : > { %v1708_v23 = vpop.f32.mrf.mxu1 }
 0x181   : > { %2288 = vmatmul.bf16.gmra.mxu0 %v3680_v51  ;;  %v1885_v53 = vadd.f32 %v1884_v46, %v1796_v2  ;;  %v1709_v19 = vadd.f32 %v1708_v23, %v3766_v34  ;;  %v4310_v2 = vld [vmem:[#allocation8_spill] sm:$0xff]  ;;  %v4311_v46 = vld [vmem:[#allocation21_spill] sm:$0xff] }
 0x183   : > { %v4085_v27 = vadd.f32 %v1973_v60, %v1885_v53 }
 0x186   : > { %v1975_v49 = vpop.f32.mrf.mxu0  ;;  %v1797_v30 = vpop.f32.mrf.mxu2 }
 0x187   : > { %v1798_v43 = vadd.f32 %v1797_v30, %v1709_v19  ;;  %v1886_v28 = vpop.f32.mrf.mxu3 }
 0x188   : > { %v1711_v42 = vpop.f32.mrf.mxu1 }
 0x189   : > { %v1887_v29 = vadd.f32 %v1886_v28, %v1798_v43  ;;  %v1712_v24 = vadd.f32 %v1711_v42, %v3784_v7  ;;  %v4309_v7 = vld [vmem:[#allocation3_spill] sm:$0xff] }
 0x18a   : > { %v4312_v43 = vld [vmem:[#allocation11_spill] sm:$0xff] }
 0x18b   : > { %2026 = vmatmul.bf16.gmra.mxu1 %v3680_v51  ;;  %2115 = vmatmul.bf16.gmra.mxu2 %v3345_v36  ;;  %v4090_v62 = vadd.f32 %v1975_v49, %v1887_v29  ;;  %v4313_v29 = vld [vmem:[#allocation23_spill] sm:$0xff] }
 0x18c   : > { %2204 = vmatmul.bf16.gmra.mxu3 %v3686_v17 }
 0x18e   : > { %v1978_v6 = vpop.f32.mrf.mxu0  ;;  %v1800_v0 = vpop.f32.mrf.mxu2 }
 0x18f   : > { %v1801_v55 = vadd.f32 %v1800_v0, %v1712_v24  ;;  %v1889_v34 = vpop.f32.mrf.mxu3 }
 0x190   : > { %v1713_v41 = vpop.f32.mrf.mxu1 }
 0x191   : > { %2293 = vmatmul.bf16.gmra.mxu0 %v3698_v48  ;;  %v1890_v1 = vadd.f32 %v1889_v34, %v1801_v55  ;;  %v1714_v51 = vadd.f32 %v1713_v41, %v3807_v31 }
 0x193   : > { %v4095_v39 = vadd.f32 %v1978_v6, %v1890_v1  ;;  %v4314_v1 = vld [vmem:[#allocation5_spill] sm:$0xff] }
 0x196   : > { %v1980_v15 = vpop.f32.mrf.mxu0  ;;  %v1802_v36 = vpop.f32.mrf.mxu2 }
 0x197   : > { %v1803_v16 = vadd.f32 %v1802_v36, %v1714_v51  ;;  %v1891_v10 = vpop.f32.mrf.mxu3  ;;  %v4316_v36 = vld [vmem:[#allocation9_spill] sm:$0xff] }
 0x198   : > { %v1716_v60 = vpop.f32.mrf.mxu1 }
 0x199   : > { %v1892_v17 = vadd.f32 %v1891_v10, %v1803_v16  ;;  %v1717_v23 = vadd.f32 %v1716_v60, %v4311_v46  ;;  %v4317_v46 = vld [vmem:[#allocation15_spill] sm:$0xff] }
 0x19b   : > { %2031 = vmatmul.bf16.gmra.mxu1 %v3698_v48  ;;  %2120 = vmatmul.bf16.gmra.mxu2 %v4309_v7  ;;  %v4100_v35 = vadd.f32 %v1980_v15, %v1892_v17  ;;  %v4315_v15 = vld [vmem:[#allocation12_spill] sm:$0xff] }
 0x19c   : > { %2209 = vmatmul.bf16.gmra.mxu3 %v4310_v2 }
 0x19e   : > { %v1983_v53 = vpop.f32.mrf.mxu0  ;;  %v1805_v19 = vpop.f32.mrf.mxu2 }
 0x19f   : > { %v1806_v49 = vadd.f32 %v1805_v19, %v1717_v23  ;;  %v1894_v31 = vpop.f32.mrf.mxu3  ;;  %v4318_v19 = vld [vmem:[#allocation10_spill] sm:$0xff] }
 0x1a0   : > { %v1718_v30 = vpop.f32.mrf.mxu1 }
 0x1a1   : > { %2298 = vmatmul.bf16.gmra.mxu0 %v4312_v43  ;;  %v1895_v28 = vadd.f32 %v1894_v31, %v1806_v49  ;;  %v1719_v48 = vadd.f32 %v1718_v30, %v4313_v29 }
 0x1a3   : > { %v4105_v42 = vadd.f32 %v1983_v53, %v1895_v28 }
 0x1a6   : > { %v1985_v24 = vpop.f32.mrf.mxu0  ;;  %v1807_v6 = vpop.f32.mrf.mxu2 }
 0x1a7   : > { %v1808_v0 = vadd.f32 %v1807_v6, %v1719_v48  ;;  %v1896_v55 = vpop.f32.mrf.mxu3 }
 0x1a8   : > { %v1721_v34 = vpop.f32.mrf.mxu1 }
 0x1a9   : > { %v1897_v41 = vadd.f32 %v1896_v55, %v1808_v0  ;;  %v1722_v16 = vadd.f32 %v1721_v34, %v4316_v36  ;;  %v4320_v0 = vld [vmem:[#allocation16_spill] sm:$0xff]  ;;  %v4321_v55 = vld [vmem:[#allocation13_spill] sm:$0xff] }
 0x1ab   : > { %2036 = vmatmul.bf16.gmra.mxu1 %v4312_v43  ;;  %2125 = vmatmul.bf16.gmra.mxu2 %v4314_v1  ;;  %v4110_v51 = vadd.f32 %v1985_v24, %v1897_v41  ;;  %v4319_v24 = vld [vmem:[#allocation6_spill] sm:$0xff] }
 0x1ac   : > { %2214 = vmatmul.bf16.gmra.mxu3 %v4315_v15 }
 0x1ae   : > { %v1988_v10 = vpop.f32.mrf.mxu0  ;;  %v1810_v60 = vpop.f32.mrf.mxu2 }
 0x1af   : > { %v1811_v17 = vadd.f32 %v1810_v60, %v1722_v16  ;;  %v1899_v7 = vpop.f32.mrf.mxu3 }
 0x1b0   : > { %v1723_v2 = vpop.f32.mrf.mxu1 }
 0x1b1   : > { %2303 = vmatmul.bf16.gmra.mxu0 %v4317_v46  ;;  %v1900_v23 = vadd.f32 %v1899_v7, %v1811_v17  ;;  %v1724_v49 = vadd.f32 %v1723_v2, %v4318_v19  ;;  %v4323_v7 = vld [vmem:[#allocation14_spill] sm:$0xff] }
 0x1b3   : > { %v4115_v53 = vadd.f32 %v1988_v10, %v1900_v23  ;;  %v4322_v10 = vld [vmem:[#allocation19_spill] sm:$0xff] }
 0x1b6   : > { %v1990_v31 = vpop.f32.mrf.mxu0  ;;  %v1812_v30 = vpop.f32.mrf.mxu2 }
 0x1b7   : > { %v1813_v43 = vadd.f32 %v1812_v30, %v1724_v49  ;;  %v1901_v28 = vpop.f32.mrf.mxu3 }
 0x1b8   : > { %v1726_v29 = vpop.f32.mrf.mxu1 }
 0x1b9   : > { %v1902_v48 = vadd.f32 %v1901_v28, %v1813_v43  ;;  %v1727_v34 = vadd.f32 %v1726_v29, %v4321_v55  ;;  %v4324_v43 = vld [vmem:[#allocation2_spill] sm:$0xff]  ;;  %v4325_v29 = vld [vmem:[#allocation20_spill] sm:$0xff] }
 0x1bb   : > { %2041 = vmatmul.bf16.gmra.mxu1 %v4317_v46  ;;  %2130 = vmatmul.bf16.gmra.mxu2 %v4319_v24  ;;  %v4120_v6 = vadd.f32 %v1990_v31, %v1902_v48  ;;  %v4326_v48 = vld [vmem:[#allocation17_spill] sm:$0xff] }
 0x1bc   : > { %2219 = vmatmul.bf16.gmra.mxu3 %v4320_v0 }
 0x1be   : > { %v1993_v41 = vpop.f32.mrf.mxu0  ;;  %v1815_v1 = vpop.f32.mrf.mxu2 }
 0x1bf   : > { %v1816_v15 = vadd.f32 %v1815_v1, %v1727_v34  ;;  %v1904_v36 = vpop.f32.mrf.mxu3 }
 0x1c0   : > { %v1728_v16 = vpop.f32.mrf.mxu1 }
 0x1c1   : > { %2308 = vmatmul.bf16.gmra.mxu0 %v4322_v10  ;;  %v1905_v60 = vadd.f32 %v1904_v36, %v1816_v15  ;;  %v1729_v2 = vadd.f32 %v1728_v16, %v4323_v7  ;;  %v4327_v15 = vld [vmem:[#allocation25_spill] sm:$0xff] }
 0x1c3   : > { %v4125_v17 = vadd.f32 %v1993_v41, %v1905_v60  ;;  %v4328_v60 = vld [vmem:[#allocation18_spill] sm:$0xff] }
 0x1c6   : > { %v1995_v46 = vpop.f32.mrf.mxu0  ;;  %v1817_v23 = vpop.f32.mrf.mxu2 }
 0x1c7   : > { %v1818_v19 = vadd.f32 %v1817_v23, %v1729_v2  ;;  %v1906_v49 = vpop.f32.mrf.mxu3 }
 0x1c8   : > { %v1731_v31 = vpop.f32.mrf.mxu1 }
 0x1c9   : > { %v1907_v30 = vadd.f32 %v1906_v49, %v1818_v19  ;;  %v1732_v24 = vadd.f32 %v1731_v31, %v4326_v48 }
 0x1cb   : > { %2046 = vmatmul.bf16.gmra.mxu1 %v4322_v10  ;;  %2135 = vmatmul.bf16.gmra.mxu2 %v4324_v43  ;;  %v4130_v28 = vadd.f32 %v1995_v46, %v1907_v30  ;;  %v4329_v30 = vld [vmem:[#allocation22_spill] sm:$0xff] }
 0x1cc   : > { %2224 = vmatmul.bf16.gmra.mxu3 %v4325_v29 }
 0x1ce   : > { %v1998_v0 = vpop.f32.mrf.mxu0  ;;  %v1820_v55 = vpop.f32.mrf.mxu2 }
 0x1cf   : > { %v1821_v34 = vadd.f32 %v1820_v55, %v1732_v24  ;;  %v1909_v41 = vpop.f32.mrf.mxu3 }
 0x1d0   : > { %v1733_v1 = vpop.f32.mrf.mxu1 }
 0x1d1   : > { %2313 = vmatmul.bf16.gmra.mxu0 %v4327_v15  ;;  %v1910_v36 = vadd.f32 %v1909_v41, %v1821_v34  ;;  %v1734_v10 = vadd.f32 %v1733_v1, %v4328_v60  ;;  %v4330_v1 = vld [vmem:[#allocation24_spill] sm:$0xff] }
 0x1d3   : > { %v4135_v16 = vadd.f32 %v1998_v0, %v1910_v36 }
 0x1d6   : > { %v2000_v7 = vpop.f32.mrf.mxu0  ;;  %v1822_v2 = vpop.f32.mrf.mxu2 }
 0x1d7   : > { %v1823_v46 = vadd.f32 %v1822_v2, %v1734_v10  ;;  %v1911_v23 = vpop.f32.mrf.mxu3 }
 0x1d8   : > { %v1736_v19 = vpop.f32.mrf.mxu1 }
 0x1d9   : > { %v1912_v49 = vadd.f32 %v1911_v23, %v1823_v46  ;;  %v1737_v43 = vadd.f32 %v1736_v19, %v4329_v30 }
 0x1db   : > { %2051 = vmatmul.bf16.gmra.mxu1 %v4327_v15  ;;  %2140 = vmatmul.bf16.gmra.mxu2 %v3416_v37  ;;  %v4140_v31 = vadd.f32 %v2000_v7, %v1912_v49 }
 0x1dc   : > { %2229 = vmatmul.bf16.gmra.mxu3 %v3855_v54 }
 0x1de   : > { %v2003_v29 = vpop.f32.mrf.mxu0  ;;  %v1825_v48 = vpop.f32.mrf.mxu2 }
 0x1df   : > { %v1826_v24 = vadd.f32 %v1825_v48, %v1737_v43  ;;  %v1914_v0 = vpop.f32.mrf.mxu3  ;;  %v4331_v48 = vld [vmem:[#allocation26_spill] sm:$0xff] }
 0x1e0   : > { %v1738_v55 = vpop.f32.mrf.mxu1 }
 0x1e1   : > { %2318 = vmatmul.bf16.gmra.mxu0 %v3880_v40  ;;  %v1915_v34 = vadd.f32 %v1914_v0, %v1826_v24  ;;  %v1739_v15 = vadd.f32 %v1738_v55, %v4330_v1 }
 0x1e3   : > { %v4145_v41 = vadd.f32 %v2003_v29, %v1915_v34 }
 0x1e6   : > { %v2005_v36 = vpop.f32.mrf.mxu0  ;;  %v1827_v37 = vpop.f32.mrf.mxu2 }
 0x1e7   : > { %v1828_v60 = vadd.f32 %v1827_v37, %v1739_v15  ;;  %v1916_v10 = vpop.f32.mrf.mxu3 }
 0x1e8   : > { %v2017_v7 = vpop.f32.mrf.mxu1 }
 0x1e9   : > { %v1917_v54 = vadd.f32 %v1916_v10, %v1828_v60  ;;  %v2018_v46 = vadd.f32 %v2017_v7, %v3872_v14 }
 0x1eb   : > { %2056 = vmatmul.bf16.gmra.mxu1 %v3880_v40  ;;  %2145 = vmatmul.bf16.gmra.mxu2 %v3523_v32  ;;  %v4150_v2 = vadd.f32 %v2005_v36, %v1917_v54 }
 0x1ec   : > { %2234 = vmatmul.bf16.gmra.mxu3 %v3889_v21 }
 0x1ee   : > { %v2284_v23 = vpop.f32.mrf.mxu0  ;;  %v2106_v19 = vpop.f32.mrf.mxu2 }
 0x1ef   : > { %v2195_v49 = vpop.f32.mrf.mxu3  ;;  %v2107_v30 = vadd.f32 %v2106_v19, %v2018_v46 }
 0x1f0   : > { %v2019_v43 = vpop.f32.mrf.mxu1 }
 0x1f1   : > { %2323 = vmatmul.bf16.gmra.mxu0 %v3902_v59  ;;  %v2196_v29 = vadd.f32 %v2195_v49, %v2107_v30  ;;  %v2020_v24 = vadd.f32 %v2019_v43, %v4331_v48 }
 0x1f3   : > { %v2285_v34 = vadd.f32 %v2284_v23, %v2196_v29  ;;  %v4332_v29 = vld [vmem:[#allocation27_spill] sm:$0xff] }
 0x1f5   : > { %v2465_v14 = vmul.f32 %v2285_v34, %v2285_v34 }
 0x1f6   : > { %v2286_v40 = vpop.f32.mrf.mxu0  ;;  %v2108_v0 = vpop.f32.mrf.mxu2 }
 0x1f7   : > { %v2109_v32 = vadd.f32 %v2108_v0, %v2020_v24  ;;  %v2197_v55 = vpop.f32.mrf.mxu3 }
 0x1f8   : > { %v2022_v1 = vpop.f32.mrf.mxu1 }
 0x1f9   : > { %v2198_v21 = vadd.f32 %v2197_v55, %v2109_v32  ;;  %v2023_v10 = vadd.f32 %v2022_v1, %v3897_v50 }
 0x1fb   : > { %v2287_v15 = vadd.f32 %v2286_v40, %v2198_v21  ;;  %2061 = vmatmul.bf16.gmra.mxu1 %v3902_v59  ;;  %2150 = vmatmul.bf16.gmra.mxu2 %v3593_v18 }
 0x1fc   : > { %2239 = vmatmul.bf16.gmra.mxu3 %v3911_v33 }
 0x1fd   : > { %v3063_v36 = vpack.c.bf16 %v2287_v15, %v2285_v34  ;;  %v2428_v37 = vadd.f32 %v2287_v15, %v2285_v34  ;;  %v2466_v60 = vmul.f32 %v2287_v15, %v2287_v15 }
 0x1fe   : > { %v2289_v7 = vpop.f32.mrf.mxu0  ;;  %v2111_v54 = vpop.f32.mrf.mxu2 }
 0x1ff   : > { %3064 = vst [vmem:[%s4163_s28] sm:$0xff] %v3063_v36   ;;  %v2497_v59 = vadd.f32 %v2466_v60, %v2465_v14  ;;  %v2112_v18 = vadd.f32 %v2111_v54, %v2023_v10  ;;  %v2200_v46 = vpop.f32.mrf.mxu3  ;;  %v4333_v14 = vld [vmem:[#allocation28_spill] sm:$0xff] }
 0x200   : > { %v2024_v23 = vpop.f32.mrf.mxu1 }
 0x201   : > { %2328 = vmatmul.bf16.gmra.mxu0 %v3936_v3  ;;  %v2201_v19 = vadd.f32 %v2200_v46, %v2112_v18  ;;  %v2025_v33 = vadd.f32 %v2024_v23, %v4332_v29  ;;  %v4334_v18 = vld [vmem:[#allocation31_spill] sm:$0xff] }
 0x203   : > { %v2290_v49 = vadd.f32 %v2289_v7, %v2201_v19  ;;  %v4335_v19 = vld [vmem:[#allocation29_spill] sm:$0xff] }
 0x205   : > { %v2429_v30 = vadd.f32 %v2428_v37, %v2290_v49  ;;  %v2467_v43 = vmul.f32 %v2290_v49, %v2290_v49 }
 0x206   : > { %v2291_v48 = vpop.f32.mrf.mxu0  ;;  %v2113_v24 = vpop.f32.mrf.mxu2 }
 0x207   : > { %v2498_v40 = vadd.f32 %v2497_v59, %v2467_v43  ;;  %v2114_v50 = vadd.f32 %v2113_v24, %v2025_v33  ;;  %v2202_v0 = vpop.f32.mrf.mxu3 }
 0x208   : > { %v2027_v32 = vpop.f32.mrf.mxu1 }
 0x209   : > { %v2203_v55 = vadd.f32 %v2202_v0, %v2114_v50  ;;  %v2028_v36 = vadd.f32 %v2027_v32, %v4333_v14  ;;  %v4336_v50 = vld [vmem:[#allocation4_spill] sm:$0xff] }
 0x20b   : > { %v2292_v34 = vadd.f32 %v2291_v48, %v2203_v55  ;;  %2066 = vmatmul.bf16.gmra.mxu1 %v3936_v3  ;;  %2155 = vmatmul.bf16.gmra.mxu2 %v3363_v44 }
 0x20c   : > { %2244 = vmatmul.bf16.gmra.mxu3 %v3945_v56 }
 0x20d   : > { %v3068_v1 = vpack.c.bf16 %v2292_v34, %v2290_v49  ;;  %v2430_v21 = vadd.f32 %v2429_v30, %v2292_v34  ;;  %v2468_v15 = vmul.f32 %v2292_v34, %v2292_v34  ;;  %v4337_v34 = vld [vmem:[#allocation30_spill] sm:$0xff] }
 0x20e   : > { %v2294_v37 = vpop.f32.mrf.mxu0  ;;  %v2116_v60 = vpop.f32.mrf.mxu2 }
 0x20f   : > { %3155 = vst [vmem:[%s4163_s28 + $0x8] sm:$0xff] %v3068_v1   ;;  %v2499_v10 = vadd.f32 %v2498_v40, %v2468_v15  ;;  %v2117_v7 = vadd.f32 %v2116_v60, %v2028_v36  ;;  %v2205_v54 = vpop.f32.mrf.mxu3 }
 0x210   : > { %v2029_v59 = vpop.f32.mrf.mxu1 }
 0x211   : > { %2333 = vmatmul.bf16.gmra.mxu0 %v4334_v18  ;;  %v2206_v46 = vadd.f32 %v2205_v54, %v2117_v7  ;;  %v2030_v56 = vadd.f32 %v2029_v59, %v4335_v19 }
 0x213   : > { %v2295_v3 = vadd.f32 %v2294_v37, %v2206_v46 }
 0x215   : > { %v2431_v23 = vadd.f32 %v2430_v21, %v2295_v3  ;;  %v2469_v44 = vmul.f32 %v2295_v3, %v2295_v3 }
 0x216   : > { %v2296_v49 = vpop.f32.mrf.mxu0  ;;  %v2118_v30 = vpop.f32.mrf.mxu2 }
 0x217   : > { %v2500_v43 = vadd.f32 %v2499_v10, %v2469_v44  ;;  %v2119_v29 = vadd.f32 %v2118_v30, %v2030_v56  ;;  %v2207_v33 = vpop.f32.mrf.mxu3 }
 0x218   : > { %v2032_v48 = vpop.f32.mrf.mxu1 }
 0x219   : > { %v2208_v24 = vadd.f32 %v2207_v33, %v2119_v29  ;;  %v2033_v1 = vadd.f32 %v2032_v48, %v4337_v34  ;;  %v4339_v48 = vld [vmem:[#allocation33_spill] sm:$0xff] }
 0x21b   : > { %v2297_v40 = vadd.f32 %v2296_v49, %v2208_v24  ;;  %2071 = vmatmul.bf16.gmra.mxu1 %v4334_v18  ;;  %2160 = vmatmul.bf16.gmra.mxu2 %v4336_v50  ;;  %v4338_v18 = vld [vmem:[#allocation32_spill] sm:$0xff] }
 0x21c   : > { %2249 = vmatmul.bf16.gmra.mxu3 %v3974_v45 }
 0x21d   : > { %v3073_v0 = vpack.c.bf16 %v2297_v40, %v2295_v3  ;;  %v2432_v32 = vadd.f32 %v2431_v23, %v2297_v40  ;;  %v2470_v55 = vmul.f32 %v2297_v40, %v2297_v40 }
 0x21e   : > { %v2299_v21 = vpop.f32.mrf.mxu0  ;;  %v2121_v15 = vpop.f32.mrf.mxu2 }
 0x21f   : > { %3156 = vst [vmem:[%s4163_s28 + $0x10] sm:$0xff] %v3073_v0   ;;  %v2501_v14 = vadd.f32 %v2500_v43, %v2470_v55  ;;  %v2122_v36 = vadd.f32 %v2121_v15, %v2033_v1  ;;  %v2210_v37 = vpop.f32.mrf.mxu3 }
 0x220   : > { %v2034_v60 = vpop.f32.mrf.mxu1 }
 0x221   : > { %2338 = vmatmul.bf16.gmra.mxu0 %v4003_v52  ;;  %v2211_v10 = vadd.f32 %v2210_v37, %v2122_v36  ;;  %v2035_v45 = vadd.f32 %v2034_v60, %v4338_v18 }
 0x223   : > { %v2300_v7 = vadd.f32 %v2299_v21, %v2211_v10 }
 0x225   : > { %v2433_v54 = vadd.f32 %v2432_v32, %v2300_v7  ;;  %v2471_v59 = vmul.f32 %v2300_v7, %v2300_v7 }
 0x226   : > { %v2301_v46 = vpop.f32.mrf.mxu0  ;;  %v2123_v3 = vpop.f32.mrf.mxu2 }
 0x227   : > { %v2502_v23 = vadd.f32 %v2501_v14, %v2471_v59  ;;  %v2124_v44 = vadd.f32 %v2123_v3, %v2035_v45  ;;  %v2212_v19 = vpop.f32.mrf.mxu3 }
 0x228   : > { %v2037_v56 = vpop.f32.mrf.mxu1 }
 0x229   : > { %v2213_v49 = vadd.f32 %v2212_v19, %v2124_v44  ;;  %v2038_v24 = vadd.f32 %v2037_v56, %v4339_v48 }
 0x22b   : > { %v2302_v30 = vadd.f32 %v2301_v46, %v2213_v49  ;;  %2076 = vmatmul.bf16.gmra.mxu1 %v4003_v52  ;;  %2165 = vmatmul.bf16.gmra.mxu2 %v3547_v11  ;;  %v4340_v46 = vld [vmem:[#allocation34_spill] sm:$0xff] }
 0x22c   : > { %2254 = vmatmul.bf16.gmra.mxu3 %v4012_v9 }
 0x22d   : > { %v3078_v43 = vpack.c.bf16 %v2302_v30, %v2300_v7  ;;  %v2434_v29 = vadd.f32 %v2433_v54, %v2302_v30  ;;  %v2472_v33 = vmul.f32 %v2302_v30, %v2302_v30 }
 0x22e   : > { %v2304_v40 = vpop.f32.mrf.mxu0  ;;  %v2126_v50 = vpop.f32.mrf.mxu2 }
 0x22f   : > { %3157 = vst [vmem:[%s4163_s28 + $0x18] sm:$0xff] %v3078_v43   ;;  %v2503_v0 = vadd.f32 %v2502_v23, %v2472_v33  ;;  %v2127_v32 = vadd.f32 %v2126_v50, %v2038_v24  ;;  %v2215_v55 = vpop.f32.mrf.mxu3 }
 0x230   : > { %v2039_v34 = vpop.f32.mrf.mxu1 }
 0x231   : > { %2343 = vmatmul.bf16.gmra.mxu0 %v4025_v8  ;;  %v2216_v1 = vadd.f32 %v2215_v55, %v2127_v32  ;;  %v2040_v9 = vadd.f32 %v2039_v34, %v4007_v20  ;;  %v983_v32 = vrot.slane %v4038_v4, 1  ;;  %v984_v55 = vrot.slane %v4044_v47, 1 }
 0x233   : > { %v2305_v52 = vadd.f32 %v2304_v40, %v2216_v1 }
 0x235   : > { %v2435_v21 = vadd.f32 %v2434_v29, %v2305_v52  ;;  %v2473_v11 = vmul.f32 %v2305_v52, %v2305_v52 }
 0x236   : > { %v2306_v15 = vpop.f32.mrf.mxu0  ;;  %v2128_v14 = vpop.f32.mrf.mxu2 }
 0x237   : > { %v2504_v36 = vadd.f32 %v2503_v0, %v2473_v11  ;;  %v2129_v37 = vadd.f32 %v2128_v14, %v2040_v9  ;;  %v2217_v60 = vpop.f32.mrf.mxu3  ;;  %v985_v9 = vsel %vm904_vm4, %v983_v32, %v984_v55 }
 0x238   : > { %v2042_v10 = vpop.f32.mrf.mxu1 }
 0x239   : > { %v2218_v7 = vadd.f32 %v2217_v60, %v2129_v37  ;;  %v2043_v20 = vadd.f32 %v2042_v10, %v4340_v46 }
 0x23b   : > { %v2307_v54 = vadd.f32 %v2306_v15, %v2218_v7  ;;  %2081 = vmatmul.bf16.gmra.mxu1 %v4025_v8  ;;  %2170 = vmatmul.bf16.gmra.mxu2 %v3597_v25 }
 0x23c   : > { %2259 = vmatmul.bf16.gmra.mxu3 %v4034_v57 }
 0x23d   : > { %v3083_v59 = vpack.c.bf16 %v2307_v54, %v2305_v52  ;;  %v2436_v18 = vadd.f32 %v2435_v21, %v2307_v54  ;;  %v2474_v45 = vmul.f32 %v2307_v54, %v2307_v54 }
 0x23e   : > { %v2309_v3 = vpop.f32.mrf.mxu0  ;;  %v2131_v23 = vpop.f32.mrf.mxu2 }
 0x23f   : > { %3158 = vst [vmem:[%s4163_s28 + $0x20] sm:$0xff] %v3083_v59   ;;  %v2505_v44 = vadd.f32 %v2504_v36, %v2474_v45  ;;  %v2132_v19 = vadd.f32 %v2131_v23, %v2043_v20  ;;  %v2220_v56 = vpop.f32.mrf.mxu3  ;;  %v4342_v23 = vld [vmem:[#allocation7_spill] sm:$0xff] }
 0x240   : > { %v2044_v49 = vpop.f32.mrf.mxu1 }
 0x241   : > { %2348 = vmatmul.bf16.gmra.mxu0 %v4053_v22  ;;  %v2221_v30 = vadd.f32 %v2220_v56, %v2132_v19  ;;  %v2045_v57 = vadd.f32 %v2044_v49, %v4029_v58 }
 0x243   : > { %v2310_v8 = vadd.f32 %v2309_v3, %v2221_v30  ;;  %v4341_v3 = vmov 0  }
 0x245   : > { %v2437_v43 = vadd.f32 %v2436_v18, %v2310_v8  ;;  %v2475_v25 = vmul.f32 %v2310_v8, %v2310_v8 }
 0x246   : > { %v2311_v29 = vpop.f32.mrf.mxu0  ;;  %v2133_v33 = vpop.f32.mrf.mxu2 }
 0x247   : > { %v2506_v48 = vadd.f32 %v2505_v44, %v2475_v25  ;;  %v2134_v24 = vadd.f32 %v2133_v33, %v2045_v57  ;;  %v2222_v40 = vpop.f32.mrf.mxu3 }
 0x248   : > { %v2047_v50 = vpop.f32.mrf.mxu1 }
 0x249   : > { %v2223_v0 = vadd.f32 %v2222_v40, %v2134_v24  ;;  %v2048_v21 = vadd.f32 %v2047_v50, %v4046_v61 }
 0x24b   : > { %v2312_v34 = vadd.f32 %v2311_v29, %v2223_v0  ;;  %2086 = vmatmul.bf16.gmra.mxu1 %v4053_v22  ;;  %2175 = vmatmul.bf16.gmra.mxu2 %v4038_v4 }
 0x24c   : > { %2264 = vmatmul.bf16.gmra.mxu3 %v4062_v63 }
 0x24d   : > { %v3088_v58 = vpack.c.bf16 %v2312_v34, %v2310_v8  ;;  %v2438_v1 = vadd.f32 %v2437_v43, %v2312_v34  ;;  %v2476_v52 = vmul.f32 %v2312_v34, %v2312_v34 }
 0x24e   : > { %v2314_v11 = vpop.f32.mrf.mxu0  ;;  %v2136_v15 = vpop.f32.mrf.mxu2 }
 0x24f   : > { %3159 = vst [vmem:[%s4163_s28 + $0x28] sm:$0xff] %v3088_v58   ;;  %v2507_v14 = vadd.f32 %v2506_v48, %v2476_v52  ;;  %v2137_v36 = vadd.f32 %v2136_v15, %v2048_v21  ;;  %v2225_v47 = vpop.f32.mrf.mxu3 }
 0x250   : > { %v2049_v37 = vpop.f32.mrf.mxu1 }
 0x251   : > { %2353 = vmatmul.bf16.gmra.mxu0 %v985_v9  ;;  %v2226_v22 = vadd.f32 %v2225_v47, %v2137_v36  ;;  %v2050_v63 = vadd.f32 %v2049_v37, %v4057_v38 }
 0x253   : > { %v2315_v60 = vadd.f32 %v2314_v11, %v2226_v22 }
 0x255   : > { %v2439_v4 = vadd.f32 %v2438_v1, %v2315_v60  ;;  %v2477_v10 = vmul.f32 %v2315_v60, %v2315_v60 }
 0x256   : > { %v2316_v7 = vpop.f32.mrf.mxu0  ;;  %v2138_v54 = vpop.f32.mrf.mxu2 }
 0x257   : > { %v2508_v61 = vadd.f32 %v2507_v14, %v2477_v10  ;;  %v2139_v59 = vadd.f32 %v2138_v54, %v2050_v63  ;;  %v2227_v18 = vpop.f32.mrf.mxu3 }
 0x258   : > { %v2052_v45 = vpop.f32.mrf.mxu1 }
 0x259   : > { %v2228_v46 = vadd.f32 %v2227_v18, %v2139_v59  ;;  %v2053_v49 = vadd.f32 %v2052_v45, %v4065_v5 }
 0x25b   : > { %v2317_v20 = vadd.f32 %v2316_v7, %v2228_v46  ;;  %2091 = vmatmul.bf16.gmra.mxu1 %v985_v9  ;;  %2180 = vmatmul.bf16.gmra.mxu2 %v4341_v3 }
 0x25c   : > { %2269 = vmatmul.bf16.gmra.mxu3 %v4342_v23 }
 0x25d   : > { %v3093_v44 = vpack.c.bf16 %v2317_v20, %v2315_v60  ;;  %v2440_v19 = vadd.f32 %v2439_v4, %v2317_v20  ;;  %v2478_v56 = vmul.f32 %v2317_v20, %v2317_v20 }
 0x25e   : > { %v2319_v38 = vpop.f32.mrf.mxu0  ;;  %v2141_v30 = vpop.f32.mrf.mxu2 }
 0x25f   : > { %3160 = vst [vmem:[%s4163_s28 + $0x30] sm:$0xff] %v3093_v44   ;;  %v2509_v8 = vadd.f32 %v2508_v61, %v2478_v56  ;;  %v2142_v43 = vadd.f32 %v2141_v30, %v2053_v49  ;;  %v2230_v25 = vpop.f32.mrf.mxu3 }
 0x260   : > { %v2054_v57 = vpop.f32.mrf.mxu1 }
 0x261   : > { %2358 = vmatmul.bf16.gmra.mxu0 %v4342_v23  ;;  %v2231_v29 = vadd.f32 %v2230_v25, %v2142_v43  ;;  %v2055_v40 = vadd.f32 %v2054_v57, %v4070_v12 }
 0x263   : > { %v2320_v33 = vadd.f32 %v2319_v38, %v2231_v29 }
 0x265   : > { %v2441_v48 = vadd.f32 %v2440_v19, %v2320_v33  ;;  %v2479_v24 = vmul.f32 %v2320_v33, %v2320_v33 }
 0x266   : > { %v2321_v50 = vpop.f32.mrf.mxu0  ;;  %v2143_v0 = vpop.f32.mrf.mxu2 }
 0x267   : > { %v2510_v32 = vadd.f32 %v2509_v8, %v2479_v24  ;;  %v2144_v5 = vadd.f32 %v2143_v0, %v2055_v40  ;;  %v2232_v55 = vpop.f32.mrf.mxu3 }
 0x268   : > { %v2057_v34 = vpop.f32.mrf.mxu1 }
 0x269   : > { %v2233_v58 = vadd.f32 %v2232_v55, %v2144_v5  ;;  %v2058_v9 = vadd.f32 %v2057_v34, %v4075_v26 }
 0x26b   : > { %v2322_v1 = vadd.f32 %v2321_v50, %v2233_v58 }
 0x26d   : > { %v3098_v52 = vpack.c.bf16 %v2322_v1, %v2320_v33  ;;  %v2442_v21 = vadd.f32 %v2441_v48, %v2322_v1  ;;  %v2480_v11 = vmul.f32 %v2322_v1, %v2322_v1 }
 0x26e   : > { %v2324_v15 = vpop.f32.mrf.mxu0  ;;  %v2146_v14 = vpop.f32.mrf.mxu2 }
 0x26f   : > { %3161 = vst [vmem:[%s4163_s28 + $0x38] sm:$0xff] %v3098_v52   ;;  %v2511_v36 = vadd.f32 %v2510_v32, %v2480_v11  ;;  %v2147_v47 = vadd.f32 %v2146_v14, %v2058_v9  ;;  %v2235_v37 = vpop.f32.mrf.mxu3 }
 0x270   : > { %v2059_v12 = vpop.f32.mrf.mxu1 }
 0x271   : > { %v2236_v22 = vadd.f32 %v2235_v37, %v2147_v47  ;;  %v2060_v63 = vadd.f32 %v2059_v12, %v4080_v13 }
 0x273   : > { %v2325_v60 = vadd.f32 %v2324_v15, %v2236_v22 }
 0x275   : > { %v2443_v4 = vadd.f32 %v2442_v21, %v2325_v60  ;;  %v2481_v10 = vmul.f32 %v2325_v60, %v2325_v60 }
 0x276   : > { %v2326_v7 = vpop.f32.mrf.mxu0  ;;  %v2148_v54 = vpop.f32.mrf.mxu2 }
 0x277   : > { %v2512_v61 = vadd.f32 %v2511_v36, %v2481_v10  ;;  %v2149_v59 = vadd.f32 %v2148_v54, %v2060_v63  ;;  %v2237_v18 = vpop.f32.mrf.mxu3 }
 0x278   : > { %v2062_v26 = vpop.f32.mrf.mxu1 }
 0x279   : > { %v2238_v45 = vadd.f32 %v2237_v18, %v2149_v59  ;;  %v2063_v44 = vadd.f32 %v2062_v26, %v4085_v27 }
 0x27b   : > { %v2327_v46 = vadd.f32 %v2326_v7, %v2238_v45 }
 0x27d   : > { %v3103_v20 = vpack.c.bf16 %v2327_v46, %v2325_v60  ;;  %v2444_v3 = vadd.f32 %v2443_v4, %v2327_v46  ;;  %v2482_v23 = vmul.f32 %v2327_v46, %v2327_v46 }
 0x27e   : > { %v2329_v19 = vpop.f32.mrf.mxu0  ;;  %v2151_v56 = vpop.f32.mrf.mxu2 }
 0x27f   : > { %3162 = vst [vmem:[%s4163_s28 + $0x40] sm:$0xff] %v3103_v20   ;;  %v2513_v49 = vadd.f32 %v2512_v61, %v2482_v23  ;;  %v2152_v38 = vadd.f32 %v2151_v56, %v2063_v44  ;;  %v2240_v30 = vpop.f32.mrf.mxu3 }
 0x280   : > { %v2064_v13 = vpop.f32.mrf.mxu1 }
 0x281   : > { %v2241_v8 = vadd.f32 %v2240_v30, %v2152_v38  ;;  %v2065_v29 = vadd.f32 %v2064_v13, %v4090_v62 }
 0x283   : > { %v2330_v43 = vadd.f32 %v2329_v19, %v2241_v8 }
 0x285   : > { %v2445_v25 = vadd.f32 %v2444_v3, %v2330_v43  ;;  %v2483_v57 = vmul.f32 %v2330_v43, %v2330_v43 }
 0x286   : > { %v2331_v33 = vpop.f32.mrf.mxu0  ;;  %v2153_v48 = vpop.f32.mrf.mxu2 }
 0x287   : > { %v2514_v24 = vadd.f32 %v2513_v49, %v2483_v57  ;;  %v2154_v40 = vadd.f32 %v2153_v48, %v2065_v29  ;;  %v2242_v50 = vpop.f32.mrf.mxu3 }
 0x288   : > { %v2067_v27 = vpop.f32.mrf.mxu1 }
 0x289   : > { %v2243_v0 = vadd.f32 %v2242_v50, %v2154_v40  ;;  %v2068_v58 = vadd.f32 %v2067_v27, %v4095_v39 }
 0x28b   : > { %v2332_v32 = vadd.f32 %v2331_v33, %v2243_v0 }
 0x28d   : > { %v3108_v5 = vpack.c.bf16 %v2332_v32, %v2330_v43  ;;  %v2446_v55 = vadd.f32 %v2445_v25, %v2332_v32  ;;  %v2484_v34 = vmul.f32 %v2332_v32, %v2332_v32 }
 0x28e   : > { %v2334_v1 = vpop.f32.mrf.mxu0  ;;  %v2156_v52 = vpop.f32.mrf.mxu2 }
 0x28f   : > { %3163 = vst [vmem:[%s4163_s28 + $0x48] sm:$0xff] %v3108_v5   ;;  %v2515_v21 = vadd.f32 %v2514_v24, %v2484_v34  ;;  %v2157_v11 = vadd.f32 %v2156_v52, %v2068_v58  ;;  %v2245_v9 = vpop.f32.mrf.mxu3 }
 0x290   : > { %v2069_v62 = vpop.f32.mrf.mxu1 }
 0x291   : > { %v2246_v15 = vadd.f32 %v2245_v9, %v2157_v11  ;;  %v2070_v37 = vadd.f32 %v2069_v62, %v4100_v35 }
 0x293   : > { %v2335_v14 = vadd.f32 %v2334_v1, %v2246_v15 }
 0x295   : > { %v2447_v36 = vadd.f32 %v2446_v55, %v2335_v14  ;;  %v2485_v47 = vmul.f32 %v2335_v14, %v2335_v14 }
 0x296   : > { %v2336_v12 = vpop.f32.mrf.mxu0  ;;  %v2158_v22 = vpop.f32.mrf.mxu2 }
 0x297   : > { %v2516_v60 = vadd.f32 %v2515_v21, %v2485_v47  ;;  %v2159_v4 = vadd.f32 %v2158_v22, %v2070_v37  ;;  %v2247_v10 = vpop.f32.mrf.mxu3 }
 0x298   : > { %v2072_v39 = vpop.f32.mrf.mxu1 }
 0x299   : > { %v2248_v63 = vadd.f32 %v2247_v10, %v2159_v4  ;;  %v2073_v18 = vadd.f32 %v2072_v39, %v4105_v42 }
 0x29b   : > { %v2337_v7 = vadd.f32 %v2336_v12, %v2248_v63 }
 0x29d   : > { %v3113_v54 = vpack.c.bf16 %v2337_v7, %v2335_v14  ;;  %v2448_v61 = vadd.f32 %v2447_v36, %v2337_v7  ;;  %v2486_v59 = vmul.f32 %v2337_v7, %v2337_v7 }
 0x29e   : > { %v2339_v26 = vpop.f32.mrf.mxu0  ;;  %v2161_v45 = vpop.f32.mrf.mxu2 }
 0x29f   : > { %3164 = vst [vmem:[%s4163_s28 + $0x50] sm:$0xff] %v3113_v54   ;;  %v2517_v46 = vadd.f32 %v2516_v60, %v2486_v59  ;;  %v2162_v20 = vadd.f32 %v2161_v45, %v2073_v18  ;;  %v2250_v3 = vpop.f32.mrf.mxu3 }
 0x2a0   : > { %v2074_v35 = vpop.f32.mrf.mxu1 }
 0x2a1   : > { %v2251_v23 = vadd.f32 %v2250_v3, %v2162_v20  ;;  %v2075_v49 = vadd.f32 %v2074_v35, %v4110_v51 }
 0x2a3   : > { %v2340_v44 = vadd.f32 %v2339_v26, %v2251_v23 }
 0x2a5   : > { %v2449_v19 = vadd.f32 %v2448_v61, %v2340_v44  ;;  %v2487_v56 = vmul.f32 %v2340_v44, %v2340_v44 }
 0x2a6   : > { %v2341_v38 = vpop.f32.mrf.mxu0  ;;  %v2163_v30 = vpop.f32.mrf.mxu2 }
 0x2a7   : > { %v2518_v13 = vadd.f32 %v2517_v46, %v2487_v56  ;;  %v2164_v8 = vadd.f32 %v2163_v30, %v2075_v49  ;;  %v2252_v43 = vpop.f32.mrf.mxu3 }
 0x2a8   : > { %v2077_v42 = vpop.f32.mrf.mxu1 }
 0x2a9   : > { %v2253_v25 = vadd.f32 %v2252_v43, %v2164_v8  ;;  %v2078_v24 = vadd.f32 %v2077_v42, %v4115_v53 }
 0x2ab   : > { %v2342_v57 = vadd.f32 %v2341_v38, %v2253_v25 }
 0x2ad   : > { %v3118_v29 = vpack.c.bf16 %v2342_v57, %v2340_v44  ;;  %v2450_v33 = vadd.f32 %v2449_v19, %v2342_v57  ;;  %v2488_v48 = vmul.f32 %v2342_v57, %v2342_v57 }
 0x2ae   : > { %v2344_v40 = vpop.f32.mrf.mxu0  ;;  %v2166_v50 = vpop.f32.mrf.mxu2 }
 0x2af   : > { %3165 = vst [vmem:[%s4163_s28 + $0x58] sm:$0xff] %v3118_v29   ;;  %v2519_v27 = vadd.f32 %v2518_v13, %v2488_v48  ;;  %v2167_v0 = vadd.f32 %v2166_v50, %v2078_v24  ;;  %v2255_v32 = vpop.f32.mrf.mxu3 }
 0x2b0   : > { %v2079_v51 = vpop.f32.mrf.mxu1 }
 0x2b1   : > { %v2256_v5 = vadd.f32 %v2255_v32, %v2167_v0  ;;  %v2080_v1 = vadd.f32 %v2079_v51, %v4120_v6 }
 0x2b3   : > { %v2345_v55 = vadd.f32 %v2344_v40, %v2256_v5 }
 0x2b5   : > { %v2451_v34 = vadd.f32 %v2450_v33, %v2345_v55  ;;  %v2489_v58 = vmul.f32 %v2345_v55, %v2345_v55 }
 0x2b6   : > { %v2346_v52 = vpop.f32.mrf.mxu0  ;;  %v2168_v21 = vpop.f32.mrf.mxu2 }
 0x2b7   : > { %v2520_v11 = vadd.f32 %v2519_v27, %v2489_v58  ;;  %v2169_v9 = vadd.f32 %v2168_v21, %v2080_v1  ;;  %v2257_v62 = vpop.f32.mrf.mxu3 }
 0x2b8   : > { %v2082_v53 = vpop.f32.mrf.mxu1 }
 0x2b9   : > { %v2258_v15 = vadd.f32 %v2257_v62, %v2169_v9  ;;  %v2083_v12 = vadd.f32 %v2082_v53, %v4125_v17 }
 0x2bb   : > { %v2347_v14 = vadd.f32 %v2346_v52, %v2258_v15 }
 0x2bd   : > { %v3123_v36 = vpack.c.bf16 %v2347_v14, %v2345_v55  ;;  %v2452_v47 = vadd.f32 %v2451_v34, %v2347_v14  ;;  %v2490_v37 = vmul.f32 %v2347_v14, %v2347_v14 }
 0x2be   : > { %v2349_v22 = vpop.f32.mrf.mxu0  ;;  %v2171_v60 = vpop.f32.mrf.mxu2 }
 0x2bf   : > { %3166 = vst [vmem:[%s4163_s28 + $0x60] sm:$0xff] %v3123_v36   ;;  %v2521_v4 = vadd.f32 %v2520_v11, %v2490_v37  ;;  %v2172_v10 = vadd.f32 %v2171_v60, %v2083_v12  ;;  %v2260_v39 = vpop.f32.mrf.mxu3 }
 0x2c0   : > { %v2084_v6 = vpop.f32.mrf.mxu1 }
 0x2c1   : > { %v2261_v63 = vadd.f32 %v2260_v39, %v2172_v10  ;;  %v2085_v59 = vadd.f32 %v2084_v6, %v4130_v28 }
 0x2c3   : > { %v2350_v7 = vadd.f32 %v2349_v22, %v2261_v63 }
 0x2c5   : > { %v2453_v54 = vadd.f32 %v2452_v47, %v2350_v7  ;;  %v2491_v61 = vmul.f32 %v2350_v7, %v2350_v7 }
 0x2c6   : > { %v2351_v18 = vpop.f32.mrf.mxu0  ;;  %v2173_v26 = vpop.f32.mrf.mxu2 }
 0x2c7   : > { %v2522_v45 = vadd.f32 %v2521_v4, %v2491_v61  ;;  %v2174_v46 = vadd.f32 %v2173_v26, %v2085_v59  ;;  %v2262_v20 = vpop.f32.mrf.mxu3 }
 0x2c8   : > { %v2087_v17 = vpop.f32.mrf.mxu1 }
 0x2c9   : > { %v2263_v3 = vadd.f32 %v2262_v20, %v2174_v46  ;;  %v2088_v56 = vadd.f32 %v2087_v17, %v4135_v16 }
 0x2cb   : > { %v2352_v35 = vadd.f32 %v2351_v18, %v2263_v3 }
 0x2cd   : > { %v3128_v23 = vpack.c.bf16 %v2352_v35, %v2350_v7  ;;  %v2454_v44 = vadd.f32 %v2453_v54, %v2352_v35  ;;  %v2492_v19 = vmul.f32 %v2352_v35, %v2352_v35 }
 0x2ce   : > { %v2354_v49 = vpop.f32.mrf.mxu0  ;;  %v2176_v38 = vpop.f32.mrf.mxu2 }
 0x2cf   : > { %3167 = vst [vmem:[%s4163_s28 + $0x68] sm:$0xff] %v3128_v23   ;;  %v2523_v30 = vadd.f32 %v2522_v45, %v2492_v19  ;;  %v2177_v13 = vadd.f32 %v2176_v38, %v2088_v56  ;;  %v2265_v8 = vpop.f32.mrf.mxu3 }
 0x2d0   : > { %v2089_v28 = vpop.f32.mrf.mxu1 }
 0x2d1   : > { %v2266_v43 = vadd.f32 %v2265_v8, %v2177_v13  ;;  %v2090_v29 = vadd.f32 %v2089_v28, %v4140_v31 }
 0x2d3   : > { %v2355_v42 = vadd.f32 %v2354_v49, %v2266_v43 }
 0x2d5   : > { %v2455_v25 = vadd.f32 %v2454_v44, %v2355_v42  ;;  %v2493_v57 = vmul.f32 %v2355_v42, %v2355_v42 }
 0x2d6   : > { %v2356_v33 = vpop.f32.mrf.mxu0  ;;  %v2178_v48 = vpop.f32.mrf.mxu2 }
 0x2d7   : > { %v2524_v24 = vadd.f32 %v2523_v30, %v2493_v57  ;;  %v2179_v40 = vadd.f32 %v2178_v48, %v2090_v29  ;;  %v2267_v50 = vpop.f32.mrf.mxu3 }
 0x2d8   : > { %v2092_v16 = vpop.f32.mrf.mxu1 }
 0x2d9   : > { %v2268_v27 = vadd.f32 %v2267_v50, %v2179_v40  ;;  %v2093_v55 = vadd.f32 %v2092_v16, %v4145_v41 }
 0x2db   : > { %v2357_v0 = vadd.f32 %v2356_v33, %v2268_v27 }
 0x2dd   : > { %v3133_v32 = vpack.c.bf16 %v2357_v0, %v2355_v42  ;;  %v2456_v51 = vadd.f32 %v2455_v25, %v2357_v0  ;;  %v2494_v5 = vmul.f32 %v2357_v0, %v2357_v0 }
 0x2de   : > { %v2181_v34 = vpop.f32.mrf.mxu2  ;;  %v2359_v21 = vpop.f32.mrf.mxu0 }
 0x2df   : > { %3168 = vst [vmem:[%s4163_s28 + $0x70] sm:$0xff] %v3133_v32   ;;  %v2525_v58 = vadd.f32 %v2524_v24, %v2494_v5  ;;  %v2182_v1 = vadd.f32 %v2181_v34, %v2093_v55  ;;  %v2270_v52 = vpop.f32.mrf.mxu3 }
 0x2e0   : > { %v2094_v11 = vpop.f32.mrf.mxu1 }
 0x2e1   : > { %v2271_v31 = vadd.f32 %v2270_v52, %v2182_v1  ;;  %v2095_v15 = vadd.f32 %v2094_v11, %v4150_v2 }
 0x2e3   : > { %v2360_v9 = vadd.f32 %v2359_v21, %v2271_v31 }
 0x2e5   : > { %v2457_v62 = vadd.f32 %v2456_v51, %v2360_v9  ;;  %v2495_v53 = vmul.f32 %v2360_v9, %v2360_v9 }
 0x2e6   : > { %v2183_v14 = vpop.f32.mrf.mxu2  ;;  %v2361_v12 = vpop.f32.mrf.mxu0 }
 0x2e7   : > { %v2526_v36 = vadd.f32 %v2525_v58, %v2495_v53  ;;  %v2184_v47 = vadd.f32 %v2183_v14, %v2095_v15  ;;  %v2272_v41 = vpop.f32.mrf.mxu3 }
 0x2e9   : > { %v2273_v37 = vadd.f32 %v2272_v41, %v2184_v47 }
 0x2eb   : > { %v2362_v22 = vadd.f32 %v2361_v12, %v2273_v37 }
 0x2ed   : > { %v3138_v60 = vpack.c.bf16 %v2362_v22, %v2360_v9  ;;  %v2458_v4 = vadd.f32 %v2457_v62, %v2362_v22  ;;  %v2496_v10 = vmul.f32 %v2362_v22, %v2362_v22 }
 0x2ef   : > { %3169 = vst [vmem:[%s4163_s28 + $0x78] sm:$0xff] %v3138_v60   ;;  %v2459_v39 = vrot.slane %v2458_v4, 4  ;;  %v2527_v6 = vadd.f32 %v2526_v36, %v2496_v10 }
 0x2f1   : > { %v2460_v63 = vadd.f32 %v2459_v39, %v2458_v4  ;;  %v2528_v7 = vrot.slane %v2527_v6, 4 }
 0x2f3   : > { %v2461_v54 = vrot.slane %v2460_v63, 2  ;;  %v2529_v61 = vadd.f32 %v2528_v7, %v2527_v6 }
 0x2f5   : > { %v2462_v2 = vadd.f32 %v2461_v54, %v2460_v63  ;;  %v2530_v59 = vrot.slane %v2529_v61, 2 }
 0x2f7   : > { %v2463_v18 = vrot.slane %v2462_v2, 1  ;;  %v2531_v26 = vadd.f32 %v2530_v59, %v2529_v61 }
 0x2f9   : > { %v2532_v45 = vrot.slane %v2531_v26, 1  ;;  %v2464_v46 = vadd.f32 %v2463_v18, %v2462_v2 }
 0x2fb   : > { %v2533_v20 = vadd.f32 %v2532_v45, %v2531_v26 }
 0x2fd   : > { %v2535_v17 = vsel %vm633_vm0, %v2464_v46, %v2533_v20 }
 0x2fe   : > { %2536 = vst [vmem:[%s211_s30] sm:$0x3] %v2535_v17 }
 0x2ff PF: > { %s15_s15 = sadd.s32 1, %s3213_s15  }
 0x300   : > { %p12_p5 = scmp.ge.s32.totalorder %s15_s15, 4  }
 0x302   :  { %14 = sbr.rel (!%p12_p5) target bundleno = 1 (0x1), region = 74 }

</bundles_post_ra>
